<compile_context>
chip_gen: v7x
topology: tpu7x:2x2x1
jax: 0.10.0
libtpu: 0.0.40
codegen_flags: <defaults>
</compile_context>

<pallas_src>
import jax
import jax.numpy as jnp
import numpy as np
from jax import lax
from jax.experimental import pallas as pl
from jax.experimental.pallas import tpu as pltpu


# ---------------------------------------------------------------------------
# Kernel
# ---------------------------------------------------------------------------
def _convx_kernel(x_ref, w1_ref, w2_ref, wd_ref, b1_ref, bo_ref,
                  o_ref, hpad_ref):
    B, Dp2, HCin = x_ref.shape
    D = Dp2 - 2
    HCout = o_ref.shape[-1]
    M = B * D
    f32 = jnp.float32
    bf16 = jnp.bfloat16

    # Row-shifted (d-direction) views of the row-padded bf16 input.  The
    # h-direction halo is already folded into the banded weights, so no
    # zero-padding scratch is needed for the input.
    x_lo = x_ref[:, 0:D, :].reshape(M, HCin)
    x_mid = x_ref[:, 1:D + 1, :].reshape(M, HCin)
    x_hi = x_ref[:, 2:D + 2, :].reshape(M, HCin)

    # conv1 (3x3 over D,H, bias=False) as 3 banded matmuls with K = H*Cin;
    # BN1 scale is pre-folded into w1, BN1 shift is the lane-dense b1_ref.
    acc1 = jnp.dot(x_lo, w1_ref[0], preferred_element_type=f32)
    acc1 += jnp.dot(x_mid, w1_ref[1], preferred_element_type=f32)
    acc1 += jnp.dot(x_hi, w1_ref[2], preferred_element_type=f32)
    h1 = jnp.maximum(acc1 + b1_ref[...], 0.0).astype(bf16)   # (M, H*Cout)

    # Stage h1 (already bf16) into the row-padded scratch for conv2.  Only
    # the two halo rows are zeroed, and they are zeroed every step (the grid
    # axis is 'parallel', so a program_id==0-only init would be wrong under
    # megacore splitting).
    zrow = jnp.zeros((B, 1, HCout), bf16)
    hpad_ref[:, 0:1, :] = zrow
    hpad_ref[:, D + 1:D + 2, :] = zrow
    hpad_ref[:, 1:D + 1, :] = h1.reshape(B, D, HCout)

    h_lo = hpad_ref[:, 0:D, :].reshape(M, HCout)
    h_hi = hpad_ref[:, 2:D + 2, :].reshape(M, HCout)

    # Residual 1x1 conv (BNd scale folded into wd) initialises the
    # accumulator; conv2's banded matmuls (BN2 scale folded into w2)
    # accumulate on top.  bo_ref holds the folded (b2 + bd) shift.
    acc2 = jnp.dot(x_mid, wd_ref[...], preferred_element_type=f32)
    acc2 += jnp.dot(h_lo, w2_ref[0], preferred_element_type=f32)
    acc2 += jnp.dot(h1, w2_ref[1], preferred_element_type=f32)
    acc2 += jnp.dot(h_hi, w2_ref[2], preferred_element_type=f32)

    out = jnp.maximum(acc2 + bo_ref[...], 0.0)                # (M, H*Cout)
    o_ref[...] = out.reshape(B, D, HCout).astype(o_ref.dtype)


# ---------------------------------------------------------------------------
# Parameter folding (one-time, cached across calls)
# ---------------------------------------------------------------------------
def _band_weights(w, H, scale):
    """Banded (block-Toeplitz) weight matrix for a SAME 3-tap conv along H.

    w:     (3, 3, Ci, Co)  indexed [kd, kh, ci, co]
    scale: (Co,)           folded BatchNorm scale
    Returns (3, H*Ci, H*Co) with
      band[kd, hi*Ci + ci, ho*Co + co] = w[kd, hi - ho + 1, ci, co] * scale[co]
    for hi - ho in {-1, 0, 1}, zero otherwise.
    """
    _, _, Ci, Co = w.shape
    ws = w * scale.reshape(1, 1, 1, Co)
    hi = jnp.arange(H)[:, None]
    ho = jnp.arange(H)[None, :]
    j = hi - ho + 1
    valid = ((j >= 0) & (j <= 2)).astype(ws.dtype)
    g = ws[:, jnp.clip(j, 0, 2)]                        # (3, H, H, Ci, Co)
    g = g * valid[None, :, :, None, None]
    g = jnp.transpose(g, (0, 1, 3, 2, 4))               # (3, hi, ci, ho, co)
    return g.reshape(3, H * Ci, H * Co)


def prepare_kernel_params(params, H):
    """One-time prep per parameter set: banded / BN-folded bf16 weights."""
    w1, w2, wd, s1, b1, s2, b2, sd, bd = params
    Cin, Cout = wd.shape
    bf16 = jnp.bfloat16
    w1b = _band_weights(w1, H, s1).astype(bf16)                    # (3,HCin,HCout)
    w2b = _band_weights(w2, H, s2).astype(bf16)                    # (3,HCout,HCout)
    wdb = jnp.kron(jnp.eye(H, dtype=wd.dtype),
                   wd * sd.reshape(1, Cout)).astype(bf16)          # (HCin,HCout)
    b1v = jnp.tile(b1, H).reshape(1, H * Cout).astype(jnp.float32)
    bov = jnp.tile(b2 + bd, H).reshape(1, H * Cout).astype(jnp.float32)
    return w1b, w2b, wdb, b1v, bov


# ---------------------------------------------------------------------------
# Per-generation sizing (trace-time, Python only)
# ---------------------------------------------------------------------------
def _num_tensorcores():
    try:
        kind = jax.devices()[0].device_kind.lower()
    except Exception:
        return 1
    # v7x (and v4/v5p megacore) present two TensorCores per Pallas device.
    if any(t in kind for t in ("v7", "7x", "v4", "v5p")):
        return 2
    return 1


def _vmem_budget_bytes():
    cap = None
    try:
        info = pltpu.get_tpu_info()
        cap = int(getattr(info, "vmem_capacity_bytes", 0)) or None
    except Exception:
        cap = None
    if cap is None:
        # Fall back on the device kind: v7x has 64 MiB/TC, older gens 128 MiB.
        try:
            kind = jax.devices()[0].device_kind.lower()
        except Exception:
            kind = ""
        cap = (64 if ("7" in kind) else 128) * 1024 * 1024
    # Leave DMA / compiler headroom; cap well under physical on all gens.
    return min(int(cap) * 3 // 4, 96 * 1024 * 1024)


def _pick_b_slab(Btot, D, HCin, HCout, budget_bytes, num_cores):
    """Largest divisor of Btot targeting M ~= 512 rows that fits VMEM and
    keeps the grid extent a multiple of the TensorCore count."""
    def step_bytes(b):
        return (2 * b * (D + 2) * HCin * 2      # bf16 input tile, 2 buffers
                + 2 * b * D * HCout * 2         # bf16 output tile, 2 buffers
                + b * (D + 2) * HCout * 2)      # bf16 h1 scratch
    weight_bytes = 2 * ((3 * HCin + 3 * HCout + HCin) * HCout * 2
                        + 2 * HCout * 4)        # resident (double-buffered)
    avail = max(budget_bytes - weight_bytes, 1 << 20)
    target_b = max(1, -(-512 // D))             # ~512 rows per matmul
    divisors = [b for b in range(1, Btot + 1) if Btot % b == 0]
    fits = [b for b in divisors
            if b <= target_b and step_bytes(b) <= avail] or [1]
    # Prefer grid extents that shard evenly over all TensorCores (v7x).
    even = [b for b in fits if (Btot // b) % num_cores == 0]
    if even:
        fits = even
    return max(fits)


# ---------------------------------------------------------------------------
# Forward wrapper (jitted; transpose + pad + bf16 cast fuse into one pass)
# ---------------------------------------------------------------------------
def _convx_forward(x, w1b, w2b, wdb, b1v, bov):
    """x: (N, Cin, D, H, W) NCDHW float32; returns (N, Cout, D, H, W) f32."""
    N, Cin, D, H, W = x.shape
    HCin = H * Cin
    HCout = b1v.shape[-1]
    Cout = HCout // H
    Btot = N * W

    num_cores = _num_tensorcores()
    budget = _vmem_budget_bytes()
    b_slab = _pick_b_slab(Btot, D, HCin, HCout, budget, num_cores)
    assert Btot % b_slab == 0, (Btot, b_slab)

    # NCDHW -> (N*W, D, H, Cin) slabs (conv kernel (3,3,1)/pad (1,1,0) acts as
    # a 2D 3x3 conv over (D,H) independently per (n,w)); pad the D axis once,
    # flatten (H, Cin) onto the lane axis, and cast to bf16 — all fused into
    # a single XLA pass under jit.
    xs = jnp.transpose(x, (0, 4, 2, 3, 1)).reshape(Btot, D, H, Cin)
    xp = jnp.pad(xs, ((0, 0), (1, 1), (0, 0), (0, 0)))
    xp = xp.reshape(Btot, D + 2, HCin).astype(jnp.bfloat16)

    def rep(shape):
        nd = len(shape)
        return pl.BlockSpec(shape, lambda i, nd=nd: (0,) * nd)

    out = pl.pallas_call(
        _convx_kernel,
        out_shape=jax.ShapeDtypeStruct((Btot, D, HCout), jnp.bfloat16),
        grid=(Btot // b_slab,),
        in_specs=[pl.BlockSpec((b_slab, D + 2, HCin), lambda i: (i, 0, 0)),
                  rep(w1b.shape), rep(w2b.shape), rep(wdb.shape),
                  rep(b1v.shape), rep(bov.shape)],
        out_specs=pl.BlockSpec((b_slab, D, HCout), lambda i: (i, 0, 0)),
        scratch_shapes=[pltpu.VMEM((b_slab, D + 2, HCout), jnp.bfloat16)],
        compiler_params=pltpu.CompilerParams(
            dimension_semantics=("parallel",),
            vmem_limit_bytes=budget),
    )(xp, w1b, w2b, wdb, b1v, bov)

    # (N*W, D, H*Cout) -> (N, Cout, D, H, W); the f32 up-cast fuses into
    # the output transpose pass.
    out = out.reshape(N, W, D, H, Cout).astype(x.dtype)
    return jnp.transpose(out, (0, 4, 2, 3, 1))


unet3d_convx = jax.jit(_convx_forward)


# ---------------------------------------------------------------------------
# Reference / test harness
# ---------------------------------------------------------------------------
def _fold_bn(gamma, beta, mean, var, eps=1e-5):
    scale = gamma / jnp.sqrt(var + eps)
    return scale, beta - mean * scale


def make_params(key, Cin, Cout):
    ks = jax.random.split(key, 6)
    w1 = 0.1 * jax.random.normal(ks[0], (3, 3, Cin, Cout), jnp.float32)
    w2 = 0.1 * jax.random.normal(ks[1], (3, 3, Cout, Cout), jnp.float32)
    wd = 0.1 * jax.random.normal(ks[2], (Cin, Cout), jnp.float32)

    def bn(k):
        k1, k2, k3, k4 = jax.random.split(k, 4)
        gamma = jax.random.uniform(k1, (Cout,), jnp.float32, 0.5, 1.5)
        beta = 0.1 * jax.random.normal(k2, (Cout,), jnp.float32)
        mean = 0.1 * jax.random.normal(k3, (Cout,), jnp.float32)
        var = jax.random.uniform(k4, (Cout,), jnp.float32, 0.5, 1.5)
        return _fold_bn(gamma, beta, mean, var)

    s1, b1 = bn(ks[3])
    s2, b2 = bn(ks[4])
    sd, bd = bn(ks[5])
    return (w1, w2, wd, s1, b1, s2, b2, sd, bd)


def ref_forward(x, params):
    """Pure-JAX (lax.conv) reference of the same forward pass, in f32."""
    w1, w2, wd, s1, b1, s2, b2, sd, bd = params
    N, Cin, D, H, W = x.shape
    Cout = w1.shape[-1]
    xs = jnp.transpose(x, (0, 4, 2, 3, 1)).reshape(N * W, D, H, Cin)
    dn = ('NHWC', 'HWIO', 'NHWC')
    h = lax.conv_general_dilated(xs, w1, (1, 1), 'SAME', dimension_numbers=dn)
    h = jnp.maximum(h * s1 + b1, 0.0)
    h = lax.conv_general_dilated(h, w2, (1, 1), 'SAME', dimension_numbers=dn)
    h = h * s2 + b2
    r = lax.conv_general_dilated(xs, wd.reshape(1, 1, Cin, Cout), (1, 1),
                                 'SAME', dimension_numbers=dn)
    r = r * sd + bd
    out = jnp.maximum(h + r, 0.0)
    return jnp.transpose(out.reshape(N, W, D, H, Cout), (0, 4, 2, 3, 1))


if __name__ == "__main__":
    # Small shapes: in_size=16, out_size=32, spatial (D,H,W)=(16,16,4), N=2.
    N, Cin, Cout = 2, 16, 32
    D, H, W = 16, 16, 4

    key = jax.random.PRNGKey(0)
    kx, kp = jax.random.split(key)
    x = jax.random.normal(kx, (N, Cin, D, H, W), jnp.float32)
    params = make_params(kp, Cin, Cout)

    # One-time weight banding / BN folding, cached across forward calls.
    prepared = prepare_kernel_params(params, H)
    prepared = jax.tree_util.tree_map(jax.block_until_ready, prepared)

    out = jax.block_until_ready(unet3d_convx(x, *prepared))
    ref = jax.block_until_ready(ref_forward(x, params))

    assert out.shape == (N, Cout, D, H, W), out.shape
    # Kernel uses bf16 MXU operands and a bf16 kernel output (per perf
    # review) with f32 accumulation, compared against an all-f32 reference
    # -> loosened tolerance.
    np.testing.assert_allclose(np.asarray(out), np.asarray(ref),
                               rtol=5e-2, atol=5e-2)
    print("KERNEL_OK")
</pallas_src>

<mosaic_0001>
module attributes {stable_mosaic.version = 11 : i64} {
  func.func @_convx_kernel(%arg0: i32, %arg1: memref<8x18x256xbf16, #tpu.memory_space<vmem>>, %arg2: memref<3x256x512xbf16, #tpu.memory_space<vmem>>, %arg3: memref<3x512x512xbf16, #tpu.memory_space<vmem>>, %arg4: memref<256x512xbf16, #tpu.memory_space<vmem>>, %arg5: memref<1x512xf32, #tpu.memory_space<vmem>>, %arg6: memref<1x512xf32, #tpu.memory_space<vmem>>, %arg7: memref<8x16x512xbf16, #tpu.memory_space<vmem>>, %arg8: memref<8x18x512xbf16, #tpu.memory_space<vmem>>) attributes {dimension_semantics = [#tpu.dimension_semantics<parallel>], iteration_bounds = array<i64: 1>, scalar_prefetch = 0 : i64, scratch_operands = 1 : i64, tpu.core_type = #tpu.core_type<tc>, window_params = [{transform_indices = @transform_0, window_bounds = array<i64: 8, 18, 256>}, {pipeline_mode = #tpu.pipeline_mode<synchronous>, transform_indices = @transform_1, window_bounds = array<i64: 3, 256, 512>}, {pipeline_mode = #tpu.pipeline_mode<synchronous>, transform_indices = @transform_2, window_bounds = array<i64: 3, 512, 512>}, {pipeline_mode = #tpu.pipeline_mode<synchronous>, transform_indices = @transform_3, window_bounds = array<i64: 256, 512>}, {pipeline_mode = #tpu.pipeline_mode<synchronous>, transform_indices = @transform_4, window_bounds = array<i64: 1, 512>}, {pipeline_mode = #tpu.pipeline_mode<synchronous>, transform_indices = @transform_5, window_bounds = array<i64: 1, 512>}, {transform_indices = @transform_6, window_bounds = array<i64: 8, 16, 512>}]} {
    %c0 = arith.constant 0 : index
    %c0_0 = arith.constant 0 : index
    %c0_1 = arith.constant 0 : index
    %0 = vector.load %arg1[%c0, %c0_0, %c0_1] : memref<8x18x256xbf16, #tpu.memory_space<vmem>>, vector<8x16x256xbf16>
    %1 = vector.shape_cast %0 : vector<8x16x256xbf16> to vector<128x256xbf16>
    %c0_2 = arith.constant 0 : index
    %c1 = arith.constant 1 : index
    %c0_3 = arith.constant 0 : index
    %2 = vector.load %arg1[%c0_2, %c1, %c0_3] : memref<8x18x256xbf16, #tpu.memory_space<vmem>>, vector<8x16x256xbf16>
    %3 = vector.shape_cast %2 : vector<8x16x256xbf16> to vector<128x256xbf16>
    %c0_4 = arith.constant 0 : index
    %c2 = arith.constant 2 : index
    %c0_5 = arith.constant 0 : index
    %4 = vector.load %arg1[%c0_4, %c2, %c0_5] : memref<8x18x256xbf16, #tpu.memory_space<vmem>>, vector<8x16x256xbf16>
    %5 = vector.shape_cast %4 : vector<8x16x256xbf16> to vector<128x256xbf16>
    %c0_6 = arith.constant 0 : index
    %c0_7 = arith.constant 0 : index
    %c0_8 = arith.constant 0 : index
    %6 = vector.load %arg2[%c0_6, %c0_7, %c0_8] : memref<3x256x512xbf16, #tpu.memory_space<vmem>>, vector<1x256x512xbf16>
    %7 = vector.shape_cast %6 : vector<1x256x512xbf16> to vector<256x512xbf16>
    %cst = arith.constant dense<0.000000e+00> : vector<128x512xf32>
    %8 = tpu.matmul %1, %7, %cst {dimension_numbers = #tpu.dot_dimension_numbers<[1], [0], [0], [1], [0, 0, 1, 1], [], []>} : vector<128x256xbf16>, vector<256x512xbf16>, vector<128x512xf32> -> vector<128x512xf32>
    %c1_9 = arith.constant 1 : index
    %c0_10 = arith.constant 0 : index
    %c0_11 = arith.constant 0 : index
    %9 = vector.load %arg2[%c1_9, %c0_10, %c0_11] : memref<3x256x512xbf16, #tpu.memory_space<vmem>>, vector<1x256x512xbf16>
    %10 = vector.shape_cast %9 : vector<1x256x512xbf16> to vector<256x512xbf16>
    %cst_12 = arith.constant dense<0.000000e+00> : vector<128x512xf32>
    %11 = tpu.matmul %3, %10, %cst_12 {dimension_numbers = #tpu.dot_dimension_numbers<[1], [0], [0], [1], [0, 0, 1, 1], [], []>} : vector<128x256xbf16>, vector<256x512xbf16>, vector<128x512xf32> -> vector<128x512xf32>
    %12 = arith.addf %8, %11 : vector<128x512xf32>
    %c2_13 = arith.constant 2 : index
    %c0_14 = arith.constant 0 : index
    %c0_15 = arith.constant 0 : index
    %13 = vector.load %arg2[%c2_13, %c0_14, %c0_15] : memref<3x256x512xbf16, #tpu.memory_space<vmem>>, vector<1x256x512xbf16>
    %14 = vector.shape_cast %13 : vector<1x256x512xbf16> to vector<256x512xbf16>
    %cst_16 = arith.constant dense<0.000000e+00> : vector<128x512xf32>
    %15 = tpu.matmul %5, %14, %cst_16 {dimension_numbers = #tpu.dot_dimension_numbers<[1], [0], [0], [1], [0, 0, 1, 1], [], []>} : vector<128x256xbf16>, vector<256x512xbf16>, vector<128x512xf32> -> vector<128x512xf32>
    %16 = arith.addf %12, %15 : vector<128x512xf32>
    %c0_17 = arith.constant 0 : index
    %c0_18 = arith.constant 0 : index
    %17 = vector.load %arg5[%c0_17, %c0_18] : memref<1x512xf32, #tpu.memory_space<vmem>>, vector<1x512xf32>
    %18 = vector.broadcast %17 : vector<1x512xf32> to vector<128x512xf32>
    %19 = arith.addf %16, %18 : vector<128x512xf32>
    %cst_19 = arith.constant 0.000000e+00 : f32
    %20 = vector.broadcast %cst_19 : f32 to vector<128x512xf32>
    %21 = arith.maximumf %19, %20 : vector<128x512xf32>
    %22 = arith.truncf %21 : vector<128x512xf32> to vector<128x512xbf16>
    %cst_20 = arith.constant 0.000000e+00 : bf16
    %23 = vector.broadcast %cst_20 : bf16 to vector<8x1x512xbf16>
    %c0_21 = arith.constant 0 : index
    %c0_22 = arith.constant 0 : index
    %c0_23 = arith.constant 0 : index
    %24 = vector.load %arg8[%c0_21, %c0_22, %c0_23] : memref<8x18x512xbf16, #tpu.memory_space<vmem>>, vector<8x1x512xbf16>
    tpu.vector_store %arg8[%c0_21, %c0_22, %c0_23], %23 {strides = array<i32>} : memref<8x18x512xbf16, #tpu.memory_space<vmem>>, vector<8x1x512xbf16>,
    %c0_24 = arith.constant 0 : index
    %c17 = arith.constant 17 : index
    %c0_25 = arith.constant 0 : index
    %25 = vector.load %arg8[%c0_24, %c17, %c0_25] : memref<8x18x512xbf16, #tpu.memory_space<vmem>>, vector<8x1x512xbf16>
    tpu.vector_store %arg8[%c0_24, %c17, %c0_25], %23 {strides = array<i32>} : memref<8x18x512xbf16, #tpu.memory_space<vmem>>, vector<8x1x512xbf16>,
    %26 = vector.shape_cast %22 : vector<128x512xbf16> to vector<8x16x512xbf16>
    %c0_26 = arith.constant 0 : index
    %c1_27 = arith.constant 1 : index
    %c0_28 = arith.constant 0 : index
    %27 = vector.load %arg8[%c0_26, %c1_27, %c0_28] : memref<8x18x512xbf16, #tpu.memory_space<vmem>>, vector<8x16x512xbf16>
    tpu.vector_store %arg8[%c0_26, %c1_27, %c0_28], %26 {strides = array<i32>} : memref<8x18x512xbf16, #tpu.memory_space<vmem>>, vector<8x16x512xbf16>,
    %c0_29 = arith.constant 0 : index
    %c0_30 = arith.constant 0 : index
    %c0_31 = arith.constant 0 : index
    %28 = vector.load %arg8[%c0_29, %c0_30, %c0_31] : memref<8x18x512xbf16, #tpu.memory_space<vmem>>, vector<8x16x512xbf16>
    %29 = vector.shape_cast %28 : vector<8x16x512xbf16> to vector<128x512xbf16>
    %c0_32 = arith.constant 0 : index
    %c2_33 = arith.constant 2 : index
    %c0_34 = arith.constant 0 : index
    %30 = vector.load %arg8[%c0_32, %c2_33, %c0_34] : memref<8x18x512xbf16, #tpu.memory_space<vmem>>, vector<8x16x512xbf16>
    %31 = vector.shape_cast %30 : vector<8x16x512xbf16> to vector<128x512xbf16>
    %c0_35 = arith.constant 0 : index
    %c0_36 = arith.constant 0 : index
    %32 = vector.load %arg4[%c0_35, %c0_36] : memref<256x512xbf16, #tpu.memory_space<vmem>>, vector<256x512xbf16>
    %cst_37 = arith.constant dense<0.000000e+00> : vector<128x512xf32>
    %33 = tpu.matmul %3, %32, %cst_37 {dimension_numbers = #tpu.dot_dimension_numbers<[1], [0], [0], [1], [0, 0, 1, 1], [], []>} : vector<128x256xbf16>, vector<256x512xbf16>, vector<128x512xf32> -> vector<128x512xf32>
    %c0_38 = arith.constant 0 : index
    %c0_39 = arith.constant 0 : index
    %c0_40 = arith.constant 0 : index
    %34 = vector.load %arg3[%c0_38, %c0_39, %c0_40] : memref<3x512x512xbf16, #tpu.memory_space<vmem>>, vector<1x512x512xbf16>
    %35 = vector.shape_cast %34 : vector<1x512x512xbf16> to vector<512x512xbf16>
    %cst_41 = arith.constant dense<0.000000e+00> : vector<128x512xf32>
    %36 = tpu.matmul %29, %35, %cst_41 {dimension_numbers = #tpu.dot_dimension_numbers<[1], [0], [0], [1], [0, 0, 1, 1], [], []>} : vector<128x512xbf16>, vector<512x512xbf16>, vector<128x512xf32> -> vector<128x512xf32>
    %37 = arith.addf %33, %36 : vector<128x512xf32>
    %c1_42 = arith.constant 1 : index
    %c0_43 = arith.constant 0 : index
    %c0_44 = arith.constant 0 : index
    %38 = vector.load %arg3[%c1_42, %c0_43, %c0_44] : memref<3x512x512xbf16, #tpu.memory_space<vmem>>, vector<1x512x512xbf16>
    %39 = vector.shape_cast %38 : vector<1x512x512xbf16> to vector<512x512xbf16>
    %cst_45 = arith.constant dense<0.000000e+00> : vector<128x512xf32>
    %40 = tpu.matmul %22, %39, %cst_45 {dimension_numbers = #tpu.dot_dimension_numbers<[1], [0], [0], [1], [0, 0, 1, 1], [], []>} : vector<128x512xbf16>, vector<512x512xbf16>, vector<128x512xf32> -> vector<128x512xf32>
    %41 = arith.addf %37, %40 : vector<128x512xf32>
    %c2_46 = arith.constant 2 : index
    %c0_47 = arith.constant 0 : index
    %c0_48 = arith.constant 0 : index
    %42 = vector.load %arg3[%c2_46, %c0_47, %c0_48] : memref<3x512x512xbf16, #tpu.memory_space<vmem>>, vector<1x512x512xbf16>
    %43 = vector.shape_cast %42 : vector<1x512x512xbf16> to vector<512x512xbf16>
    %cst_49 = arith.constant dense<0.000000e+00> : vector<128x512xf32>
    %44 = tpu.matmul %31, %43, %cst_49 {dimension_numbers = #tpu.dot_dimension_numbers<[1], [0], [0], [1], [0, 0, 1, 1], [], []>} : vector<128x512xbf16>, vector<512x512xbf16>, vector<128x512xf32> -> vector<128x512xf32>
    %45 = arith.addf %41, %44 : vector<128x512xf32>
    %c0_50 = arith.constant 0 : index
    %c0_51 = arith.constant 0 : index
    %46 = vector.load %arg6[%c0_50, %c0_51] : memref<1x512xf32, #tpu.memory_space<vmem>>, vector<1x512xf32>
    %47 = vector.broadcast %46 : vector<1x512xf32> to vector<128x512xf32>
    %48 = arith.addf %45, %47 : vector<128x512xf32>
    %cst_52 = arith.constant 0.000000e+00 : f32
    %49 = vector.broadcast %cst_52 : f32 to vector<128x512xf32>
    %50 = arith.maximumf %48, %49 : vector<128x512xf32>
    %51 = vector.shape_cast %50 : vector<128x512xf32> to vector<8x16x512xf32>
    %52 = arith.truncf %51 : vector<8x16x512xf32> to vector<8x16x512xbf16>
    %c0_53 = arith.constant 0 : index
    %c0_54 = arith.constant 0 : index
    %c0_55 = arith.constant 0 : index
    %53 = vector.load %arg7[%c0_53, %c0_54, %c0_55] : memref<8x16x512xbf16, #tpu.memory_space<vmem>>, vector<8x16x512xbf16>
    tpu.vector_store %arg7[%c0_53, %c0_54, %c0_55], %52 {strides = array<i32>} : memref<8x16x512xbf16, #tpu.memory_space<vmem>>, vector<8x16x512xbf16>,
    return
  }
  func.func @transform_0(%arg0: i32) -> (i32, i32, i32) {
    %c0_i32 = arith.constant 0 : i32
    %c0_i32_0 = arith.constant 0 : i32
    %c0_i32_1 = arith.constant 0 : i32
    return %arg0, %c0_i32, %c0_i32_0 : i32, i32, i32
  }
  func.func @transform_1(%arg0: i32) -> (i32, i32, i32) {
    %c0_i32 = arith.constant 0 : i32
    %c0_i32_0 = arith.constant 0 : i32
    %c0_i32_1 = arith.constant 0 : i32
    %c0_i32_2 = arith.constant 0 : i32
    return %c0_i32, %c0_i32_0, %c0_i32_1 : i32, i32, i32
  }
  func.func @transform_2(%arg0: i32) -> (i32, i32, i32) {
    %c0_i32 = arith.constant 0 : i32
    %c0_i32_0 = arith.constant 0 : i32
    %c0_i32_1 = arith.constant 0 : i32
    %c0_i32_2 = arith.constant 0 : i32
    return %c0_i32, %c0_i32_0, %c0_i32_1 : i32, i32, i32
  }
  func.func @transform_3(%arg0: i32) -> (i32, i32) {
    %c0_i32 = arith.constant 0 : i32
    %c0_i32_0 = arith.constant 0 : i32
    %c0_i32_1 = arith.constant 0 : i32
    return %c0_i32, %c0_i32_0 : i32, i32
  }
  func.func @transform_4(%arg0: i32) -> (i32, i32) {
    %c0_i32 = arith.constant 0 : i32
    %c0_i32_0 = arith.constant 0 : i32
    %c0_i32_1 = arith.constant 0 : i32
    return %c0_i32, %c0_i32_0 : i32, i32
  }
  func.func @transform_5(%arg0: i32) -> (i32, i32) {
    %c0_i32 = arith.constant 0 : i32
    %c0_i32_0 = arith.constant 0 : i32
    %c0_i32_1 = arith.constant 0 : i32
    return %c0_i32, %c0_i32_0 : i32, i32
  }
  func.func @transform_6(%arg0: i32) -> (i32, i32, i32) {
    %c0_i32 = arith.constant 0 : i32
    %c0_i32_0 = arith.constant 0 : i32
    %c0_i32_1 = arith.constant 0 : i32
    return %arg0, %c0_i32, %c0_i32_0 : i32, i32, i32
  }
}

</mosaic_0001>

<bundles_post_ra>
// kernel: _convx_forward.1
= control target key start
LH: loop header
LB: loop body
LE: loop exit
PB: predicated region body
PF: predicated region fallthrough
CT: control target
= control target key end

     0   :  { %11 = vsyncpa [#allocation4], 0  ;;  %s12687_s0 = inlined_call_operand.hbm [shape: bf16[8,18,256], index: 0, kind: input, shape index: {}]   ;;  %s12688_s1 = inlined_call_operand.hbm [shape: bf16[3,256,512], index: 1, kind: input, shape index: {}]   ;;  %s12689_s2 = inlined_call_operand.hbm [shape: bf16[3,512,512], index: 2, kind: input, shape index: {}]   ;;  %s12690_s3 = inlined_call_operand.hbm [shape: bf16[256,512], index: 3, kind: input, shape index: {}]   ;;  %s12691_s4 = inlined_call_operand.hbm [shape: f32[1,512], index: 4, kind: input, shape index: {}]   ;;  %s12692_s5 = inlined_call_operand.hbm [shape: f32[1,512], index: 5, kind: input, shape index: {}]   ;;  %s12693_s6 = inlined_call_operand.hbm [shape: bf16[8,16,512], index: 6, kind: output, shape index: {}]  }
   0x1   :  { %12 = vsyncpa [#allocation7], 0 }
   0x2   :  { %13 = vsyncpa [#allocation10], 0 }
   0x3   :  { %14 = vsyncpa [#allocation13], 0 }
   0x4   :  { %15 = vsyncpa [#allocation5], 0  ;;  %s11251_s21 = smov [#allocation6]   ;;  %s11087_s25 = scalar_lea.hbm %s12688_s1, 24576 }
   0x5   :  { %s33_s22 = sshll.u32 %s11251_s21, 4  ;;  %p11088_p0 = scmp.ne.s32.totalorder %s12688_s1, %s11087_s25  ;;  %s34_s22 = int_to_ptr.vmem [resolvable:$true] %s33_s22 }
   0x6   :  { %p11091_p1 = scmp.lt.u32.totalorder %s11087_s25, %s12688_s1 }
   0x8   :  { %p11093_p2 = pnand %p11091_p1, %p11088_p0 }
   0xa   :  { %11096 = shalt.err (!%p11093_p2)
}
   0xb   :  { %s11097_s30 = scalar_lea.vmem %s34_s22, 24576  ;;  %p11102_p4 = scmp.lt.s32.totalorder %s34_s22, %s34_s22 }
   0xc   :  { %p11098_p3 = scmp.ne.s32.totalorder %s34_s22, %s11097_s30  ;;  %p11103_p5 = scmp.lt.s32.totalorder %s11097_s30, %s11097_s30 }
   0xe   :  { %p11104_p6 = por %p11103_p5, %p11102_p4 }
  0x10   :  { %p11105_p7 = pnand %p11104_p6, %p11098_p3 }
  0x12   :  { %11108 = shalt.err (!%p11105_p7)
}
  0x13   :  { %s11252_s7 = smov 256   ;;  %s11253_s8 = smov 16  }
  0x14   :  { %39 = dma.hbm_to_vmem [thread:$0]  %s12688_s1, 24576, %s34_s22, [#allocation7], %s11252_s7, %s11252_s7, %s11253_s8  }
  0x15   :  { %s11254_s11 = smov [#allocation9]   ;;  %s11255_s13 = smov [#allocation3]  }
  0x16   :  { %s57_s12 = sshll.u32 %s11254_s11, 4  ;;  %s21_s14 = sshll.u32 %s11255_s13, 4  ;;  %s58_s12 = int_to_ptr.vmem [resolvable:$true] %s57_s12  ;;  %s22_s14 = int_to_ptr.vmem [resolvable:$true] %s21_s14 }
  0x17   :  { %s11109_s17 = scalar_lea.hbm %s12690_s3, 8192 }
  0x18   :  { %p11110_p8 = scmp.ne.s32.totalorder %s12690_s3, %s11109_s17  ;;  %p11113_p9 = scmp.lt.u32.totalorder %s11109_s17, %s12690_s3 }
  0x1a   :  { %p11115_p10 = pnand %p11113_p9, %p11110_p8 }
  0x1c   :  { %11118 = shalt.err (!%p11115_p10)
}
  0x1d   :  { %s11119_s1 = scalar_lea.vmem %s58_s12, 8192  ;;  %p11124_p12 = scmp.lt.s32.totalorder %s58_s12, %s58_s12 }
  0x1e   :  { %p11120_p11 = scmp.ne.s32.totalorder %s58_s12, %s11119_s1  ;;  %p11125_p13 = scmp.lt.s32.totalorder %s11119_s1, %s11119_s1 }
  0x20   :  { %p11126_p0 = por %p11125_p13, %p11124_p12 }
  0x22   :  { %p11127_p1 = pnand %p11126_p0, %p11120_p11 }
  0x24   :  { %11130 = shalt.err (!%p11127_p1)
}
  0x25   :  { %63 = dma.hbm_to_vmem [thread:$0]  %s12690_s3, 8192, %s58_s12, [#allocation10], %s11252_s7, %s11252_s7, %s11253_s8  }
  0x26   :  { %s11131_s26 = scalar_lea.hbm %s12687_s0, 3072 }
  0x27   :  { %p11132_p2 = scmp.ne.s32.totalorder %s12687_s0, %s11131_s26  ;;  %p11135_p3 = scmp.lt.u32.totalorder %s11131_s26, %s12687_s0 }
  0x29   :  { %p11137_p4 = pnand %p11135_p3, %p11132_p2 }
  0x2b   :  { %11140 = shalt.err (!%p11137_p4)
}
  0x2c   :  { %s11141_s9 = scalar_lea.vmem %s22_s14, 3072  ;;  %p11146_p6 = scmp.lt.s32.totalorder %s22_s14, %s22_s14 }
  0x2d   :  { %p11142_p5 = scmp.ne.s32.totalorder %s22_s14, %s11141_s9  ;;  %p11147_p7 = scmp.lt.s32.totalorder %s11141_s9, %s11141_s9 }
  0x2f   :  { %p11148_p8 = por %p11147_p7, %p11146_p6 }
  0x31   :  { %p11149_p9 = pnand %p11148_p8, %p11142_p5 }
  0x33   :  { %11152 = shalt.err (!%p11149_p9)
}
  0x34   :  { %s11256_s3 = smov 128   ;;  %s11257_s10 = smov 8  }
  0x35   :  { %27 = dma.hbm_to_vmem [thread:$0]  %s12687_s0, 3072, %s22_s14, [#allocation4], %s11256_s3, %s11256_s3, %s11257_s10  }
  0x36   :  { %s11258_s13 = smov [#allocation8]   ;;  %s11259_s16 = smov [#allocation11]  }
  0x37   :  { %s45_s15 = sshll.u32 %s11258_s13, 4  ;;  %s70_s17 = sshll.u32 %s11259_s16, 4  ;;  %s46_s15 = int_to_ptr.vmem [resolvable:$true] %s45_s15  ;;  %s71_s17 = int_to_ptr.vmem [resolvable:$true] %s70_s17 }
  0x38   :  { %s11153_s20 = scalar_lea.hbm %s12689_s2, 49152 }
  0x39   :  { %p11154_p10 = scmp.ne.s32.totalorder %s12689_s2, %s11153_s20  ;;  %p11157_p11 = scmp.lt.u32.totalorder %s11153_s20, %s12689_s2 }
  0x3b   :  { %p11159_p12 = pnand %p11157_p11, %p11154_p10 }
  0x3d   :  { %11162 = shalt.err (!%p11159_p12)
}
  0x3e   :  { %s11163_s0 = scalar_lea.vmem %s46_s15, 49152  ;;  %p11168_p0 = scmp.lt.s32.totalorder %s46_s15, %s46_s15 }
  0x3f   :  { %p11164_p13 = scmp.ne.s32.totalorder %s46_s15, %s11163_s0  ;;  %p11169_p1 = scmp.lt.s32.totalorder %s11163_s0, %s11163_s0 }
  0x41   :  { %p11170_p2 = por %p11169_p1, %p11168_p0 }
  0x43   :  { %p11171_p3 = pnand %p11170_p2, %p11164_p13 }
  0x45   :  { %11174 = shalt.err (!%p11171_p3)
}
  0x46   :  { %51 = dma.hbm_to_vmem [thread:$0]  %s12689_s2, 49152, %s46_s15, [#allocation7], %s11252_s7, %s11252_s7, %s11253_s8  }
  0x47   :  { %s11175_s27 = scalar_lea.hbm %s12691_s4, 64 }
  0x48   :  { %p11176_p4 = scmp.ne.s32.totalorder %s12691_s4, %s11175_s27  ;;  %p11179_p5 = scmp.lt.u32.totalorder %s11175_s27, %s12691_s4 }
  0x4a   :  { %p11181_p6 = pnand %p11179_p5, %p11176_p4 }
  0x4c   :  { %11184 = shalt.err (!%p11181_p6)
}
  0x4d   :  { %s11185_s3 = scalar_lea.vmem %s71_s17, 64  ;;  %p11190_p8 = scmp.lt.s32.totalorder %s71_s17, %s71_s17 }
  0x4e   :  { %p11186_p7 = scmp.ne.s32.totalorder %s71_s17, %s11185_s3  ;;  %p11191_p9 = scmp.lt.s32.totalorder %s11185_s3, %s11185_s3 }
  0x50   :  { %p11192_p10 = por %p11191_p9, %p11190_p8 }
  0x52   :  { %p11193_p11 = pnand %p11192_p10, %p11186_p7 }
  0x54   :  { %11196 = shalt.err (!%p11193_p11)
}
  0x55   :  { %73 = dma.hbm_to_vmem [thread:$0]  %s12691_s4, 64, %s71_s17, [#allocation10]  }
  0x56   :  { %s11260_s11 = smov [#allocation12]   ;;  %s11197_s16 = scalar_lea.hbm %s12692_s5, 64 }
  0x57   :  { %s80_s12 = sshll.u32 %s11260_s11, 4  ;;  %p11198_p12 = scmp.ne.s32.totalorder %s12692_s5, %s11197_s16  ;;  %s81_s12 = int_to_ptr.vmem [resolvable:$true] %s80_s12 }
  0x58   :  { %p11201_p13 = scmp.lt.u32.totalorder %s11197_s16, %s12692_s5 }
  0x5a   :  { %p11203_p0 = pnand %p11201_p13, %p11198_p12 }
  0x5c   :  { %11206 = shalt.err (!%p11203_p0)
}
  0x5d   :  { %s11207_s1 = scalar_lea.vmem %s81_s12, 64  ;;  %p11212_p2 = scmp.lt.s32.totalorder %s81_s12, %s81_s12 }
  0x5e   :  { %p11208_p1 = scmp.ne.s32.totalorder %s81_s12, %s11207_s1  ;;  %p11213_p3 = scmp.lt.s32.totalorder %s11207_s1, %s11207_s1 }
  0x60   :  { %p11214_p4 = por %p11213_p3, %p11212_p2 }
  0x62   :  { %p11215_p5 = pnand %p11214_p4, %p11208_p1 }
  0x64   :  { %11218 = shalt.err (!%p11215_p5)
}
  0x65   :  { %83 = dma.hbm_to_vmem [thread:$0]  %s12692_s5, 64, %s81_s12, [#allocation13]  }
  0x66   :  { %11241 = dma.done.wait [#allocation4], 3072  }
  0x67   :  { %11242 = vsyncadd [#allocation4], 4294964224 }
  0x68   :  { %11243 = dma.done.wait [#allocation7], 73728  }
  0x69   :  { %11244 = vsyncadd [#allocation7], 4294893568 }
  0x6a   :  { %11245 = dma.done.wait [#allocation10], 8256  }
  0x6b   :  { %11246 = vsyncadd [#allocation10], 4294959040 }
  0x6c   :  { %11247 = dma.done.wait [#allocation13], 64  }
  0x6d   :  { %11248 = vsyncadd [#allocation13], 4294967232  ;;  %v10083_v0 = vld [vmem:[#allocation6 + $0x204] ss:$16 sps:$4 sm:$0xff]   ;;  %v10085_v1 = vld [vmem:[#allocation6 + $0x20c] ss:$16 sps:$4 sm:$0xff]  }
  0x6e   :  { %926 = vmatprep.subr.bf16.mxu0 %v10083_v0  ;;  %v10087_v2 = vld [vmem:[#allocation6 + $0x200] ss:$16 sps:$4 sm:$0xff]   ;;  %v10088_v3 = vld [vmem:[#allocation6 + $0x208] ss:$16 sps:$4 sm:$0xff]   ;;  %1039 = vmatprep.subr.bf16.mxu1 %v10085_v1  ;;  %v10089_v4 = vld [vmem:[#allocation6 + $0x224] ss:$16 sps:$4 sm:$0xff]  }
  0x6f   :  { %927 = vmatpush1.bf16.msra.mxu0 %v10087_v2  ;;  %1040 = vmatpush1.bf16.msra.mxu1 %v10088_v3  ;;  %v10091_v5 = vld [vmem:[#allocation6 + $0x22c] ss:$16 sps:$4 sm:$0xff]   ;;  %v10093_v6 = vld [vmem:[#allocation6 + $0x220] ss:$16 sps:$4 sm:$0xff]   ;;  %v10094_v7 = vld [vmem:[#allocation6 + $0x228] ss:$16 sps:$4 sm:$0xff]  }
  0x70   :  { %928 = vmatprep.subr.bf16.mxu0 %v10089_v4  ;;  %1041 = vmatprep.subr.bf16.mxu1 %v10091_v5  ;;  %v10095_v8 = vld [vmem:[#allocation6 + $0x244] ss:$16 sps:$4 sm:$0xff]   ;;  %v10097_v9 = vld [vmem:[#allocation6 + $0x24c] ss:$16 sps:$4 sm:$0xff]   ;;  %v10099_v10 = vld [vmem:[#allocation6 + $0x240] ss:$16 sps:$4 sm:$0xff]  }
  0x71   :  { %v10100_v11 = vld [vmem:[#allocation6 + $0x248] ss:$16 sps:$4 sm:$0xff]   ;;  %v10101_v12 = vld [vmem:[#allocation6 + $0x264] ss:$16 sps:$4 sm:$0xff]   ;;  %v10103_v13 = vld [vmem:[#allocation6 + $0x26c] ss:$16 sps:$4 sm:$0xff]  }
  0x72   :  { %v10105_v14 = vld [vmem:[#allocation6 + $0x260] ss:$16 sps:$4 sm:$0xff]   ;;  %v10106_v15 = vld [vmem:[#allocation6 + $0x268] ss:$16 sps:$4 sm:$0xff]   ;;  %v10107_v16 = vld [vmem:[#allocation6 + $0x284] ss:$16 sps:$4 sm:$0xff]  }
  0x73   :  { %929 = vmatpush1.bf16.msra.mxu0 %v10093_v6  ;;  %1042 = vmatpush1.bf16.msra.mxu1 %v10094_v7  ;;  %v10109_v17 = vld [vmem:[#allocation6 + $0x28c] ss:$16 sps:$4 sm:$0xff]   ;;  %v10111_v18 = vld [vmem:[#allocation6 + $0x280] ss:$16 sps:$4 sm:$0xff]   ;;  %v10112_v19 = vld [vmem:[#allocation6 + $0x288] ss:$16 sps:$4 sm:$0xff]  }
  0x74   :  { %930 = vmatprep.subr.bf16.mxu0 %v10095_v8  ;;  %1043 = vmatprep.subr.bf16.mxu1 %v10097_v9  ;;  %v10113_v20 = vld [vmem:[#allocation6 + $0x2a4] ss:$16 sps:$4 sm:$0xff]   ;;  %v10115_v21 = vld [vmem:[#allocation6 + $0x2ac] ss:$16 sps:$4 sm:$0xff]   ;;  %v10117_v22 = vld [vmem:[#allocation6 + $0x2a0] ss:$16 sps:$4 sm:$0xff]  }
  0x75   :  { %v10118_v23 = vld [vmem:[#allocation6 + $0x2a8] ss:$16 sps:$4 sm:$0xff]   ;;  %v10119_v24 = vld [vmem:[#allocation6 + $0x2c4] ss:$16 sps:$4 sm:$0xff]   ;;  %v10121_v25 = vld [vmem:[#allocation6 + $0x2cc] ss:$16 sps:$4 sm:$0xff]  }
  0x76   :  { %v10123_v26 = vld [vmem:[#allocation6 + $0x2c0] ss:$16 sps:$4 sm:$0xff]   ;;  %v10124_v27 = vld [vmem:[#allocation6 + $0x2c8] ss:$16 sps:$4 sm:$0xff]   ;;  %v10125_v28 = vld [vmem:[#allocation6 + $0x2e4] ss:$16 sps:$4 sm:$0xff]  }
  0x77   :  { %931 = vmatpush1.bf16.msra.mxu0 %v10099_v10  ;;  %1044 = vmatpush1.bf16.msra.mxu1 %v10100_v11  ;;  %v10127_v29 = vld [vmem:[#allocation6 + $0x2ec] ss:$16 sps:$4 sm:$0xff]   ;;  %v10129_v30 = vld [vmem:[#allocation6 + $0x2e0] ss:$16 sps:$4 sm:$0xff]   ;;  %v10130_v31 = vld [vmem:[#allocation6 + $0x2e8] ss:$16 sps:$4 sm:$0xff]  }
  0x78   :  { %932 = vmatprep.subr.bf16.mxu0 %v10101_v12  ;;  %1045 = vmatprep.subr.bf16.mxu1 %v10103_v13  ;;  %v10131_v32 = vld [vmem:[#allocation6 + $0x304] ss:$16 sps:$4 sm:$0xff]   ;;  %v10133_v33 = vld [vmem:[#allocation6 + $0x30c] ss:$16 sps:$4 sm:$0xff]   ;;  %v10135_v34 = vld [vmem:[#allocation6 + $0x300] ss:$16 sps:$4 sm:$0xff]  }
  0x79   :  { %v10136_v35 = vld [vmem:[#allocation6 + $0x308] ss:$16 sps:$4 sm:$0xff]   ;;  %v10137_v36 = vld [vmem:[#allocation6 + $0x324] ss:$16 sps:$4 sm:$0xff]   ;;  %v10139_v37 = vld [vmem:[#allocation6 + $0x32c] ss:$16 sps:$4 sm:$0xff]  }
  0x7a   :  { %v10141_v38 = vld [vmem:[#allocation6 + $0x320] ss:$16 sps:$4 sm:$0xff]   ;;  %v10142_v39 = vld [vmem:[#allocation6 + $0x328] ss:$16 sps:$4 sm:$0xff]   ;;  %v10143_v40 = vld [vmem:[#allocation6 + $0x344] ss:$16 sps:$4 sm:$0xff]  }
  0x7b   :  { %933 = vmatpush1.bf16.msra.mxu0 %v10105_v14  ;;  %1046 = vmatpush1.bf16.msra.mxu1 %v10106_v15  ;;  %v10145_v41 = vld [vmem:[#allocation6 + $0x34c] ss:$16 sps:$4 sm:$0xff]   ;;  %v10147_v42 = vld [vmem:[#allocation6 + $0x340] ss:$16 sps:$4 sm:$0xff]   ;;  %v10148_v43 = vld [vmem:[#allocation6 + $0x348] ss:$16 sps:$4 sm:$0xff]  }
  0x7c   :  { %934 = vmatprep.subr.bf16.mxu0 %v10107_v16  ;;  %1047 = vmatprep.subr.bf16.mxu1 %v10109_v17  ;;  %v10149_v44 = vld [vmem:[#allocation6 + $0x364] ss:$16 sps:$4 sm:$0xff]   ;;  %vm127_vm0 = vsmask.f32 3328  ;;  %v10151_v45 = vld [vmem:[#allocation6 + $0x36c] ss:$16 sps:$4 sm:$0xff]  }
  0x7d   :  { %vm128_vm1 = vsmask.f32 7440  ;;  %v10153_v46 = vld [vmem:[#allocation6 + $0x360] ss:$16 sps:$4 sm:$0xff]   ;;  %v10154_v47 = vld [vmem:[#allocation6 + $0x368] ss:$16 sps:$4 sm:$0xff]  }
  0x7e   :  { %v103_v48 = vld [vmem:[#allocation3] sm:$0xff]  ;;  %v11378_v49 = vld [vmem:[#allocation3 + $0x8] sm:$0xff]  ;;  %v11380_v50 = vld [vmem:[#allocation3 + $0x10] sm:$0x11]  ;;  %vm354_vm3 = vcmask 1042432   ;;  %vm355_vm4 = vcmask 1046532  }
  0x7f   :  { %935 = vmatpush1.bf16.msra.mxu0 %v10111_v18  ;;  %1048 = vmatpush1.bf16.msra.mxu1 %v10112_v19  ;;  %v131_v51 = vshrl.u32 %v103_v48, 16  ;;  %v134_v52 = vshll.u32 %v103_v48, 16  ;;  %v10155_v53 = vld [vmem:[#allocation6 + $0x384] ss:$16 sps:$4 sm:$0xff]   ;;  %v140_v54 = vshll.u32 %v11378_v49, 16  ;;  %v144_v55 = vshrl.u32 %v11378_v49, 16  ;;  %vm11393_vm2 = vmor %vm127_vm0, %vm128_vm1 }
  0x80   :  { %936 = vmatprep.subr.bf16.mxu0 %v10113_v20  ;;  %1049 = vmatprep.subr.bf16.mxu1 %v10115_v21  ;;  %v150_v56 = vshll.u32 %v11380_v50, 16  ;;  %v11386_v57 = vcombine.high %v103_v48, %v11378_v49  ;;  %v10157_v58 = vld [vmem:[#allocation6 + $0x38c] ss:$16 sps:$4 sm:$0xff]   ;;  %v11389_v61 = vcombine.low %v103_v48, %v11378_v49  ;;  %v10159_v0 = vld [vmem:[#allocation6 + $0x380] ss:$16 sps:$4 sm:$0xff]   ;;  %vm11485_vm5 = vmor %vm354_vm3, %vm355_vm4  ;;  %vm2691_vm6 = vcmask 1040384  }
  0x81   :  { %v133_v59 = vrot.slane %v131_v51, 4  ;;  %v136_v60 = vrot.slane %v134_v52, 5  ;;  %v142_v62 = vrot.slane %v140_v54, 5  ;;  %v146_v63 = vrot.slane %v144_v55, 4  ;;  %v10160_v3 = vld [vmem:[#allocation6 + $0x388] ss:$16 sps:$4 sm:$0xff]  }
  0x82   :  { %v152_v5 = vrot.slane %v150_v56, 5  ;;  %v10161_v6 = vld [vmem:[#allocation6 + $0x3a4] ss:$16 sps:$4 sm:$0xff]   ;;  %v10163_v7 = vld [vmem:[#allocation6 + $0x3ac] ss:$16 sps:$4 sm:$0xff]   ;;  %vm2694_vm8 = vcmask 1044484  }
  0x83   :  { %937 = vmatpush1.bf16.msra.mxu0 %v10117_v22  ;;  %1050 = vmatpush1.bf16.msra.mxu1 %v10118_v23  ;;  %v137_v2 = vor.u32 %v136_v60, %v133_v59  ;;  %v147_v4 = vor.u32 %v146_v63, %v142_v62  ;;  %v105_v9 = vld [vmem:[#allocation3 + $0x18] sm:$0xff]  ;;  %v10165_v10 = vld [vmem:[#allocation6 + $0x3a0] ss:$16 sps:$4 sm:$0xff]   ;;  %v11399_v13 = vld [vmem:[#allocation3 + $0x28] sm:$0x11]  ;;  %vm3251_vm3 = vcmask 1047556  }
  0x84   :  { %938 = vmatprep.subr.bf16.mxu0 %v10119_v24  ;;  %1051 = vmatprep.subr.bf16.mxu1 %v10121_v25  ;;  %v11397_v12 = vld [vmem:[#allocation3 + $0x20] sm:$0xff]  ;;  %v155_v14 = vshrl.u32 %v105_v9, 16  ;;  %v158_v15 = vshll.u32 %v105_v9, 16  ;;  %v174_v19 = vshll.u32 %v11399_v13, 16  ;;  %v10166_v20 = vld [vmem:[#allocation6 + $0x3a8] ss:$16 sps:$4 sm:$0xff]  }
  0x85   :  { %v138_v8 = vrot.slane %v137_v2, 4  ;;  %v148_v11 = vrot.slane %v147_v4, 4  ;;  %v164_v17 = vshll.u32 %v11397_v12, 16  ;;  %v168_v18 = vshrl.u32 %v11397_v12, 16  ;;  %v10167_v21 = vld [vmem:[#allocation6 + $0x3c4] ss:$16 sps:$4 sm:$0xff]  }
  0x86   :  { %v157_v23 = vrot.slane %v155_v14, 4  ;;  %v160_v24 = vrot.slane %v158_v15, 5  ;;  %v11409_v25 = vcombine.high %v105_v9, %v11397_v12  ;;  %v10178_v48 = vld [vmem:[#allocation6 + $0x3e8] ss:$16 sps:$4 sm:$0xff]   ;;  %v10184_v59 = vld [vmem:[#allocation6 + $0xc] ss:$16 sps:$4 sm:$0xff]  }
  0x87   :  { %939 = vmatpush1.bf16.msra.mxu0 %v10123_v26  ;;  %1052 = vmatpush1.bf16.msra.mxu1 %v10124_v27  ;;  %v143_v16 = vsel %vm11393_vm2, %v138_v8, %v142_v62  ;;  %v153_v22 = vsel %vm11393_vm2, %v148_v11, %v152_v5  ;;  %v10169_v26 = vld [vmem:[#allocation6 + $0x3cc] ss:$16 sps:$4 sm:$0xff]   ;;  %v10179_v63 = vld [vmem:[#allocation6] ss:$16 sps:$4 sm:$0xff]   ;;  %v10182_v5 = vld [vmem:[#allocation6 + $0x8] ss:$16 sps:$4 sm:$0xff]  }
  0x88   :  { %940 = vmatprep.subr.bf16.mxu0 %v10125_v28  ;;  %1053 = vmatprep.subr.bf16.mxu1 %v10127_v29  ;;  %v11411_v27 = vcombine.high %v143_v16, %v153_v22  ;;  %v166_v28 = vrot.slane %v164_v17, 5  ;;  %v170_v29 = vrot.slane %v168_v18, 4  ;;  %v11435_v4 = vcombine.low %v143_v16, %v153_v22  ;;  %v10190_v8 = vld [vmem:[#allocation6 + $0x2c] ss:$16 sps:$4 sm:$0xff]   ;;  %s11261_s5 = smov [#allocation14]  }
  0x89   :  { %vm2692_vm7 = vsmask.f32 256  ;;  %vm2695_vm9 = vsmask.f32 4352  ;;  %vm2746_vm12 = vsmask.f32 7938 }
  0x8a   :  { %12755 = vst [vmem:[#allocation20_spill] sm:$0xff] %v11411_v27  ;;  %958 = vmatprep.mubr.bf16.mxu0 %v11411_v27  ;;  %1071 = vmatprep.mubr.bf16.mxu1 %v11411_v27  ;;  %12756 = vst [vmem:[#allocation21_spill] sm:$0xff] %v11435_v4  ;;  %vm2748_vm13 = vsmask.f32 7954  ;;  %s8641_s22 = sshll.u32 %s11261_s5, 4  ;;  %s8642_s22 = int_to_ptr.vmem [resolvable:$true] %s8641_s22 }
  0x8b   :  { %941 = vmatpush1.bf16.msra.mxu0 %v10129_v30  ;;  %1054 = vmatpush1.bf16.msra.mxu1 %v10130_v31  ;;  %v10171_v30 = vld [vmem:[#allocation6 + $0x3c0] ss:$16 sps:$4 sm:$0xff]   ;;  %v161_v31 = vor.u32 %v160_v24, %v157_v23  ;;  %v10188_v24 = vld [vmem:[#allocation6 + $0x28] ss:$16 sps:$4 sm:$0xff]   ;;  %vm2693_vm10 = vmand %vm2691_vm6, %vm2692_vm7  ;;  %s11219_s23 = scalar_lea.vmem %s8642_s22, 4096  ;;  %p11224_p7 = scmp.lt.s32.totalorder %s8642_s22, %s8642_s22 }
  0x8c   :  { %942 = vmatprep.subr.bf16.mxu0 %v10131_v32  ;;  %1055 = vmatprep.subr.bf16.mxu1 %v10133_v33  ;;  %v11414_v32 = vcombine.low %v105_v9, %v11397_v12  ;;  %v10172_v33 = vld [vmem:[#allocation6 + $0x3c8] ss:$16 sps:$4 sm:$0xff]   ;;  %vm2696_vm11 = vmand %vm2694_vm8, %vm2695_vm9  ;;  %vm2927_vm9 = vsmask.f32 4368  ;;  %p11220_p6 = scmp.ne.s32.totalorder %s8642_s22, %s11219_s23  ;;  %p11225_p8 = scmp.lt.s32.totalorder %s11219_s23, %s11219_s23 }
  0x8d   :  { %vm11813_vm14 = vmor %vm2696_vm11, %vm2693_vm10 }
  0x8e   :  { %vm2747_vm15 = vmand %vm2691_vm6, %vm2746_vm12  ;;  %p11226_p9 = por %p11225_p8, %p11224_p7 }
  0x8f   :  { %943 = vmatpush1.bf16.msra.mxu0 %v10135_v34  ;;  %1056 = vmatpush1.bf16.msra.mxu1 %v10136_v35  ;;  %v171_v34 = vor.u32 %v170_v29, %v166_v28  ;;  %v10173_v35 = vld [vmem:[#allocation6 + $0x3e4] ss:$16 sps:$4 sm:$0xff]   ;;  %vm2749_vm0 = vmand %vm2694_vm8, %vm2748_vm13 }
  0x90   :  { %944 = vmatprep.subr.bf16.mxu0 %v10137_v36  ;;  %1057 = vmatprep.subr.bf16.mxu1 %v10139_v37  ;;  %v10175_v36 = vld [vmem:[#allocation6 + $0x3ec] ss:$16 sps:$4 sm:$0xff]   ;;  %v176_v37 = vrot.slane %v174_v19, 5  ;;  %v10185_v19 = vld [vmem:[#allocation6 + $0x20] ss:$16 sps:$4 sm:$0xff]   ;;  %vm11825_vm1 = vmor %vm2749_vm0, %vm2747_vm15  ;;  %p11227_p10 = pnand %p11226_p9, %p11220_p6 }
  0x91   :  { %v10193_v29 = vld [vmem:[#allocation6 + $0x44] ss:$16 sps:$4 sm:$0xff]   ;;  %vm3252_vm6 = vmand %vm3251_vm3, %vm2748_vm13 }
  0x92   :  { %vm11949_vm10 = vmor %vm2692_vm7, %vm2927_vm9 }
  0x93   :  { %945 = vmatpush1.bf16.msra.mxu0 %v10141_v38  ;;  %1058 = vmatpush1.bf16.msra.mxu1 %v10142_v39  ;;  %v107_v38 = vld [vmem:[#allocation3 + $0x30] sm:$0xff]  ;;  %v162_v39 = vrot.slane %v161_v31, 4 }
  0x94   :  { %946 = vmatprep.subr.bf16.mxu0 %v10143_v40  ;;  %1059 = vmatprep.subr.bf16.mxu1 %v10145_v41  ;;  %v11418_v40 = vld [vmem:[#allocation3 + $0x38] sm:$0xff]  ;;  %v11420_v41 = vld [vmem:[#allocation3 + $0x40] sm:$0x11] }
  0x95   :  { %v198_v56 = vshll.u32 %v11420_v41, 16  ;;  %v11429_v62 = vcombine.low %v107_v38, %v11418_v40 }
  0x97   :  { %947 = vmatpush1.bf16.msra.mxu0 %v10147_v42  ;;  %1060 = vmatpush1.bf16.msra.mxu1 %v10148_v43  ;;  %v179_v42 = vshrl.u32 %v107_v38, 16  ;;  %v182_v43 = vshll.u32 %v107_v38, 16  ;;  %v200_v9 = vrot.slane %v198_v56, 5 }
  0x98   :  { %948 = vmatprep.subr.bf16.mxu0 %v10149_v44  ;;  %1061 = vmatprep.subr.bf16.mxu1 %v10151_v45  ;;  %v172_v44 = vrot.slane %v171_v34, 4  ;;  %v188_v45 = vshll.u32 %v11418_v40, 16  ;;  %v10196_v34 = vld [vmem:[#allocation6 + $0x4c] ss:$16 sps:$4 sm:$0xff]  }
  0x99   :  { %v181_v51 = vrot.slane %v179_v42, 4  ;;  %v184_v52 = vrot.slane %v182_v43, 5  ;;  %v111_v42 = vld [vmem:[#allocation3 + $0x60] sm:$0xff] }
  0x9a   :  { %v190_v54 = vrot.slane %v188_v45, 5  ;;  %v177_v2 = vsel %vm11393_vm2, %v172_v44, %v176_v37  ;;  %v10199_v43 = vld [vmem:[#allocation6 + $0x64] ss:$16 sps:$4 sm:$0xff]  }
  0x9b   :  { %949 = vmatpush1.bf16.msra.mxu0 %v10153_v46  ;;  %1062 = vmatpush1.bf16.msra.mxu1 %v10154_v47  ;;  %v192_v46 = vshrl.u32 %v11418_v40, 16  ;;  %v10177_v47 = vld [vmem:[#allocation6 + $0x3e0] ss:$16 sps:$4 sm:$0xff]   ;;  %v185_v60 = vor.u32 %v184_v52, %v181_v51 }
  0x9c   :  { %950 = vmatprep.subr.bf16.mxu0 %v10155_v53  ;;  %1063 = vmatprep.subr.bf16.mxu1 %v10157_v58  ;;  %v11425_v53 = vcombine.high %v107_v38, %v11418_v40  ;;  %v10181_v58 = vld [vmem:[#allocation6 + $0x4] ss:$16 sps:$4 sm:$0xff]  }
  0x9d   :  { %v194_v55 = vrot.slane %v192_v46, 4  ;;  %v186_v17 = vrot.slane %v185_v60, 4  ;;  %v11465_v46 = vld [vmem:[#allocation3 + $0x68] sm:$0xff] }
  0x9e   :  { %v236_v51 = vshll.u32 %v11465_v46, 16  ;;  %v240_v52 = vshrl.u32 %v11465_v46, 16 }
  0x9f   :  { %951 = vmatpush1.bf16.msra.mxu0 %v10159_v0  ;;  %1064 = vmatpush1.bf16.msra.mxu1 %v10160_v3  ;;  %v167_v0 = vsel %vm11393_vm2, %v162_v39, %v166_v28  ;;  %v195_v3 = vor.u32 %v194_v55, %v190_v54  ;;  %v191_v37 = vsel %vm11393_vm2, %v186_v17, %v190_v54  ;;  %v12695_v54 = vrot.slane %v11378_v49, 5  ;;  %v10202_v55 = vld [vmem:[#allocation6 + $0x6c] ss:$16 sps:$4 sm:$0xff]  }
  0xa0   :  { %952 = vmatprep.subr.bf16.mxu0 %v10161_v6  ;;  %1065 = vmatprep.subr.bf16.mxu1 %v10163_v7  ;;  %v10187_v6 = vld [vmem:[#allocation6 + $0x24] ss:$16 sps:$4 sm:$0xff]   ;;  %v109_v7 = vld [vmem:[#allocation3 + $0x48] sm:$0xff]  ;;  %v11439_v15 = vcombine.high %v167_v0, %v177_v2 }
  0xa1   :  { %v203_v11 = vshrl.u32 %v109_v7, 16  ;;  %v206_v14 = vshll.u32 %v109_v7, 16 }
  0xa2   :  { %12757 = vst [vmem:[#allocation22_spill] sm:$0xff] %v11439_v15 }
  0xa3   :  { %953 = vmatpush1.bf16.msra.mxu0 %v10165_v10  ;;  %1066 = vmatpush1.bf16.msra.mxu1 %v10166_v20  ;;  %v11437_v10 = vld [vmem:[#allocation3 + $0x50] sm:$0xff]  ;;  %v196_v20 = vrot.slane %v195_v3, 4  ;;  %v208_v22 = vrot.slane %v206_v14, 5  ;;  %v242_v3 = vrot.slane %v240_v52, 4  ;;  %v10200_v14 = vld [vmem:[#allocation6 + $0x68] ss:$16 sps:$4 sm:$0xff]  }
  0xa4   :  { %954 = vmatprep.subr.bf16.mxu0 %v10167_v21  ;;  %1067 = vmatprep.subr.bf16.mxu1 %v10169_v26  ;;  %v212_v18 = vshll.u32 %v11437_v10, 16  ;;  %v216_v16 = vshrl.u32 %v11437_v10, 16  ;;  %v205_v21 = vrot.slane %v203_v11, 4  ;;  %v11444_v23 = vcombine.high %v109_v7, %v11437_v10 }
  0xa5   :  { %v11453_v31 = vcombine.low %v109_v7, %v11437_v10  ;;  %v201_v38 = vsel %vm11393_vm2, %v196_v20, %v200_v9  ;;  %v11481_v9 = vcombine.low %v111_v42, %v11465_v46  ;;  %v12760_v11 = vmov 0  ;;  %v10205_v20 = vld [vmem:[#allocation6 + $0x84] ss:$16 sps:$4 sm:$0xff]  }
  0xa6   :  { %v11448_v26 = vrot.slane %v212_v18, 5  ;;  %v218_v28 = vrot.slane %v216_v16, 4  ;;  %v209_v39 = vor.u32 %v208_v22, %v205_v21  ;;  %v11470_v56 = vcombine.high %v191_v37, %v201_v38  ;;  %v10208_v21 = vld [vmem:[#allocation6 + $0x8c] ss:$16 sps:$4 sm:$0xff]  }
  0xa7   :  { %955 = vmatpush1.bf16.msra.mxu0 %v10171_v30  ;;  %1068 = vmatpush1.bf16.msra.mxu1 %v10172_v33  ;;  %v11450_v30 = vld [vmem:[#allocation3 + $0x58] sm:$0x11]  ;;  %v11455_v33 = vcombine.low %v167_v0, %v177_v2  ;;  %v238_v2 = vrot.slane %v236_v51, 5  ;;  %v12761_v11 = vsel %vm11485_vm5, 4294967295, %v12760_v11  ;;  %v361_v16 = vrot.slane %v12695_v54, 4 }
  0xa8   :  { %956 = vmatprep.subr.bf16.mxu0 %v10173_v35  ;;  %1069 = vmatprep.subr.bf16.mxu1 %v10175_v36  ;;  %v10191_v35 = vld [vmem:[#allocation6 + $0x40] ss:$16 sps:$4 sm:$0xff]   ;;  %v10194_v36 = vld [vmem:[#allocation6 + $0x48] ss:$16 sps:$4 sm:$0xff]   ;;  %v219_v44 = vor.u32 %v218_v28, %v11448_v26  ;;  %v222_v45 = vshll.u32 %v11450_v30, 16  ;;  %12759 = vst [vmem:[#allocation24_spill] sm:$0xff] %v11470_v56 }
  0xa9   :  { %12758 = vst [vmem:[#allocation23_spill] sm:$0xff] %v11455_v33  ;;  %v210_v0 = vrot.slane %v209_v39, 4  ;;  %12762 = vst [vmem:[#allocation25_spill] sm:$0xff] %v12761_v11  ;;  %v243_v17 = vor.u32 %v242_v3, %v238_v2  ;;  %v113_v22 = vld [vmem:[#allocation3 + $0x78] sm:$0xff]  ;;  %v11510_v51 = vld [vmem:[#allocation3 + $0x88] sm:$0x11] }
  0xaa   :  { %v220_v7 = vrot.slane %v219_v44, 4  ;;  %v10206_v28 = vld [vmem:[#allocation6 + $0x88] ss:$16 sps:$4 sm:$0xff]   ;;  %v10214_v39 = vld [vmem:[#allocation6 + $0xac] ss:$16 sps:$4 sm:$0xff]  }
  0xab   :  { %957 = vmatpush1.bf16.msra.mxu0 %v10177_v47  ;;  %1070 = vmatpush1.bf16.msra.mxu1 %v10178_v48  ;;  %v227_v47 = vshrl.u32 %v111_v42, 16  ;;  %v230_v48 = vshll.u32 %v111_v42, 16 }
  0xac   :  { %1544 = vmatprep.subr.bf16.mxu0 %v10181_v58  ;;  %1657 = vmatprep.subr.bf16.mxu1 %v10184_v59  ;;  %v11472_v58 = vld [vmem:[#allocation3 + $0x70] sm:$0x11] }
  0xad   :  { %v229_v59 = vrot.slane %v227_v47, 4  ;;  %v232_v60 = vrot.slane %v230_v48, 5  ;;  %v246_v18 = vshll.u32 %v11472_v58, 16  ;;  %v244_v47 = vrot.slane %v243_v17, 4 }
  0xae   :  { %959 = vmatmul.mubr.bf16.vlgmr.msra.gmra.mrb[0].mxu0 %v11435_v4  ;;  %1072 = vmatmul.mubr.bf16.vlgmr.msra.gmra.mrb[0].mxu1 %v11435_v4 }
  0xaf   :  { %1545 = vmatpush1.bf16.msra.mxu0 %v10179_v63  ;;  %1658 = vmatpush1.bf16.msra.mxu1 %v10182_v5  ;;  %v11475_v63 = vcombine.high %v111_v42, %v11465_v46  ;;  %v362_v5 = vrot.slane %v11380_v50, 5  ;;  %v233_v50 = vor.u32 %v232_v60, %v229_v59  ;;  %v248_v48 = vrot.slane %v246_v18, 5 }
  0xb0   :  { %1546 = vmatprep.subr.bf16.mxu0 %v10187_v6  ;;  %1659 = vmatprep.subr.bf16.mxu1 %v10190_v8  ;;  %v10197_v6 = vld [vmem:[#allocation6 + $0x60] ss:$16 sps:$4 sm:$0xff]   ;;  %v224_v8 = vrot.slane %v222_v45, 5  ;;  %v12694_v45 = vrot.slane %v11397_v12, 5  ;;  %v270_v18 = vshll.u32 %v11510_v51, 16 }
  0xb1   :  { %968 = vmatprep.mubr.bf16.mxu0 %v11439_v15  ;;  %1081 = vmatprep.mubr.bf16.mxu1 %v11439_v15  ;;  %v249_v17 = vsel %vm11393_vm2, %v244_v47, %v248_v48  ;;  %v10226_v48 = vld [vmem:[#allocation6 + $0xec] ss:$16 sps:$4 sm:$0xff]  }
  0xb2   :  { %v225_v42 = vsel %vm11393_vm2, %v220_v7, %v224_v8  ;;  %v369_v7 = vrot.slane %v11399_v13, 5  ;;  %v10209_v8 = vld [vmem:[#allocation6 + $0xa0] ss:$16 sps:$4 sm:$0xff]  }
  0xb3   :  { %1547 = vmatpush1.bf16.msra.mxu0 %v10185_v19  ;;  %1660 = vmatpush1.bf16.msra.mxu1 %v10188_v24  ;;  %v11492_v19 = vcombine.low %v191_v37, %v201_v38  ;;  %v10203_v24 = vld [vmem:[#allocation6 + $0x80] ss:$16 sps:$4 sm:$0xff]   ;;  %v11503_v37 = vsel %vm11485_vm5, %v361_v16, %v362_v5  ;;  %v10211_v38 = vld [vmem:[#allocation6 + $0xa4] ss:$16 sps:$4 sm:$0xff]  }
  0xb4   :  { %1548 = vmatprep.subr.bf16.mxu0 %v10193_v29  ;;  %1661 = vmatprep.subr.bf16.mxu1 %v10196_v34  ;;  %v215_v29 = vsel %vm11393_vm2, %v210_v0, %v11448_v26  ;;  %v11499_v34 = vld [vmem:[#allocation3 + $0x80] sm:$0xff]  ;;  %v234_v26 = vrot.slane %v233_v50, 4  ;;  %v115_v16 = vld [vmem:[#allocation3 + $0x90] sm:$0xff] }
  0xb5   :  { %12763 = vst [vmem:[#allocation26_spill] sm:$0xff] %v11492_v19  ;;  %v264_v44 = vshrl.u32 %v11499_v34, 16  ;;  %v11513_v52 = vcombine.high %v113_v22, %v11499_v34  ;;  %v11517_v3 = vcombine.high %v215_v29, %v225_v42  ;;  %v11520_v5 = vcombine.low %v113_v22, %v11499_v34 }
  0xb6   :  { %969 = vmatmul.mubr.bf16.gmra.mrb[4].mxu0 %v11455_v33  ;;  %1082 = vmatmul.mubr.bf16.gmra.mrb[4].mxu1 %v11455_v33  ;;  %v239_v50 = vsel %vm11393_vm2, %v234_v26, %v238_v2  ;;  %v278_v2 = vshll.u32 %v115_v16, 16  ;;  %v10223_v26 = vld [vmem:[#allocation6 + $0xe4] ss:$16 sps:$4 sm:$0xff]  }
  0xb7   :  { %1549 = vmatpush1.bf16.msra.mxu0 %v10191_v35  ;;  %1662 = vmatpush1.bf16.msra.mxu1 %v10194_v36  ;;  %v251_v35 = vshrl.u32 %v113_v22, 16  ;;  %v254_v36 = vshll.u32 %v113_v22, 16  ;;  %v266_v0 = vrot.slane %v264_v44, 4  ;;  %12764 = vst [vmem:[#allocation27_spill] sm:$0xff] %v11517_v3  ;;  %v10218_v44 = vld [vmem:[#allocation6 + $0xc8] ss:$16 sps:$4 sm:$0xff]  }
  0xb8   :  { %1550 = vmatprep.subr.bf16.mxu0 %v10199_v43  ;;  %1663 = vmatprep.subr.bf16.mxu1 %v10202_v55  ;;  %v260_v43 = vshll.u32 %v11499_v34, 16 }
  0xb9   :  { %978 = vmatprep.mubr.bf16.mxu0 %v11470_v56  ;;  %1091 = vmatprep.mubr.bf16.mxu1 %v11470_v56  ;;  %v253_v55 = vrot.slane %v251_v35, 4  ;;  %v256_v59 = vrot.slane %v254_v36, 5  ;;  %v10236_v56 = vld [vmem:[#allocation6 + $0x128] ss:$16 sps:$4 sm:$0xff]  }
  0xba   :  { %v11515_v60 = vrot.slane %v260_v43, 5  ;;  %v10215_v43 = vld [vmem:[#allocation6 + $0xc0] ss:$16 sps:$4 sm:$0xff]  }
  0xbb   :  { %1551 = vmatpush1.bf16.msra.mxu0 %v10197_v6  ;;  %1664 = vmatpush1.bf16.msra.mxu1 %v10200_v14  ;;  %v368_v6 = vrot.slane %v12694_v45, 4  ;;  %v10212_v14 = vld [vmem:[#allocation6 + $0xa8] ss:$16 sps:$4 sm:$0xff]   ;;  %v257_v22 = vor.u32 %v256_v59, %v253_v55  ;;  %v11548_v55 = vcombine.high %v239_v50, %v249_v17  ;;  %v280_v45 = vrot.slane %v278_v2, 5 }
  0xbc   :  { %1552 = vmatprep.subr.bf16.mxu0 %v10205_v20  ;;  %1665 = vmatprep.subr.bf16.mxu1 %v10208_v21  ;;  %v10217_v20 = vld [vmem:[#allocation6 + $0xc4] ss:$16 sps:$4 sm:$0xff]   ;;  %v10220_v21 = vld [vmem:[#allocation6 + $0xcc] ss:$16 sps:$4 sm:$0xff]   ;;  %v267_v13 = vor.u32 %v266_v0, %v11515_v60 }
  0xbd   :  { %v11537_v35 = vsel %vm11485_vm5, %v368_v6, %v369_v7  ;;  %12766 = vst [vmem:[#allocation29_spill] sm:$0xff] %v11548_v55  ;;  %v258_v59 = vrot.slane %v257_v22, 4  ;;  %v272_v6 = vrot.slane %v270_v18, 5  ;;  %v11550_v7 = vld [vmem:[#allocation3 + $0xa0] sm:$0x11]  ;;  %v11559_v18 = vcombine.low %v239_v50, %v249_v17 }
  0xbe   :  { %979 = vmatmul.mubr.bf16.gmra.mrb[8].mxu0 %v11492_v19  ;;  %1092 = vmatmul.mubr.bf16.gmra.mrb[8].mxu1 %v11492_v19  ;;  %v268_v0 = vrot.slane %v267_v13, 4  ;;  %v10232_v22 = vld [vmem:[#allocation6 + $0x10c] ss:$16 sps:$4 sm:$0xff]   ;;  %v294_v2 = vshll.u32 %v11550_v7, 16  ;;  %v10227_v50 = vld [vmem:[#allocation6 + $0x100] ss:$16 sps:$4 sm:$0xff]  }
  0xbf   :  { %1553 = vmatpush1.bf16.msra.mxu0 %v10203_v24  ;;  %1666 = vmatpush1.bf16.msra.mxu1 %v10206_v28  ;;  %v11533_v24 = vld [vmem:[#allocation3 + $0x98] sm:$0xff]  ;;  %v275_v28 = vshrl.u32 %v115_v16, 16  ;;  %12767 = vst [vmem:[#allocation30_spill] sm:$0xff] %v11559_v18  ;;  %v263_v13 = vsel %vm11393_vm2, %v258_v59, %v11515_v60  ;;  %v376_v59 = vrot.slane %v11420_v41, 5  ;;  %v10233_v19 = vld [vmem:[#allocation6 + $0x120] ss:$16 sps:$4 sm:$0xff]  }
  0xc0   :  { %1554 = vmatprep.subr.bf16.mxu0 %v10211_v38  ;;  %1667 = vmatprep.subr.bf16.mxu1 %v10214_v39  ;;  %v284_v36 = vshll.u32 %v11533_v24, 16  ;;  %v288_v38 = vshrl.u32 %v11533_v24, 16  ;;  %v11543_v39 = vcombine.low %v215_v29, %v225_v42  ;;  %v11546_v47 = vcombine.high %v115_v16, %v11533_v24 }
  0xc1   :  { %988 = vmatprep.mubr.bf16.mxu0 %v11517_v3  ;;  %1101 = vmatprep.mubr.bf16.mxu1 %v11517_v3  ;;  %v11553_v29 = vcombine.low %v115_v16, %v11533_v24  ;;  %v277_v42 = vrot.slane %v275_v28, 4  ;;  %v11561_v16 = vld [vmem:[#allocation3 + $0xb0] sm:$0xff]  ;;  %v273_v28 = vsel %vm11393_vm2, %v268_v0, %v272_v6  ;;  %v10230_v0 = vld [vmem:[#allocation6 + $0x108] ss:$16 sps:$4 sm:$0xff]  }
  0xc2   :  { %12765 = vst [vmem:[#allocation28_spill] sm:$0xff] %v11543_v39  ;;  %v11555_v54 = vrot.slane %v284_v36, 5  ;;  %v290_v3 = vrot.slane %v288_v38, 4  ;;  %v10235_v6 = vld [vmem:[#allocation6 + $0x124] ss:$16 sps:$4 sm:$0xff]   ;;  %v408_v1 = vrot.slane %v11561_v16, 5 }
  0xc3   :  { %1555 = vmatpush1.bf16.msra.mxu0 %v10209_v8  ;;  %1668 = vmatpush1.bf16.msra.mxu1 %v10212_v14  ;;  %v10221_v8 = vld [vmem:[#allocation6 + $0xe0] ss:$16 sps:$4 sm:$0xff]   ;;  %v10224_v14 = vld [vmem:[#allocation6 + $0xe8] ss:$16 sps:$4 sm:$0xff]   ;;  %v281_v17 = vor.u32 %v280_v45, %v277_v42  ;;  %v10238_v45 = vld [vmem:[#allocation6 + $0x12c] ss:$16 sps:$4 sm:$0xff]  }
  0xc4   :  { %1556 = vmatprep.subr.bf16.mxu0 %v10217_v20  ;;  %1669 = vmatprep.subr.bf16.mxu1 %v10220_v21  ;;  %v117_v20 = vld [vmem:[#allocation3 + $0xa8] sm:$0xff]  ;;  %v10229_v21 = vld [vmem:[#allocation6 + $0x104] ss:$16 sps:$4 sm:$0xff]   ;;  %v291_v38 = vor.u32 %v290_v3, %v11555_v54  ;;  %v11582_v3 = vcombine.high %v263_v13, %v273_v28  ;;  %v12769_v42 = vrot.slane %v11418_v40, 5 }
  0xc5   :  { %v302_v60 = vshll.u32 %v117_v20, 16  ;;  %v11580_v36 = vcombine.low %v117_v20, %v11561_v16  ;;  %v282_v41 = vrot.slane %v281_v17, 4  ;;  %v12770_v17 = vrot.slane %v11437_v10, 5 }
  0xc6   :  { %989 = vmatmul.mubr.bf16.gmra.mrb[12].mxu0 %v11543_v39  ;;  %1102 = vmatmul.mubr.bf16.gmra.mrb[12].mxu1 %v11543_v39  ;;  %12768 = vst [vmem:[#allocation31_spill] sm:$0xff] %v11582_v3  ;;  %v10241_v39 = vld [vmem:[#allocation6 + $0x144] ss:$16 sps:$4 sm:$0xff]  }
  0xc7   :  { %1557 = vmatpush1.bf16.msra.mxu0 %v10215_v43  ;;  %1670 = vmatpush1.bf16.msra.mxu1 %v10218_v44  ;;  %v299_v43 = vshrl.u32 %v117_v20, 16  ;;  %v11574_v44 = vcombine.high %v117_v20, %v11561_v16  ;;  %v11589_v20 = vld [vmem:[#allocation3 + $0xb8] sm:$0x11] }
  0xc8   :  { %1558 = vmatprep.subr.bf16.mxu0 %v10223_v26  ;;  %1671 = vmatprep.subr.bf16.mxu1 %v10226_v48  ;;  %v308_v26 = vshll.u32 %v11561_v16, 16  ;;  %v312_v48 = vshrl.u32 %v11561_v16, 16 }
  0xc9   :  { %998 = vmatprep.mubr.bf16.mxu0 %v11548_v55  ;;  %1111 = vmatprep.mubr.bf16.mxu1 %v11548_v55  ;;  %v375_v55 = vrot.slane %v12769_v42, 4  ;;  %v301_v33 = vrot.slane %v299_v43, 4  ;;  %v11598_v43 = vcombine.low %v263_v13, %v273_v28  ;;  %v394_v13 = vrot.slane %v11499_v34, 5  ;;  %v10239_v28 = vld [vmem:[#allocation6 + $0x140] ss:$16 sps:$4 sm:$0xff]  }
  0xca   :  { %v314_v15 = vrot.slane %v312_v48, 4  ;;  %v10242_v48 = vld [vmem:[#allocation6 + $0x148] ss:$16 sps:$4 sm:$0xff]  }
  0xcb   :  { %1559 = vmatpush1.bf16.msra.mxu0 %v10221_v8  ;;  %1672 = vmatpush1.bf16.msra.mxu1 %v10224_v14  ;;  %v292_v8 = vrot.slane %v291_v38, 4  ;;  %v296_v14 = vrot.slane %v294_v2, 5  ;;  %v11593_v42 = vsel %vm11485_vm5, %v375_v55, %v376_v59  ;;  %v382_v2 = vrot.slane %v12770_v17, 4  ;;  %12771 = vst [vmem:[#allocation32_spill] sm:$0xff] %v11598_v43  ;;  %v10250_v17 = vld [vmem:[#allocation6 + $0x16c] ss:$16 sps:$4 sm:$0xff]  }
  0xcc   :  { %1560 = vmatprep.subr.bf16.mxu0 %v10229_v21  ;;  %1673 = vmatprep.subr.bf16.mxu1 %v10232_v22  ;;  %v304_v21 = vrot.slane %v302_v60, 5  ;;  %v310_v22 = vrot.slane %v308_v26, 5  ;;  %v383_v38 = vrot.slane %v11450_v30, 5  ;;  %v387_v60 = vrot.slane %v11465_v46, 5  ;;  %v10314_v46 = vld [vmem:[#allocation6 + $0x4a8] ss:$16 sps:$4 sm:$0xff]  }
  0xcd   :  { %v390_v26 = vrot.slane %v11472_v58, 5  ;;  %v287_v55 = vsel %vm11393_vm2, %v282_v41, %v11555_v54  ;;  %v297_v58 = vsel %vm11393_vm2, %v292_v8, %v296_v14  ;;  %v10247_v54 = vld [vmem:[#allocation6 + $0x164] ss:$16 sps:$4 sm:$0xff]   ;;  %v397_v41 = vrot.slane %v11510_v51, 5 }
  0xce   :  { %999 = vmatmul.mubr.bf16.gmra.mrb[16].mxu0 %v11559_v18  ;;  %1112 = vmatmul.mubr.bf16.gmra.mrb[16].mxu1 %v11559_v18  ;;  %v10244_v18 = vld [vmem:[#allocation6 + $0x14c] ss:$16 sps:$4 sm:$0xff]   ;;  %v11610_v30 = vsel %vm11485_vm5, %v382_v2, %v383_v38  ;;  %v305_v59 = vor.u32 %v304_v21, %v301_v33  ;;  %v10245_v33 = vld [vmem:[#allocation6 + $0x160] ss:$16 sps:$4 sm:$0xff]   ;;  %v11624_v8 = vcombine.high %v287_v55, %v297_v58  ;;  %v10253_v14 = vld [vmem:[#allocation6 + $0x184] ss:$16 sps:$4 sm:$0xff]  }
  0xcf   :  { %1561 = vmatpush1.bf16.msra.mxu0 %v10227_v50  ;;  %1674 = vmatpush1.bf16.msra.mxu1 %v10230_v0  ;;  %v318_v50 = vshll.u32 %v11589_v20, 16  ;;  %v315_v0 = vor.u32 %v314_v15, %v310_v22  ;;  %v10248_v15 = vld [vmem:[#allocation6 + $0x168] ss:$16 sps:$4 sm:$0xff]   ;;  %v404_v21 = vrot.slane %v11550_v7, 5  ;;  %v10256_v38 = vld [vmem:[#allocation6 + $0x18c] ss:$16 sps:$4 sm:$0xff]  }
  0xd0   :  { %1562 = vmatprep.subr.bf16.mxu0 %v10235_v6  ;;  %1675 = vmatprep.subr.bf16.mxu1 %v10238_v45  ;;  %v389_v6 = vrot.slane %v387_v60, 4  ;;  %v396_v45 = vrot.slane %v394_v13, 4  ;;  %12772 = vst [vmem:[#allocation33_spill] sm:$0xff] %v11624_v8 }
  0xd1   :  { %1008 = vmatprep.mubr.bf16.mxu0 %v11582_v3  ;;  %1121 = vmatprep.mubr.bf16.mxu1 %v11582_v3  ;;  %v316_v51 = vrot.slane %v315_v0, 4  ;;  %v10254_v0 = vld [vmem:[#allocation6 + $0x188] ss:$16 sps:$4 sm:$0xff]  }
  0xd2   :  { %v11622_v2 = vsel %vm11485_vm5, %v389_v6, %v390_v26  ;;  %v10259_v6 = vld [vmem:[#allocation6 + $0x1a4] ss:$16 sps:$4 sm:$0xff]  }
  0xd3   :  { %1563 = vmatpush1.bf16.msra.mxu0 %v10233_v19  ;;  %1676 = vmatpush1.bf16.msra.mxu1 %v10236_v56  ;;  %v11628_v56 = vsel %vm11485_vm5, %v396_v45, %v397_v41  ;;  %v306_v19 = vrot.slane %v305_v59, 4  ;;  %v11638_v59 = vcombine.low %v287_v55, %v297_v58  ;;  %v10260_v58 = vld [vmem:[#allocation6 + $0x1a8] ss:$16 sps:$4 sm:$0xff]   ;;  %v10265_v45 = vld [vmem:[#allocation6 + $0x1c4] ss:$16 sps:$4 sm:$0xff]   ;;  %v411_v41 = vrot.slane %v11589_v20, 5 }
  0xd4   :  { %1564 = vmatprep.subr.bf16.mxu0 %v10241_v39  ;;  %1677 = vmatprep.subr.bf16.mxu1 %v10244_v18  ;;  %v320_v39 = vrot.slane %v318_v50, 5  ;;  %v401_v18 = vrot.slane %v11533_v24, 5  ;;  %v10251_v50 = vld [vmem:[#allocation6 + $0x180] ss:$16 sps:$4 sm:$0xff]   ;;  %v10271_v20 = vld [vmem:[#allocation6 + $0x1e4] ss:$16 sps:$4 sm:$0xff]  }
  0xd5   :  { %12773 = vst [vmem:[#allocation34_spill] sm:$0xff] %v11638_v59 }
  0xd6   :  { %1009 = vmatmul.mubr.bf16.gmra.mrb[20].mxu0 %v11598_v43  ;;  %1122 = vmatmul.mubr.bf16.gmra.mrb[20].mxu1 %v11598_v43  ;;  %v403_v26 = vrot.slane %v401_v18, 4  ;;  %v321_v7 = vsel %vm11393_vm2, %v316_v51, %v320_v39  ;;  %v10266_v51 = vld [vmem:[#allocation6 + $0x1c8] ss:$16 sps:$4 sm:$0xff]  }
  0xd7   :  { %1565 = vmatpush1.bf16.msra.mxu0 %v10239_v28  ;;  %1678 = vmatpush1.bf16.msra.mxu1 %v10242_v48  ;;  %v311_v28 = vsel %vm11393_vm2, %v306_v19, %v310_v22  ;;  %v10257_v22 = vld [vmem:[#allocation6 + $0x1a0] ss:$16 sps:$4 sm:$0xff]   ;;  %vm3249_vm2 = vcmask 1043456   ;;  %v10504_v43 = vld [vmem:[#allocation8 + $0x268] ss:$16 sps:$4 sm:$0xff]  }
  0xd8   :  { %1566 = vmatprep.subr.bf16.mxu0 %v10247_v54  ;;  %1679 = vmatprep.subr.bf16.mxu1 %v10250_v17  ;;  %v11646_v48 = vsel %vm11485_vm5, %v403_v26, %v404_v21  ;;  %v10262_v54 = vld [vmem:[#allocation6 + $0x1ac] ss:$16 sps:$4 sm:$0xff]   ;;  %v11648_v55 = vcombine.high %v311_v28, %v321_v7  ;;  %v10263_v19 = vld [vmem:[#allocation6 + $0x1c0] ss:$16 sps:$4 sm:$0xff]   ;;  %v10279_v26 = vld [vmem:[#allocation6 + $0x404] ss:$16 sps:$4 sm:$0xff]  }
  0xd9   :  { %1018 = vmatprep.mubr.bf16.mxu0 %v11624_v8  ;;  %1131 = vmatprep.mubr.bf16.mxu1 %v11624_v8  ;;  %v10268_v17 = vld [vmem:[#allocation6 + $0x1cc] ss:$16 sps:$4 sm:$0xff]   ;;  %v10269_v21 = vld [vmem:[#allocation6 + $0x1e0] ss:$16 sps:$4 sm:$0xff]   ;;  %vm3250_vm4 = vmand %vm3249_vm2, %vm2746_vm12 }
  0xda   :  { %12774 = vst [vmem:[#allocation35_spill] sm:$0xff] %v11648_v55  ;;  %vm11835_vm8 = vmor %vm3252_vm6, %vm3250_vm4  ;;  %v10501_v8 = vld [vmem:[#allocation8 + $0x260] ss:$16 sps:$4 sm:$0xff]  }
  0xdb   :  { %1567 = vmatpush1.bf16.msra.mxu0 %v10245_v33  ;;  %1680 = vmatpush1.bf16.msra.mxu1 %v10248_v15  ;;  %v410_v33 = vrot.slane %v408_v1, 4  ;;  %v11658_v15 = vcombine.low %v311_v28, %v321_v7  ;;  %v10280_v28 = vld [vmem:[#allocation6 + $0x408] ss:$16 sps:$4 sm:$0xff]   ;;  %v10285_v7 = vld [vmem:[#allocation6 + $0x424] ss:$16 sps:$4 sm:$0xff]  }
  0xdc   :  { %1568 = vmatprep.subr.bf16.mxu0 %v10253_v14  ;;  %1681 = vmatprep.subr.bf16.mxu1 %v10256_v38  ;;  %v10274_v14 = vld [vmem:[#allocation6 + $0x1ec] ss:$16 sps:$4 sm:$0xff]   ;;  %v10272_v38 = vld [vmem:[#allocation6 + $0x1e8] ss:$16 sps:$4 sm:$0xff]  }
  0xdd   :  { %12775 = vst [vmem:[#allocation36_spill] sm:$0xff] %v11658_v15  ;;  %v11662_v39 = vsel %vm11485_vm5, %v410_v33, %v411_v41  ;;  %v10294_v41 = vld [vmem:[#allocation6 + $0x448] ss:$16 sps:$4 sm:$0xff]   ;;  %v10297_v33 = vld [vmem:[#allocation6 + $0x460] ss:$16 sps:$4 sm:$0xff]  }
  0xde   :  { %1019 = vmatmul.mubr.bf16.gmra.mrb[24].mxu0 %v11638_v59  ;;  %1132 = vmatmul.mubr.bf16.gmra.mrb[24].mxu1 %v11638_v59 }
  0xdf   :  { %1569 = vmatpush1.bf16.msra.mxu0 %v10251_v50  ;;  %1682 = vmatpush1.bf16.msra.mxu1 %v10254_v0  ;;  %v10282_v50 = vld [vmem:[#allocation6 + $0x40c] ss:$16 sps:$4 sm:$0xff]   ;;  %v10277_v0 = vld [vmem:[#allocation6 + $0x400] ss:$16 sps:$4 sm:$0xff]  }
  0xe0   :  { %1570 = vmatprep.subr.bf16.mxu0 %v10259_v6  ;;  %1683 = vmatprep.subr.bf16.mxu1 %v10262_v54  ;;  %v10288_v6 = vld [vmem:[#allocation6 + $0x42c] ss:$16 sps:$4 sm:$0xff]   ;;  %v10283_v54 = vld [vmem:[#allocation6 + $0x420] ss:$16 sps:$4 sm:$0xff]  }
  0xe1   :  { %1028 = vmatprep.mubr.bf16.mxu0 %v11648_v55  ;;  %1141 = vmatprep.mubr.bf16.mxu1 %v11648_v55 }
  0xe3   :  { %1571 = vmatpush1.bf16.msra.mxu0 %v10257_v22  ;;  %1684 = vmatpush1.bf16.msra.mxu1 %v10260_v58  ;;  %v10286_v22 = vld [vmem:[#allocation6 + $0x428] ss:$16 sps:$4 sm:$0xff]   ;;  %v10293_v58 = vld [vmem:[#allocation6 + $0x444] ss:$16 sps:$4 sm:$0xff]  }
  0xe4   :  { %1572 = vmatprep.subr.bf16.mxu0 %v10265_v45  ;;  %1685 = vmatprep.subr.bf16.mxu1 %v10268_v17  ;;  %v10291_v45 = vld [vmem:[#allocation6 + $0x440] ss:$16 sps:$4 sm:$0xff]   ;;  %v10299_v17 = vld [vmem:[#allocation6 + $0x464] ss:$16 sps:$4 sm:$0xff]  }
  0xe6   :  { %1029 = vmatmul.mubr.bf16.gmra.mrb[28].mxu0 %v11658_v15  ;;  %1142 = vmatmul.mubr.bf16.gmra.mrb[28].mxu1 %v11658_v15 }
  0xe7   :  { %1573 = vmatpush1.bf16.msra.mxu0 %v10263_v19  ;;  %1686 = vmatpush1.bf16.msra.mxu1 %v10266_v51  ;;  %v10300_v19 = vld [vmem:[#allocation6 + $0x468] ss:$16 sps:$4 sm:$0xff]   ;;  %v10307_v51 = vld [vmem:[#allocation6 + $0x484] ss:$16 sps:$4 sm:$0xff]  }
  0xe8   :  { %1574 = vmatprep.subr.bf16.mxu0 %v10271_v20  ;;  %1687 = vmatprep.subr.bf16.mxu1 %v10274_v14  ;;  %v322_v20 = vld [vmem:[#allocation3] sm:$0xee]  ;;  %v323_v14 = vld [vmem:[#allocation3 + $0x18] sm:$0xee] }
  0xe9   :  { %1576 = vmatprep.mubr.bf16.mxu0 %v11386_v57  ;;  %1689 = vmatprep.mubr.bf16.mxu1 %v11386_v57  ;;  %v10296_v57 = vld [vmem:[#allocation6 + $0x44c] ss:$16 sps:$4 sm:$0xff]  }
  0xeb   :  { %1575 = vmatpush1.bf16.msra.mxu0 %v10269_v21  ;;  %1688 = vmatpush1.bf16.msra.mxu1 %v10272_v38  ;;  %v10305_v21 = vld [vmem:[#allocation6 + $0x480] ss:$16 sps:$4 sm:$0xff]   ;;  %v10308_v38 = vld [vmem:[#allocation6 + $0x488] ss:$16 sps:$4 sm:$0xff]  }
  0xec   :  { %2219 = vmatprep.subr.bf16.mxu0 %v10279_v26  ;;  %2332 = vmatprep.subr.bf16.mxu1 %v10282_v50  ;;  %v8656_v26 = vrot.slane %v322_v20, 9  ;;  %v8657_v50 = vrot.slane %v323_v14, 9  ;;  %v329_v20 = vld [vmem:[#allocation3 + $0xa8] sm:$0xee] }
  0xed   :  { %v10316_v14 = vld [vmem:[#allocation6 + $0x4ac] ss:$16 sps:$4 sm:$0xff]  }
  0xee   :  { %1577 = vmatmul.mubr.bf16.vlgmr.msra.gmra.mrb[0].mxu0 %v11389_v61  ;;  %1690 = vmatmul.mubr.bf16.vlgmr.msra.gmra.mrb[0].mxu1 %v11389_v61  ;;  %v10302_v61 = vld [vmem:[#allocation6 + $0x46c] ss:$16 sps:$4 sm:$0xff]  }
  0xef   :  { %2220 = vmatpush1.bf16.msra.mxu0 %v10277_v0  ;;  %2333 = vmatpush1.bf16.msra.mxu1 %v10280_v28  ;;  %v324_v0 = vld [vmem:[#allocation3 + $0x30] sm:$0xee] }
  0xf0   :  { %2221 = vmatprep.subr.bf16.mxu0 %v10285_v7  ;;  %2334 = vmatprep.subr.bf16.mxu1 %v10288_v6  ;;  %v10313_v28 = vld [vmem:[#allocation6 + $0x4a4] ss:$16 sps:$4 sm:$0xff]   ;;  %v8658_v7 = vrot.slane %v324_v0, 9 }
  0xf1   :  { %1586 = vmatprep.mubr.bf16.mxu0 %v11409_v25  ;;  %1699 = vmatprep.mubr.bf16.mxu1 %v11409_v25  ;;  %v10310_v25 = vld [vmem:[#allocation6 + $0x48c] ss:$16 sps:$4 sm:$0xff]  }
  0xf3   :  { %2222 = vmatpush1.bf16.msra.mxu0 %v10283_v54  ;;  %2335 = vmatpush1.bf16.msra.mxu1 %v10286_v22  ;;  %v326_v54 = vld [vmem:[#allocation3 + $0x60] sm:$0xee]  ;;  %v327_v22 = vld [vmem:[#allocation3 + $0x78] sm:$0xee] }
  0xf4   :  { %2223 = vmatprep.subr.bf16.mxu0 %v10293_v58  ;;  %2336 = vmatprep.subr.bf16.mxu1 %v10296_v57  ;;  %v12776_v58 = vrot.slane %v11378_v49, 5 }
  0xf6   :  { %1587 = vmatmul.mubr.bf16.gmra.mrb[4].mxu0 %v11414_v32  ;;  %1700 = vmatmul.mubr.bf16.gmra.mrb[4].mxu1 %v11414_v32  ;;  %v325_v32 = vld [vmem:[#allocation3 + $0x48] sm:$0xee]  ;;  %v360_v57 = vsel %vm11485_vm5, %v8656_v26, %v12776_v58  ;;  %v10335_v58 = vld [vmem:[#allocation6 + $0x504] ss:$16 sps:$4 sm:$0xff]  }
  0xf7   :  { %2224 = vmatpush1.bf16.msra.mxu0 %v10291_v45  ;;  %2337 = vmatpush1.bf16.msra.mxu1 %v10294_v41  ;;  %v8659_v6 = vrot.slane %v325_v32, 9  ;;  %v8660_v41 = vrot.slane %v326_v54, 9  ;;  %v11688_v49 = vcombine.high %v360_v57, %v11503_v37 }
  0xf8   :  { %2225 = vmatprep.subr.bf16.mxu0 %v10299_v17  ;;  %2338 = vmatprep.subr.bf16.mxu1 %v10302_v61  ;;  %v8661_v17 = vrot.slane %v327_v22, 9  ;;  %v328_v61 = vld [vmem:[#allocation3 + $0x90] sm:$0xee] }
  0xf9   :  { %1596 = vmatprep.mubr.bf16.mxu0 %v11425_v53  ;;  %1709 = vmatprep.mubr.bf16.mxu1 %v11425_v53  ;;  %v12777_v53 = vrot.slane %v11397_v12, 5  ;;  %v8662_v12 = vrot.slane %v328_v61, 9  ;;  %v10325_v22 = vld [vmem:[#allocation6 + $0x4e0] ss:$16 sps:$4 sm:$0xff]   ;;  %v10349_v61 = vld [vmem:[#allocation6 + $0x544] ss:$16 sps:$4 sm:$0xff]  }
  0xfb   :  { %2226 = vmatpush1.bf16.msra.mxu0 %v10297_v33  ;;  %2339 = vmatpush1.bf16.msra.mxu1 %v10300_v19  ;;  %v367_v45 = vsel %vm11485_vm5, %v8657_v50, %v12777_v53  ;;  %v11685_v33 = vcombine.low %v360_v57, %v11503_v37  ;;  %v12778_v50 = vrot.slane %v11418_v40, 5  ;;  %v388_v37 = vsel %vm11485_vm5, %v8660_v41, %v387_v60  ;;  %v10333_v57 = vld [vmem:[#allocation6 + $0x500] ss:$16 sps:$4 sm:$0xff]   ;;  %v10336_v53 = vld [vmem:[#allocation6 + $0x508] ss:$16 sps:$4 sm:$0xff]  }
  0xfc   :  { %2227 = vmatprep.subr.bf16.mxu0 %v10307_v51  ;;  %2340 = vmatprep.subr.bf16.mxu1 %v10310_v25  ;;  %v11691_v19 = vcombine.high %v367_v45, %v11537_v35  ;;  %v11694_v26 = vcombine.low %v367_v45, %v11537_v35  ;;  %v12779_v25 = vrot.slane %v11437_v10, 5  ;;  %v10311_v35 = vld [vmem:[#allocation6 + $0x4a0] ss:$16 sps:$4 sm:$0xff]   ;;  %v11726_v54 = vcombine.low %v388_v37, %v11622_v2  ;;  %v10341_v45 = vld [vmem:[#allocation6 + $0x524] ss:$16 sps:$4 sm:$0xff]  }
  0xfd   :  { %v374_v51 = vsel %vm11485_vm5, %v8658_v7, %v12778_v50  ;;  %v8663_v7 = vrot.slane %v329_v20, 9  ;;  %v10339_v41 = vld [vmem:[#allocation6 + $0x520] ss:$16 sps:$4 sm:$0xff]   ;;  %v10358_v50 = vld [vmem:[#allocation6 + $0x56c] ss:$16 sps:$4 sm:$0xff]  }
  0xfe   :  { %v381_v0 = vsel %vm11485_vm5, %v8659_v6, %v12779_v25  ;;  %1597 = vmatmul.mubr.bf16.gmra.mrb[8].mxu0 %v11429_v62  ;;  %1710 = vmatmul.mubr.bf16.gmra.mrb[8].mxu1 %v11429_v62  ;;  %v11711_v40 = vcombine.high %v374_v51, %v11593_v42  ;;  %v11714_v32 = vcombine.low %v374_v51, %v11593_v42  ;;  %v10321_v6 = vld [vmem:[#allocation6 + $0x4c4] ss:$16 sps:$4 sm:$0xff]   ;;  %v10324_v42 = vld [vmem:[#allocation6 + $0x4cc] ss:$16 sps:$4 sm:$0xff]   ;;  %v10347_v20 = vld [vmem:[#allocation6 + $0x540] ss:$16 sps:$4 sm:$0xff]  }
  0xff   :  { %v11717_v10 = vcombine.high %v381_v0, %v11610_v30  ;;  %2228 = vmatpush1.bf16.msra.mxu0 %v10305_v21  ;;  %2341 = vmatpush1.bf16.msra.mxu1 %v10308_v38  ;;  %v11720_v60 = vcombine.low %v381_v0, %v11610_v30  ;;  %v11723_v62 = vcombine.high %v388_v37, %v11622_v2  ;;  %v10356_v51 = vld [vmem:[#allocation6 + $0x568] ss:$16 sps:$4 sm:$0xff]   ;;  %v10363_v25 = vld [vmem:[#allocation6 + $0x584] ss:$16 sps:$4 sm:$0xff]   ;;  %v10366_v0 = vld [vmem:[#allocation6 + $0x58c] ss:$16 sps:$4 sm:$0xff]  }
 0x100   :  { %2229 = vmatprep.subr.bf16.mxu0 %v10313_v28  ;;  %2342 = vmatprep.subr.bf16.mxu1 %v10316_v14  ;;  %v395_v21 = vsel %vm11485_vm5, %v8661_v17, %v394_v13  ;;  %v402_v30 = vsel %vm11485_vm5, %v8662_v12, %v401_v18  ;;  %v409_v38 = vsel %vm11485_vm5, %v8663_v7, %v408_v1  ;;  %v10319_v13 = vld [vmem:[#allocation6 + $0x4c0] ss:$16 sps:$4 sm:$0xff]   ;;  %v10327_v28 = vld [vmem:[#allocation6 + $0x4e4] ss:$16 sps:$4 sm:$0xff]   ;;  %v10342_v17 = vld [vmem:[#allocation6 + $0x528] ss:$16 sps:$4 sm:$0xff]  }
 0x101   :  { %1606 = vmatprep.mubr.bf16.mxu0 %v11444_v23  ;;  %1719 = vmatprep.mubr.bf16.mxu1 %v11444_v23  ;;  %v11743_v2 = vcombine.high %v395_v21, %v11628_v56  ;;  %v11746_v34 = vcombine.low %v395_v21, %v11628_v56  ;;  %v11749_v24 = vcombine.high %v402_v30, %v11646_v48  ;;  %v10322_v23 = vld [vmem:[#allocation6 + $0x4c8] ss:$16 sps:$4 sm:$0xff]   ;;  %v10330_v56 = vld [vmem:[#allocation6 + $0x4ec] ss:$16 sps:$4 sm:$0xff]   ;;  %v10355_v12 = vld [vmem:[#allocation6 + $0x564] ss:$16 sps:$4 sm:$0xff]  }
 0x102   :  { %v11752_v18 = vcombine.low %v402_v30, %v11646_v48  ;;  %v11755_v16 = vcombine.high %v409_v38, %v11662_v39  ;;  %v11758_v1 = vcombine.low %v409_v38, %v11662_v39  ;;  %v10328_v48 = vld [vmem:[#allocation6 + $0x4e8] ss:$16 sps:$4 sm:$0xff]   ;;  %v10338_v39 = vld [vmem:[#allocation6 + $0x50c] ss:$16 sps:$4 sm:$0xff]   ;;  %v10383_v30 = vld [vmem:[#allocation6 + $0x5e4] ss:$16 sps:$4 sm:$0xff]  }
 0x103   :  { %2230 = vmatpush1.bf16.msra.mxu0 %v10311_v35  ;;  %2343 = vmatpush1.bf16.msra.mxu1 %v10314_v46  ;;  %v10350_v14 = vld [vmem:[#allocation6 + $0x548] ss:$16 sps:$4 sm:$0xff]   ;;  %v10369_v35 = vld [vmem:[#allocation6 + $0x5a4] ss:$16 sps:$4 sm:$0xff]   ;;  %v10372_v7 = vld [vmem:[#allocation6 + $0x5ac] ss:$16 sps:$4 sm:$0xff]  }
 0x104   :  { %2231 = vmatprep.subr.bf16.mxu0 %v10321_v6  ;;  %2344 = vmatprep.subr.bf16.mxu1 %v10324_v42  ;;  %v10364_v37 = vld [vmem:[#allocation6 + $0x588] ss:$16 sps:$4 sm:$0xff]   ;;  %v10367_v46 = vld [vmem:[#allocation6 + $0x5a0] ss:$16 sps:$4 sm:$0xff]   ;;  %v10377_v6 = vld [vmem:[#allocation6 + $0x5c4] ss:$16 sps:$4 sm:$0xff]  }
 0x105   :  { %v10380_v42 = vld [vmem:[#allocation6 + $0x5cc] ss:$16 sps:$4 sm:$0xff]   ;;  %v10378_v21 = vld [vmem:[#allocation6 + $0x5c8] ss:$16 sps:$4 sm:$0xff]  }
 0x106   :  { %1607 = vmatmul.mubr.bf16.gmra.mrb[12].mxu0 %v11453_v31  ;;  %1720 = vmatmul.mubr.bf16.gmra.mrb[12].mxu1 %v11453_v31  ;;  %v10344_v31 = vld [vmem:[#allocation6 + $0x52c] ss:$16 sps:$4 sm:$0xff]  }
 0x107   :  { %2232 = vmatpush1.bf16.msra.mxu0 %v10319_v13  ;;  %2345 = vmatpush1.bf16.msra.mxu1 %v10322_v23  ;;  %v10386_v38 = vld [vmem:[#allocation6 + $0x5ec] ss:$16 sps:$4 sm:$0xff]   ;;  %v10381_v13 = vld [vmem:[#allocation6 + $0x5e0] ss:$16 sps:$4 sm:$0xff]   ;;  %v10389_v23 = vld [vmem:[#allocation8 + $0x4] ss:$16 sps:$4 sm:$0xff]  }
 0x108   :  { %2233 = vmatprep.subr.bf16.mxu0 %v10327_v28  ;;  %2346 = vmatprep.subr.bf16.mxu1 %v10330_v56  ;;  %v10392_v28 = vld [vmem:[#allocation8 + $0xc] ss:$16 sps:$4 sm:$0xff]   ;;  %v10390_v56 = vld [vmem:[#allocation8 + $0x8] ss:$16 sps:$4 sm:$0xff]  }
 0x109   :  { %1616 = vmatprep.mubr.bf16.mxu0 %v11475_v63  ;;  %1729 = vmatprep.mubr.bf16.mxu1 %v11475_v63  ;;  %v10352_v63 = vld [vmem:[#allocation6 + $0x54c] ss:$16 sps:$4 sm:$0xff]  }
 0x10b   :  { %2234 = vmatpush1.bf16.msra.mxu0 %v10325_v22  ;;  %2347 = vmatpush1.bf16.msra.mxu1 %v10328_v48  ;;  %v10395_v22 = vld [vmem:[#allocation8 + $0x24] ss:$16 sps:$4 sm:$0xff]   ;;  %v10398_v48 = vld [vmem:[#allocation8 + $0x2c] ss:$16 sps:$4 sm:$0xff]  }
 0x10c   :  { %2235 = vmatprep.subr.bf16.mxu0 %v10335_v58  ;;  %2348 = vmatprep.subr.bf16.mxu1 %v10338_v39  ;;  %v10396_v58 = vld [vmem:[#allocation8 + $0x28] ss:$16 sps:$4 sm:$0xff]   ;;  %v10401_v39 = vld [vmem:[#allocation8 + $0x44] ss:$16 sps:$4 sm:$0xff]  }
 0x10e   :  { %1617 = vmatmul.mubr.bf16.gmra.mrb[16].mxu0 %v11481_v9  ;;  %1730 = vmatmul.mubr.bf16.gmra.mrb[16].mxu1 %v11481_v9  ;;  %v10353_v9 = vld [vmem:[#allocation6 + $0x560] ss:$16 sps:$4 sm:$0xff]  }
 0x10f   :  { %2236 = vmatpush1.bf16.msra.mxu0 %v10333_v57  ;;  %2349 = vmatpush1.bf16.msra.mxu1 %v10336_v53  ;;  %v10399_v57 = vld [vmem:[#allocation8 + $0x40] ss:$16 sps:$4 sm:$0xff]   ;;  %v10402_v53 = vld [vmem:[#allocation8 + $0x48] ss:$16 sps:$4 sm:$0xff]  }
 0x110   :  { %2237 = vmatprep.subr.bf16.mxu0 %v10341_v45  ;;  %2350 = vmatprep.subr.bf16.mxu1 %v10344_v31  ;;  %v10407_v45 = vld [vmem:[#allocation8 + $0x64] ss:$16 sps:$4 sm:$0xff]   ;;  %v10410_v31 = vld [vmem:[#allocation8 + $0x6c] ss:$16 sps:$4 sm:$0xff]  }
 0x111   :  { %1626 = vmatprep.mubr.bf16.mxu0 %v11513_v52  ;;  %1739 = vmatprep.mubr.bf16.mxu1 %v11513_v52  ;;  %v10361_v52 = vld [vmem:[#allocation6 + $0x580] ss:$16 sps:$4 sm:$0xff]  }
 0x113   :  { %2238 = vmatpush1.bf16.msra.mxu0 %v10339_v41  ;;  %2351 = vmatpush1.bf16.msra.mxu1 %v10342_v17  ;;  %v10413_v41 = vld [vmem:[#allocation8 + $0x84] ss:$16 sps:$4 sm:$0xff]   ;;  %v10416_v17 = vld [vmem:[#allocation8 + $0x8c] ss:$16 sps:$4 sm:$0xff]  }
 0x114   :  { %2239 = vmatprep.subr.bf16.mxu0 %v10349_v61  ;;  %2352 = vmatprep.subr.bf16.mxu1 %v10352_v63  ;;  %v10411_v61 = vld [vmem:[#allocation8 + $0x80] ss:$16 sps:$4 sm:$0xff]   ;;  %v10414_v63 = vld [vmem:[#allocation8 + $0x88] ss:$16 sps:$4 sm:$0xff]  }
 0x116   :  { %1627 = vmatmul.mubr.bf16.gmra.mrb[20].mxu0 %v11520_v5  ;;  %1740 = vmatmul.mubr.bf16.gmra.mrb[20].mxu1 %v11520_v5  ;;  %v10370_v5 = vld [vmem:[#allocation6 + $0x5a8] ss:$16 sps:$4 sm:$0xff]  }
 0x117   :  { %2240 = vmatpush1.bf16.msra.mxu0 %v10347_v20  ;;  %2353 = vmatpush1.bf16.msra.mxu1 %v10350_v14  ;;  %v10419_v20 = vld [vmem:[#allocation8 + $0xa4] ss:$16 sps:$4 sm:$0xff]   ;;  %v10422_v14 = vld [vmem:[#allocation8 + $0xac] ss:$16 sps:$4 sm:$0xff]  }
 0x118   :  { %2241 = vmatprep.subr.bf16.mxu0 %v10355_v12  ;;  %2354 = vmatprep.subr.bf16.mxu1 %v10358_v50  ;;  %v10425_v12 = vld [vmem:[#allocation8 + $0xc4] ss:$16 sps:$4 sm:$0xff]   ;;  %v10428_v50 = vld [vmem:[#allocation8 + $0xcc] ss:$16 sps:$4 sm:$0xff]  }
 0x119   :  { %1636 = vmatprep.mubr.bf16.mxu0 %v11546_v47  ;;  %1749 = vmatprep.mubr.bf16.mxu1 %v11546_v47  ;;  %v10375_v47 = vld [vmem:[#allocation6 + $0x5c0] ss:$16 sps:$4 sm:$0xff]  }
 0x11b   :  { %2242 = vmatpush1.bf16.msra.mxu0 %v10353_v9  ;;  %2355 = vmatpush1.bf16.msra.mxu1 %v10356_v51  ;;  %v10423_v9 = vld [vmem:[#allocation8 + $0xc0] ss:$16 sps:$4 sm:$0xff]   ;;  %v10426_v51 = vld [vmem:[#allocation8 + $0xc8] ss:$16 sps:$4 sm:$0xff]  }
 0x11c   :  { %2243 = vmatprep.subr.bf16.mxu0 %v10363_v25  ;;  %2356 = vmatprep.subr.bf16.mxu1 %v10366_v0  ;;  %v10431_v25 = vld [vmem:[#allocation8 + $0xe4] ss:$16 sps:$4 sm:$0xff]   ;;  %v10434_v0 = vld [vmem:[#allocation8 + $0xec] ss:$16 sps:$4 sm:$0xff]  }
 0x11e   :  { %1637 = vmatmul.mubr.bf16.gmra.mrb[24].mxu0 %v11553_v29  ;;  %1750 = vmatmul.mubr.bf16.gmra.mrb[24].mxu1 %v11553_v29  ;;  %v10384_v29 = vld [vmem:[#allocation6 + $0x5e8] ss:$16 sps:$4 sm:$0xff]  }
 0x11f   :  { %2244 = vmatpush1.bf16.msra.mxu0 %v10361_v52  ;;  %2357 = vmatpush1.bf16.msra.mxu1 %v10364_v37  ;;  %v10437_v52 = vld [vmem:[#allocation8 + $0x104] ss:$16 sps:$4 sm:$0xff]   ;;  %v10440_v37 = vld [vmem:[#allocation8 + $0x10c] ss:$16 sps:$4 sm:$0xff]  }
 0x120   :  { %2245 = vmatprep.subr.bf16.mxu0 %v10369_v35  ;;  %2358 = vmatprep.subr.bf16.mxu1 %v10372_v7  ;;  %v10435_v35 = vld [vmem:[#allocation8 + $0x100] ss:$16 sps:$4 sm:$0xff]   ;;  %v10438_v7 = vld [vmem:[#allocation8 + $0x108] ss:$16 sps:$4 sm:$0xff]  }
 0x121   :  { %1646 = vmatprep.mubr.bf16.mxu0 %v11574_v44  ;;  %1759 = vmatprep.mubr.bf16.mxu1 %v11574_v44  ;;  %v10387_v44 = vld [vmem:[#allocation8] ss:$16 sps:$4 sm:$0xff]  }
 0x123   :  { %2246 = vmatpush1.bf16.msra.mxu0 %v10367_v46  ;;  %2359 = vmatpush1.bf16.msra.mxu1 %v10370_v5  ;;  %v10447_v46 = vld [vmem:[#allocation8 + $0x140] ss:$16 sps:$4 sm:$0xff]   ;;  %v10458_v5 = vld [vmem:[#allocation8 + $0x16c] ss:$16 sps:$4 sm:$0xff]  }
 0x124   :  { %2247 = vmatprep.subr.bf16.mxu0 %v10377_v6  ;;  %2360 = vmatprep.subr.bf16.mxu1 %v10380_v42  ;;  %v10453_v6 = vld [vmem:[#allocation8 + $0x160] ss:$16 sps:$4 sm:$0xff]  }
 0x125   :  { %v2698_v42 = vld [vmem:[#allocation2] sm:$0x11] }
 0x126   :  { %1647 = vmatmul.mubr.bf16.gmra.mrb[28].mxu0 %v11580_v36  ;;  %1760 = vmatmul.mubr.bf16.gmra.mrb[28].mxu1 %v11580_v36  ;;  %v10393_v36 = vld [vmem:[#allocation8 + $0x20] ss:$16 sps:$4 sm:$0xff]  }
 0x127   :  { %2248 = vmatpush1.bf16.msra.mxu0 %v10375_v47  ;;  %2361 = vmatpush1.bf16.msra.mxu1 %v10378_v21  ;;  %v2701_v21 = vld [vmem:[#allocation2 + $0x8] sm:$0x11] }
 0x128   :  { %2249 = vmatprep.subr.bf16.mxu0 %v10383_v30  ;;  %2362 = vmatprep.subr.bf16.mxu1 %v10386_v38  ;;  %v2699_v30 = vsel %vm11813_vm14, 0, %v2698_v42  ;;  %v2702_v38 = vsel %vm11813_vm14, 0, %v2701_v21  ;;  %v2725_v42 = vld [vmem:[#allocation2 + $0xc8] sm:$0x11] }
 0x129   :  { %2251 = vmatprep.mubr.bf16.mxu0 %v11688_v49  ;;  %2364 = vmatprep.mubr.bf16.mxu1 %v11688_v49  ;;  %v10404_v49 = vld [vmem:[#allocation8 + $0x4c] ss:$16 sps:$4 sm:$0xff]   ;;  %2700 = vst [vmem:[#allocation2] sm:$0x11] %v2699_v30  ;;  %2703 = vst [vmem:[#allocation2 + $0x8] sm:$0x11] %v2702_v38 }
 0x12a   :  { %v2726_v21 = vsel %vm11813_vm14, 0, %v2725_v42  ;;  %v2775_v30 = vld [vmem:[#allocation2 + $0xe0] sm:$0x11] }
 0x12b   :  { %2250 = vmatpush1.bf16.msra.mxu0 %v10381_v13  ;;  %2363 = vmatpush1.bf16.msra.mxu1 %v10384_v29  ;;  %v2751_v13 = vld [vmem:[#allocation2 + $0x20] sm:$0x11]  ;;  %v2754_v29 = vld [vmem:[#allocation2 + $0x28] sm:$0x11]  ;;  %2727 = vst [vmem:[#allocation2 + $0xc8] sm:$0x11] %v2726_v21 }
 0x12c   :  { %4566 = vmatprep.subr.bf16.mxu0 %v10389_v23  ;;  %4792 = vmatprep.subr.bf16.mxu1 %v10392_v28  ;;  %v2752_v28 = vsel %vm11825_vm1, 0, %v2751_v13  ;;  %v2776_v38 = vsel %vm11825_vm1, 0, %v2775_v30  ;;  %v2778_v13 = vld [vmem:[#allocation2 + $0xe8] sm:$0x11] }
 0x12d   :  { %2753 = vst [vmem:[#allocation2 + $0x20] sm:$0x11] %v2752_v28  ;;  %2777 = vst [vmem:[#allocation2 + $0xe0] sm:$0x11] %v2776_v38  ;;  %v2728_v28 = vld [vmem:[#allocation2 + $0xf0] sm:$0x11] }
 0x12e   :  { %2252 = vmatmul.mubr.bf16.vlgmr.msra.gmra.mrb[0].mxu0 %v11685_v33  ;;  %2365 = vmatmul.mubr.bf16.vlgmr.msra.gmra.mrb[0].mxu1 %v11685_v33  ;;  %v10405_v33 = vld [vmem:[#allocation8 + $0x60] ss:$16 sps:$4 sm:$0xff]  }
 0x12f   :  { %2261 = vmatprep.mubr.bf16.mxu0 %v11691_v19  ;;  %2374 = vmatprep.mubr.bf16.mxu1 %v11691_v19  ;;  %v10408_v19 = vld [vmem:[#allocation8 + $0x68] ss:$16 sps:$4 sm:$0xff]  }
 0x130   :  { %4567 = vmatpush1.bf16.msra.mxu0 %v10387_v44  ;;  %4793 = vmatpush1.bf16.msra.mxu1 %v10390_v56  ;;  %v2755_v44 = vsel %vm11825_vm1, 0, %v2754_v29  ;;  %v10461_v56 = vld [vmem:[#allocation8 + $0x184] ss:$16 sps:$4 sm:$0xff]   ;;  %v2779_v29 = vsel %vm11825_vm1, 0, %v2778_v13 }
 0x131   :  { %4568 = vmatprep.subr.bf16.mxu0 %v10395_v22  ;;  %4794 = vmatprep.subr.bf16.mxu1 %v10398_v48  ;;  %v10464_v22 = vld [vmem:[#allocation8 + $0x18c] ss:$16 sps:$4 sm:$0xff]   ;;  %2756 = vst [vmem:[#allocation2 + $0x28] sm:$0x11] %v2755_v44  ;;  %v10459_v48 = vld [vmem:[#allocation8 + $0x180] ss:$16 sps:$4 sm:$0xff]  }
 0x132   :  { %2780 = vst [vmem:[#allocation2 + $0xe8] sm:$0x11] %v2779_v29  ;;  %v2729_v44 = vsel %vm11813_vm14, 0, %v2728_v28  ;;  %v3313_v4 = vld [vmem:[#allocation2 + $0xc8] sm:$0xff] }
 0x133   :  { %2730 = vst [vmem:[#allocation2 + $0xf0] sm:$0x11] %v2729_v44 }
 0x134   :  { %4569 = vmatpush1.bf16.msra.mxu0 %v10393_v36  ;;  %4795 = vmatpush1.bf16.msra.mxu1 %v10396_v58  ;;  %v10462_v36 = vld [vmem:[#allocation8 + $0x188] ss:$16 sps:$4 sm:$0xff]   ;;  %v10467_v58 = vld [vmem:[#allocation8 + $0x1a4] ss:$16 sps:$4 sm:$0xff]  }
 0x135   :  { %4570 = vmatprep.subr.bf16.mxu0 %v10401_v39  ;;  %4796 = vmatprep.subr.bf16.mxu1 %v10404_v49  ;;  %v10470_v39 = vld [vmem:[#allocation8 + $0x1ac] ss:$16 sps:$4 sm:$0xff]  }
 0x136   :  { %2262 = vmatmul.mubr.bf16.gmra.mrb[4].mxu0 %v11694_v26  ;;  %2375 = vmatmul.mubr.bf16.gmra.mrb[4].mxu1 %v11694_v26  ;;  %v10417_v26 = vld [vmem:[#allocation8 + $0xa0] ss:$16 sps:$4 sm:$0xff]  }
 0x137   :  { %2271 = vmatprep.mubr.bf16.mxu0 %v11711_v40  ;;  %2384 = vmatprep.mubr.bf16.mxu1 %v11711_v40  ;;  %v10420_v40 = vld [vmem:[#allocation8 + $0xa8] ss:$16 sps:$4 sm:$0xff]  }
 0x138   :  { %4571 = vmatpush1.bf16.msra.mxu0 %v10399_v57  ;;  %4797 = vmatpush1.bf16.msra.mxu1 %v10402_v53  ;;  %v10465_v57 = vld [vmem:[#allocation8 + $0x1a0] ss:$16 sps:$4 sm:$0xff]   ;;  %v10468_v53 = vld [vmem:[#allocation8 + $0x1a8] ss:$16 sps:$4 sm:$0xff]  }
 0x139   :  { %4572 = vmatprep.subr.bf16.mxu0 %v10407_v45  ;;  %4798 = vmatprep.subr.bf16.mxu1 %v10410_v31  ;;  %v2704_v45 = vld [vmem:[#allocation2 + $0x30] sm:$0x11]  ;;  %v2707_v31 = vld [vmem:[#allocation2 + $0x38] sm:$0x11] }
 0x13c   :  { %4573 = vmatpush1.bf16.msra.mxu0 %v10405_v33  ;;  %4799 = vmatpush1.bf16.msra.mxu1 %v10408_v19  ;;  %v2705_v33 = vsel %vm11813_vm14, 0, %v2704_v45  ;;  %v2708_v19 = vsel %vm11813_vm14, 0, %v2707_v31  ;;  %v2737_v45 = vld [vmem:[#allocation2 + $0x128] sm:$0x11] }
 0x13d   :  { %4574 = vmatprep.subr.bf16.mxu0 %v10413_v41  ;;  %4800 = vmatprep.subr.bf16.mxu1 %v10416_v17  ;;  %2706 = vst [vmem:[#allocation2 + $0x30] sm:$0x11] %v2705_v33  ;;  %2709 = vst [vmem:[#allocation2 + $0x38] sm:$0x11] %v2708_v19  ;;  %v2757_v41 = vld [vmem:[#allocation2 + $0x50] sm:$0x11] }
 0x13e   :  { %2272 = vmatmul.mubr.bf16.gmra.mrb[8].mxu0 %v11714_v32  ;;  %2385 = vmatmul.mubr.bf16.gmra.mrb[8].mxu1 %v11714_v32  ;;  %v10429_v32 = vld [vmem:[#allocation8 + $0xe0] ss:$16 sps:$4 sm:$0xff]   ;;  %v2760_v17 = vld [vmem:[#allocation2 + $0x58] sm:$0x11]  ;;  %v2738_v31 = vsel %vm11813_vm14, 0, %v2737_v45 }
 0x13f   :  { %2281 = vmatprep.mubr.bf16.mxu0 %v11717_v10  ;;  %2394 = vmatprep.mubr.bf16.mxu1 %v11717_v10  ;;  %v10432_v10 = vld [vmem:[#allocation8 + $0xe8] ss:$16 sps:$4 sm:$0xff]   ;;  %2739 = vst [vmem:[#allocation2 + $0x128] sm:$0x11] %v2738_v31  ;;  %v2787_v33 = vld [vmem:[#allocation2 + $0x140] sm:$0x11] }
 0x140   :  { %4575 = vmatpush1.bf16.msra.mxu0 %v10411_v61  ;;  %4801 = vmatpush1.bf16.msra.mxu1 %v10414_v63  ;;  %v10473_v61 = vld [vmem:[#allocation8 + $0x1c4] ss:$16 sps:$4 sm:$0xff]   ;;  %v2758_v63 = vsel %vm11825_vm1, 0, %v2757_v41  ;;  %v2788_v19 = vsel %vm11825_vm1, 0, %v2787_v33  ;;  %v2790_v41 = vld [vmem:[#allocation2 + $0x148] sm:$0x11] }
 0x141   :  { %4576 = vmatprep.subr.bf16.mxu0 %v10419_v20  ;;  %4802 = vmatprep.subr.bf16.mxu1 %v10422_v14  ;;  %v2761_v20 = vsel %vm11825_vm1, 0, %v2760_v17  ;;  %v10471_v14 = vld [vmem:[#allocation8 + $0x1c0] ss:$16 sps:$4 sm:$0xff]   ;;  %2759 = vst [vmem:[#allocation2 + $0x50] sm:$0x11] %v2758_v63  ;;  %v2791_v17 = vsel %vm11825_vm1, 0, %v2790_v41 }
 0x142   :  { %2762 = vst [vmem:[#allocation2 + $0x58] sm:$0x11] %v2761_v20  ;;  %2789 = vst [vmem:[#allocation2 + $0x140] sm:$0x11] %v2788_v19  ;;  %v2743_v20 = vld [vmem:[#allocation2 + $0x158] sm:$0x11] }
 0x143   :  { %2792 = vst [vmem:[#allocation2 + $0x148] sm:$0x11] %v2791_v17 }
 0x144   :  { %4577 = vmatpush1.bf16.msra.mxu0 %v10417_v26  ;;  %4803 = vmatpush1.bf16.msra.mxu1 %v10420_v40  ;;  %v10474_v26 = vld [vmem:[#allocation8 + $0x1c8] ss:$16 sps:$4 sm:$0xff]   ;;  %v10476_v40 = vld [vmem:[#allocation8 + $0x1cc] ss:$16 sps:$4 sm:$0xff]  }
 0x145   :  { %4578 = vmatprep.subr.bf16.mxu0 %v10425_v12  ;;  %4804 = vmatprep.subr.bf16.mxu1 %v10428_v50  ;;  %v10479_v12 = vld [vmem:[#allocation8 + $0x1e4] ss:$16 sps:$4 sm:$0xff]   ;;  %v10477_v50 = vld [vmem:[#allocation8 + $0x1e0] ss:$16 sps:$4 sm:$0xff]  }
 0x146   :  { %2282 = vmatmul.mubr.bf16.gmra.mrb[12].mxu0 %v11720_v60  ;;  %2395 = vmatmul.mubr.bf16.gmra.mrb[12].mxu1 %v11720_v60  ;;  %v10443_v60 = vld [vmem:[#allocation8 + $0x124] ss:$16 sps:$4 sm:$0xff]  }
 0x147   :  { %2291 = vmatprep.mubr.bf16.mxu0 %v11723_v62  ;;  %2404 = vmatprep.mubr.bf16.mxu1 %v11723_v62  ;;  %v10446_v62 = vld [vmem:[#allocation8 + $0x12c] ss:$16 sps:$4 sm:$0xff]  }
 0x148   :  { %4579 = vmatpush1.bf16.msra.mxu0 %v10423_v9  ;;  %4805 = vmatpush1.bf16.msra.mxu1 %v10426_v51  ;;  %v10480_v9 = vld [vmem:[#allocation8 + $0x1e8] ss:$16 sps:$4 sm:$0xff]   ;;  %v10482_v51 = vld [vmem:[#allocation8 + $0x1ec] ss:$16 sps:$4 sm:$0xff]  }
 0x149   :  { %4580 = vmatprep.subr.bf16.mxu0 %v10431_v25  ;;  %4806 = vmatprep.subr.bf16.mxu1 %v10434_v0  ;;  %v2710_v25 = vld [vmem:[#allocation2 + $0x60] sm:$0x11]  ;;  %v2713_v0 = vld [vmem:[#allocation2 + $0x68] sm:$0x11] }
 0x14c   :  { %4581 = vmatpush1.bf16.msra.mxu0 %v10429_v32  ;;  %4807 = vmatpush1.bf16.msra.mxu1 %v10432_v10  ;;  %v2711_v32 = vsel %vm11813_vm14, 0, %v2710_v25  ;;  %v2714_v10 = vsel %vm11813_vm14, 0, %v2713_v0 }
 0x14d   :  { %4582 = vmatprep.subr.bf16.mxu0 %v10437_v52  ;;  %4808 = vmatprep.subr.bf16.mxu1 %v10440_v37  ;;  %2712 = vst [vmem:[#allocation2 + $0x60] sm:$0x11] %v2711_v32  ;;  %2715 = vst [vmem:[#allocation2 + $0x68] sm:$0x11] %v2714_v10  ;;  %v2763_v52 = vld [vmem:[#allocation2 + $0x80] sm:$0x11] }
 0x14e   :  { %2292 = vmatmul.mubr.bf16.gmra.mrb[16].mxu0 %v11726_v54  ;;  %2405 = vmatmul.mubr.bf16.gmra.mrb[16].mxu1 %v11726_v54  ;;  %v10441_v54 = vld [vmem:[#allocation8 + $0x120] ss:$16 sps:$4 sm:$0xff]   ;;  %v2766_v37 = vld [vmem:[#allocation2 + $0x88] sm:$0x11] }
 0x14f   :  { %2301 = vmatprep.mubr.bf16.mxu0 %v11743_v2  ;;  %2414 = vmatprep.mubr.bf16.mxu1 %v11743_v2  ;;  %v10444_v2 = vld [vmem:[#allocation8 + $0x128] ss:$16 sps:$4 sm:$0xff]   ;;  %v2509_v32 = vld [vmem:[#allocation11] sm:$0xf] }
 0x150   :  { %4583 = vmatpush1.bf16.msra.mxu0 %v10435_v35  ;;  %4809 = vmatpush1.bf16.msra.mxu1 %v10438_v7  ;;  %v2764_v35 = vsel %vm11825_vm1, 0, %v2763_v52  ;;  %v2767_v7 = vsel %vm11825_vm1, 0, %v2766_v37 }
 0x151   :  { %4584 = vmatprep.subr.bf16.mxu0 %v10443_v60  ;;  %4810 = vmatprep.subr.bf16.mxu1 %v10446_v62  ;;  %2765 = vst [vmem:[#allocation2 + $0x80] sm:$0x11] %v2764_v35  ;;  %2768 = vst [vmem:[#allocation2 + $0x88] sm:$0x11] %v2767_v7  ;;  %v2716_v60 = vld [vmem:[#allocation2 + $0x90] sm:$0x11] }
 0x152   :  { %v2717_v62 = vsel %vm11813_vm14, 0, %v2716_v60 }
 0x153   :  { %2718 = vst [vmem:[#allocation2 + $0x90] sm:$0x11] %v2717_v62 }
 0x154   :  { %4585 = vmatpush1.bf16.msra.mxu0 %v10441_v54  ;;  %4811 = vmatpush1.bf16.msra.mxu1 %v10444_v2  ;;  %v2719_v54 = vld [vmem:[#allocation2 + $0x98] sm:$0x11] }
 0x155   :  { %v2720_v2 = vsel %vm11813_vm14, 0, %v2719_v54 }
 0x156   :  { %2302 = vmatmul.mubr.bf16.gmra.mrb[20].mxu0 %v11746_v34  ;;  %2415 = vmatmul.mubr.bf16.gmra.mrb[20].mxu1 %v11746_v34  ;;  %v10449_v34 = vld [vmem:[#allocation8 + $0x144] ss:$16 sps:$4 sm:$0xff]   ;;  %2721 = vst [vmem:[#allocation2 + $0x98] sm:$0x11] %v2720_v2 }
 0x157   :  { %2311 = vmatprep.mubr.bf16.mxu0 %v11749_v24  ;;  %2424 = vmatprep.mubr.bf16.mxu1 %v11749_v24  ;;  %v10452_v24 = vld [vmem:[#allocation8 + $0x14c] ss:$16 sps:$4 sm:$0xff]  }
 0x158   :  { %4586 = vmatprep.subr.bf16.mxu0 %v10449_v34  ;;  %4812 = vmatprep.subr.bf16.mxu1 %v10452_v24  ;;  %v2769_v34 = vld [vmem:[#allocation2 + $0xb0] sm:$0x11]  ;;  %v2772_v24 = vld [vmem:[#allocation2 + $0xb8] sm:$0x11] }
 0x159   :  { %4587 = vmatpush1.bf16.msra.mxu0 %v10447_v46  ;;  %v2770_v46 = vsel %vm11825_vm1, 0, %v2769_v34 }
 0x15a   :  { %2771 = vst [vmem:[#allocation2 + $0xb0] sm:$0x11] %v2770_v46 }
 0x15e   :  { %2312 = vmatmul.mubr.bf16.gmra.mrb[24].mxu0 %v11752_v18  ;;  %2425 = vmatmul.mubr.bf16.gmra.mrb[24].mxu1 %v11752_v18  ;;  %v10450_v18 = vld [vmem:[#allocation8 + $0x148] ss:$16 sps:$4 sm:$0xff]  }
 0x15f   :  { %2321 = vmatprep.mubr.bf16.mxu0 %v11755_v16  ;;  %2434 = vmatprep.mubr.bf16.mxu1 %v11755_v16  ;;  %v10455_v16 = vld [vmem:[#allocation8 + $0x164] ss:$16 sps:$4 sm:$0xff]  }
 0x160   :  { %4813 = vmatpush1.bf16.msra.mxu1 %v10450_v18  ;;  %4588 = vmatprep.subr.bf16.mxu0 %v10455_v16  ;;  %v2773_v18 = vsel %vm11825_vm1, 0, %v2772_v24  ;;  %v10485_v16 = vld [vmem:[#allocation8 + $0x204] ss:$16 sps:$4 sm:$0xff]  }
 0x161   :  { %4814 = vmatprep.subr.bf16.mxu1 %v10458_v5  ;;  %4589 = vmatpush1.bf16.msra.mxu0 %v10453_v6  ;;  %2774 = vst [vmem:[#allocation2 + $0xb8] sm:$0x11] %v2773_v18  ;;  %v10488_v5 = vld [vmem:[#allocation8 + $0x20c] ss:$16 sps:$4 sm:$0xff]   ;;  %v2722_v6 = vld [vmem:[#allocation2 + $0xc0] sm:$0x11] }
 0x162   :  { %4590 = vmatprep.subr.bf16.mxu0 %v10461_v56  ;;  %v2731_v56 = vld [vmem:[#allocation2 + $0xf8] sm:$0x11] }
 0x165   :  { %4591 = vmatpush1.bf16.msra.mxu0 %v10459_v48  ;;  %v2781_v48 = vld [vmem:[#allocation2 + $0x110] sm:$0x11] }
 0x166   :  { %2322 = vmatmul.mubr.bf16.gmra.mrb[28].mxu0 %v11758_v1  ;;  %2435 = vmatmul.mubr.bf16.gmra.mrb[28].mxu1 %v11758_v1  ;;  %v10456_v1 = vld [vmem:[#allocation8 + $0x168] ss:$16 sps:$4 sm:$0xff]  }
 0x167   :  { %4815 = vmatpush1.bf16.msra.mxu1 %v10456_v1  ;;  %4592 = vmatprep.subr.bf16.mxu0 %v10467_v58  ;;  %v2723_v1 = vsel %vm11813_vm14, 0, %v2722_v6  ;;  %v2784_v58 = vld [vmem:[#allocation2 + $0x118] sm:$0x11] }
 0x168   :  { %4816 = vmatprep.subr.bf16.mxu1 %v10464_v22  ;;  %2724 = vst [vmem:[#allocation2 + $0xc0] sm:$0x11] %v2723_v1  ;;  %v2732_v22 = vsel %vm11813_vm14, 0, %v2731_v56 }
 0x169   :  { %4593 = vmatpush1.bf16.msra.mxu0 %v10465_v57  ;;  %2733 = vst [vmem:[#allocation2 + $0xf8] sm:$0x11] %v2732_v22  ;;  %v2734_v57 = vld [vmem:[#allocation2 + $0x120] sm:$0x11] }
 0x16a   :  { %4594 = vmatprep.subr.bf16.mxu0 %v10473_v61  ;;  %v2740_v61 = vld [vmem:[#allocation2 + $0x150] sm:$0x11] }
 0x16b   :  { %4817 = vmatpush1.bf16.msra.mxu1 %v10462_v36  ;;  %v2782_v36 = vsel %vm11825_vm1, 0, %v2781_v48  ;;  %v2741_v63 = vsel %vm11813_vm14, 0, %v2740_v61 }
 0x16c   :  { %4818 = vmatprep.subr.bf16.mxu1 %v10470_v39  ;;  %2783 = vst [vmem:[#allocation2 + $0x110] sm:$0x11] %v2782_v36  ;;  %v2785_v39 = vsel %vm11825_vm1, 0, %v2784_v58  ;;  %2742 = vst [vmem:[#allocation2 + $0x150] sm:$0x11] %v2741_v63 }
 0x16d   :  { %4595 = vmatpush1.bf16.msra.mxu0 %v10471_v14  ;;  %2786 = vst [vmem:[#allocation2 + $0x118] sm:$0x11] %v2785_v39  ;;  %v2744_v14 = vsel %vm11813_vm14, 0, %v2743_v20 }
 0x16e   :  { %4596 = vmatprep.subr.bf16.mxu0 %v10479_v12  ;;  %2745 = vst [vmem:[#allocation2 + $0x158] sm:$0x11] %v2744_v14  ;;  %v2796_v12 = vld [vmem:[#allocation2 + $0x178] sm:$0x11] }
 0x16f   :  { %4819 = vmatpush1.bf16.msra.mxu1 %v10468_v53  ;;  %v2735_v53 = vsel %vm11813_vm14, 0, %v2734_v57 }
 0x170   :  { %4820 = vmatprep.subr.bf16.mxu1 %v10476_v40  ;;  %2736 = vst [vmem:[#allocation2 + $0x120] sm:$0x11] %v2735_v53 }
 0x171   :  { %4597 = vmatpush1.bf16.msra.mxu0 %v10477_v50  ;;  %v2797_v50 = vsel %vm11825_vm1, 0, %v2796_v12 }
 0x172   :  { %4679 = vmatprep.subr.bf16.mxu0 %v10485_v16  ;;  %2798 = vst [vmem:[#allocation2 + $0x178] sm:$0x11] %v2797_v50  ;;  %v3254_v50 = vld [vmem:[#allocation2] sm:$0xff] }
 0x173   :  { %4821 = vmatpush1.bf16.msra.mxu1 %v10474_v26  ;;  %v2793_v26 = vld [vmem:[#allocation2 + $0x170] sm:$0x11] }
 0x174   :  { %4822 = vmatprep.subr.bf16.mxu1 %v10482_v51  ;;  %v2794_v40 = vsel %vm11825_vm1, 0, %v2793_v26 }
 0x175   :  { %2795 = vst [vmem:[#allocation2 + $0x170] sm:$0x11] %v2794_v40 }
 0x177   :  { %4823 = vmatpush1.bf16.msra.mxu1 %v10480_v9  ;;  %v2511_v9 = vlaneseq }
 0x178   :  { %4905 = vmatprep.subr.bf16.mxu1 %v10488_v5 }
 0x179   :  { %v11895_v51 = vshrl.u32 %v2511_v9, 7 }
 0x17b   :  { %12786 = vst [vmem:[#allocation37_spill] sm:$0xff] %v11895_v51  ;;  %v12715_v25 = vsub.s32 0, %v11895_v51  ;;  %v12714_v0 = vsub.s32 2, %v11895_v51  ;;  %v12713_v10 = vsub.s32 1, %v11895_v51  ;;  %v12712_v52 = vsub.s32 3, %v11895_v51 }
 0x17d   :  { %v11903_v37 = vrot.slane %v2509_v32, %v12715_v25  ;;  %v11907_v23 = vrot.slane %v2509_v32, %v12714_v0  ;;  %v11911_v35 = vrot.slane %v2509_v32, %v12713_v10  ;;  %v11915_v7 = vrot.slane %v2509_v32, %v12712_v52  ;;  %v3257_v32 = vld [vmem:[#allocation2 + $0x8] sm:$0xff] }
 0x201   :  { %v2253_v60 = vpop.f32.mrb[0].mxu0  ;;  %v2366_v62 = vpop.f32.mrb[0].mxu1 }
 0x202   :  { %v2531_v54 = vadd.f32 %v11903_v37, %v2253_v60  ;;  %v2533_v2 = vadd.f32 %v11907_v23, %v2366_v62  ;;  %v2255_v34 = vpop.f32.mrb[1].mxu0  ;;  %v2368_v24 = vpop.f32.mrb[1].mxu1 }
 0x203   :  { %v2532_v46 = vadd.f32 %v11911_v35, %v2255_v34  ;;  %v2534_v18 = vadd.f32 %v11915_v7, %v2368_v24  ;;  %v2257_v16 = vpop.f32.mrb[2].mxu0  ;;  %v2370_v5 = vpop.f32.mrb[2].mxu1 }
 0x204   :  { %v2595_v6 = vmax.f32 %v2531_v54, 0.0  ;;  %v2597_v1 = vmax.f32 %v2533_v2, 0.0  ;;  %v2535_v42 = vadd.f32 %v11903_v37, %v2257_v16  ;;  %v2537_v21 = vadd.f32 %v11907_v23, %v2370_v5  ;;  %v2259_v30 = vpop.f32.mrb[3].mxu0  ;;  %v2372_v38 = vpop.f32.mrb[3].mxu1 }
 0x205   :  { %v2596_v13 = vmax.f32 %v2532_v46, 0.0  ;;  %v2598_v29 = vmax.f32 %v2534_v18, 0.0  ;;  %v2536_v28 = vadd.f32 %v11911_v35, %v2259_v30  ;;  %v2538_v44 = vadd.f32 %v11915_v7, %v2372_v38 }
 0x206   :  { %v2599_v56 = vmax.f32 %v2535_v42, 0.0  ;;  %v2601_v22 = vmax.f32 %v2537_v21, 0.0 }
 0x207   :  { %v9496_v48 = vpack.c.bf16 %v2596_v13, %v2595_v6  ;;  %v9497_v36 = vpack.c.bf16 %v2598_v29, %v2597_v1  ;;  %v2600_v58 = vmax.f32 %v2536_v28, 0.0  ;;  %v2602_v39 = vmax.f32 %v2538_v44, 0.0 }
 0x208   :  { %v11925_v57 = vpack.c.bf16 %v2599_v56, %v2595_v6  ;;  %v11927_v53 = vpack.c.bf16 %v2601_v22, %v2597_v1 }
 0x209   :  { %v2930_v45 = vshrl.u32 %v9496_v48, 16  ;;  %v2933_v31 = vshll.u32 %v9496_v48, 16  ;;  %v2937_v33 = vshrl.u32 %v9497_v36, 16  ;;  %v2940_v19 = vshll.u32 %v9497_v36, 16  ;;  %v2263_v41 = vpop.f32.mrb[4].mxu0  ;;  %v2376_v17 = vpop.f32.mrb[4].mxu1 }
 0x20a   :  { %12787 = vst [vmem:[#allocation38_spill] sm:$0xff] %v11925_v57  ;;  %12788 = vst [vmem:[#allocation39_spill] sm:$0xff] %v11927_v53  ;;  %v11929_v61 = vpack.c.bf16 %v2600_v58, %v2596_v13  ;;  %v9498_v63 = vpack.c.bf16 %v2600_v58, %v2599_v56  ;;  %v11931_v20 = vpack.c.bf16 %v2602_v39, %v2598_v29  ;;  %v2265_v26 = vpop.f32.mrb[5].mxu0  ;;  %v2378_v40 = vpop.f32.mrb[5].mxu1  ;;  %v3265_v48 = vld [vmem:[#allocation2 + $0x28] sm:$0x11] }
 0x20b   :  { %v9499_v14 = vpack.c.bf16 %v2602_v39, %v2601_v22  ;;  %v2932_v12 = vrot.slane %v2930_v45, 7  ;;  %v2939_v9 = vrot.slane %v2937_v33, 7  ;;  %v11934_v60 = vadd.f32 %v11903_v37, %v2263_v41  ;;  %v2267_v54 = vpop.f32.mrb[6].mxu0  ;;  %v2380_v2 = vpop.f32.mrb[6].mxu1  ;;  %v3262_v22 = vld [vmem:[#allocation2 + $0x20] sm:$0x11] }
 0x20c   :  { %12789 = vst [vmem:[#allocation40_spill] sm:$0xff] %v11929_v61  ;;  %12790 = vst [vmem:[#allocation41_spill] sm:$0xff] %v11931_v20  ;;  %v11937_v62 = vadd.f32 %v11907_v23, %v2376_v17  ;;  %v2945_v34 = vshrl.u32 %v9498_v63, 16  ;;  %v2948_v24 = vshll.u32 %v9498_v63, 16  ;;  %v2269_v16 = vpop.f32.mrb[7].mxu0  ;;  %v2382_v5 = vpop.f32.mrb[7].mxu1  ;;  %v2540_v36 = vadd.f32 %v11911_v35, %v2265_v26 }
 0x20d   :  { %v2954_v46 = vshrl.u32 %v9499_v14, 16  ;;  %v2957_v18 = vshll.u32 %v9499_v14, 16  ;;  %v2935_v6 = vor.u32 %v2933_v31, %v2932_v12  ;;  %v2943_v1 = vrot.slane %v2932_v12, 4 }
 0x20e   :  { %v2942_v42 = vor.u32 %v2940_v19, %v2939_v9  ;;  %v2952_v21 = vrot.slane %v2939_v9, 4  ;;  %v2947_v30 = vrot.slane %v2945_v34, 7  ;;  %v2603_v13 = vmax.f32 %v11934_v60, 0.0 }
 0x20f   :  { %v2956_v38 = vrot.slane %v2954_v46, 7  ;;  %v2605_v29 = vmax.f32 %v11937_v62, 0.0  ;;  %v11943_v28 = vsel %vm11835_vm8, %v2935_v6, %v3254_v50  ;;  %v2542_v58 = vadd.f32 %v11915_v7, %v2378_v40 }
 0x210   :  { %v3258_v44 = vsel %vm11835_vm8, %v2942_v42, %v3257_v32  ;;  %3256 = vst [vmem:[#allocation2] sm:$0xff] %v11943_v28  ;;  %v2950_v39 = vor.u32 %v2948_v24, %v2947_v30  ;;  %v2961_v45 = vrot.slane %v2947_v30, 4  ;;  %v2604_v19 = vmax.f32 %v2540_v36, 0.0 }
 0x211   :  { %3259 = vst [vmem:[#allocation2 + $0x8] sm:$0xff] %v3258_v44  ;;  %v2959_v31 = vor.u32 %v2957_v18, %v2956_v38  ;;  %v2962_v33 = vrot.slane %v2956_v38, 4  ;;  %v2606_v41 = vmax.f32 %v2542_v58, 0.0  ;;  %v2543_v17 = vadd.f32 %v11903_v37, %v2267_v54  ;;  %v2273_v14 = vpop.f32.mrb[8].mxu0  ;;  %v2386_v12 = vpop.f32.mrb[8].mxu1 }
 0x212   :  { %v2545_v63 = vadd.f32 %v11907_v23, %v2380_v2  ;;  %v11960_v26 = vsel %vm11949_vm10, %v2943_v1, %v2950_v39  ;;  %v3263_v40 = vsel %vm11813_vm14, %v2961_v45, %v3262_v22  ;;  %v2275_v32 = vpop.f32.mrb[9].mxu0  ;;  %v2388_v60 = vpop.f32.mrb[9].mxu1  ;;  %v9500_v62 = vpack.c.bf16 %v2604_v19, %v2603_v13 }
 0x213   :  { %v2960_v50 = vsel %vm11949_vm10, %v2952_v21, %v2959_v31  ;;  %v3266_v9 = vsel %vm11813_vm14, %v2962_v33, %v3265_v48  ;;  %3260 = vst [vmem:[#allocation2 + $0x10] sm:$0xff] %v11960_v26  ;;  %3264 = vst [vmem:[#allocation2 + $0x20] sm:$0x11] %v3263_v40  ;;  %v9501_v54 = vpack.c.bf16 %v2606_v41, %v2605_v29  ;;  %v2607_v2 = vmax.f32 %v2543_v17, 0.0  ;;  %v2277_v24 = vpop.f32.mrb[10].mxu0  ;;  %v2390_v46 = vpop.f32.mrb[10].mxu1 }
 0x214   :  { %3261 = vst [vmem:[#allocation2 + $0x18] sm:$0xff] %v2960_v50  ;;  %3267 = vst [vmem:[#allocation2 + $0x28] sm:$0x11] %v3266_v9  ;;  %v2609_v34 = vmax.f32 %v2545_v63, 0.0  ;;  %v2544_v18 = vadd.f32 %v11911_v35, %v2269_v16  ;;  %v2546_v6 = vadd.f32 %v11915_v7, %v2382_v5  ;;  %v11972_v1 = vadd.f32 %v11903_v37, %v2273_v14  ;;  %v2279_v21 = vpop.f32.mrb[11].mxu0  ;;  %v2392_v30 = vpop.f32.mrb[11].mxu1 }
 0x215   :  { %v11975_v42 = vadd.f32 %v11907_v23, %v2386_v12  ;;  %v2964_v38 = vshrl.u32 %v9500_v62, 16  ;;  %v2967_v44 = vshll.u32 %v9500_v62, 16  ;;  %v2971_v22 = vshrl.u32 %v9501_v54, 16  ;;  %v3268_v17 = vld [vmem:[#allocation2 + $0x30] sm:$0xff]  ;;  %v3271_v63 = vld [vmem:[#allocation2 + $0x38] sm:$0xff] }
 0x216   :  { %v2974_v48 = vshll.u32 %v9501_v54, 16  ;;  %v11977_v36 = vpack.c.bf16 %v2607_v2, %v2603_v13  ;;  %v11979_v58 = vpack.c.bf16 %v2609_v34, %v2605_v29  ;;  %v2608_v39 = vmax.f32 %v2544_v18, 0.0 }
 0x217   :  { %v2610_v16 = vmax.f32 %v2546_v6, 0.0  ;;  %v2966_v45 = vrot.slane %v2964_v38, 7  ;;  %v2973_v5 = vrot.slane %v2971_v22, 7  ;;  %v2611_v31 = vmax.f32 %v11972_v1, 0.0 }
 0x218   :  { %12793 = vst [vmem:[#allocation42_spill] sm:$0xff] %v11977_v36  ;;  %12794 = vst [vmem:[#allocation43_spill] sm:$0xff] %v11979_v58  ;;  %v2613_v33 = vmax.f32 %v11975_v42, 0.0  ;;  %v11983_v14 = vpack.c.bf16 %v2608_v39, %v2604_v19  ;;  %v9502_v12 = vpack.c.bf16 %v2608_v39, %v2607_v2  ;;  %v2548_v2 = vadd.f32 %v11911_v35, %v2275_v32  ;;  %v3276_v32 = vld [vmem:[#allocation2 + $0x50] sm:$0x11] }
 0x219   :  { %v11985_v40 = vpack.c.bf16 %v2610_v16, %v2606_v41  ;;  %v9503_v50 = vpack.c.bf16 %v2610_v16, %v2609_v34  ;;  %v2969_v13 = vor.u32 %v2967_v44, %v2966_v45  ;;  %v2977_v9 = vrot.slane %v2966_v45, 4  ;;  %v2283_v54 = vpop.f32.mrb[12].mxu0  ;;  %v2396_v18 = vpop.f32.mrb[12].mxu1  ;;  %v3296_v36 = vld [vmem:[#allocation2 + $0x90] sm:$0xff] }
 0x21a   :  { %12795 = vst [vmem:[#allocation44_spill] sm:$0xff] %v11983_v14  ;;  %v2976_v29 = vor.u32 %v2974_v48, %v2973_v5  ;;  %v2986_v62 = vrot.slane %v2973_v5, 4  ;;  %v2979_v6 = vshrl.u32 %v9502_v12, 16  ;;  %v2982_v38 = vshll.u32 %v9502_v12, 16  ;;  %v11987_v52 = vpop.f32.mrb[13].mxu0  ;;  %v11989_v42 = vpop.f32.mrb[13].mxu1 }
 0x21b   :  { %12796 = vst [vmem:[#allocation45_spill] sm:$0xff] %v11985_v40  ;;  %v2988_v22 = vshrl.u32 %v9503_v50, 16  ;;  %v2991_v1 = vshll.u32 %v9503_v50, 16  ;;  %v11993_v19 = vsel %vm11835_vm8, %v2969_v13, %v3268_v17  ;;  %v2550_v34 = vadd.f32 %v11915_v7, %v2388_v60  ;;  %v11999_v44 = vpop.f32.mrb[14].mxu0  ;;  %v12001_v48 = vpop.f32.mrb[14].mxu1 }
 0x21c   :  { %v3272_v41 = vsel %vm11835_vm8, %v2976_v29, %v3271_v63  ;;  %3270 = vst [vmem:[#allocation2 + $0x30] sm:$0xff] %v11993_v19  ;;  %v2981_v39 = vrot.slane %v2979_v6, 7  ;;  %v2551_v45 = vadd.f32 %v11903_v37, %v2277_v24  ;;  %v2553_v5 = vadd.f32 %v11907_v23, %v2390_v46  ;;  %v12006_v17 = vpop.f32.mrb[15].mxu0  ;;  %v12008_v63 = vpop.f32.mrb[15].mxu1  ;;  %v3279_v12 = vld [vmem:[#allocation2 + $0x58] sm:$0x11] }
 0x21d   :  { %3273 = vst [vmem:[#allocation2 + $0x38] sm:$0xff] %v3272_v41  ;;  %v2990_v16 = vrot.slane %v2988_v22, 7  ;;  %v2612_v60 = vmax.f32 %v2548_v2, 0.0  ;;  %v2614_v50 = vmax.f32 %v2550_v34, 0.0  ;;  %v2552_v13 = vadd.f32 %v11911_v35, %v2279_v21 }
 0x21e   :  { %v2554_v29 = vadd.f32 %v11915_v7, %v2392_v30  ;;  %v2984_v10 = vor.u32 %v2982_v38, %v2981_v39  ;;  %v2995_v41 = vrot.slane %v2981_v39, 4  ;;  %v2615_v25 = vmax.f32 %v2551_v45, 0.0 }
 0x21f   :  { %v2993_v6 = vor.u32 %v2991_v1, %v2990_v16  ;;  %v2996_v22 = vrot.slane %v2990_v16, 4  ;;  %v9504_v0 = vpack.c.bf16 %v2612_v60, %v2611_v31  ;;  %v9505_v24 = vpack.c.bf16 %v2614_v50, %v2613_v33 }
 0x220   :  { %v2617_v46 = vmax.f32 %v2553_v5, 0.0  ;;  %v12014_v51 = vsel %vm11949_vm10, %v2977_v9, %v2984_v10  ;;  %v3277_v2 = vsel %vm11813_vm14, %v2995_v41, %v3276_v32  ;;  %v12027_v16 = vpack.c.bf16 %v2615_v25, %v2611_v31 }
 0x221   :  { %v2994_v21 = vsel %vm11949_vm10, %v2986_v62, %v2993_v6  ;;  %v3280_v30 = vsel %vm11813_vm14, %v2996_v22, %v3279_v12  ;;  %3274 = vst [vmem:[#allocation2 + $0x40] sm:$0xff] %v12014_v51  ;;  %3278 = vst [vmem:[#allocation2 + $0x50] sm:$0x11] %v3277_v2  ;;  %v2998_v38 = vshrl.u32 %v9504_v0, 16  ;;  %v3001_v1 = vshll.u32 %v9504_v0, 16  ;;  %v12023_v10 = vpop.f32.mrb[16].mxu0 }
 0x222   :  { %3275 = vst [vmem:[#allocation2 + $0x48] sm:$0xff] %v2994_v21  ;;  %3281 = vst [vmem:[#allocation2 + $0x58] sm:$0x11] %v3280_v30  ;;  %v3005_v34 = vshrl.u32 %v9505_v24, 16  ;;  %v3008_v39 = vshll.u32 %v9505_v24, 16  ;;  %v12025_v9 = vpop.f32.mrb[16].mxu1  ;;  %v12029_v45 = vpack.c.bf16 %v2617_v46, %v2613_v33  ;;  %v12036_v0 = vadd.f32 %v11903_v37, %v2283_v54 }
 0x223   :  { %12797 = vst [vmem:[#allocation46_spill] sm:$0xff] %v12027_v16  ;;  %v2616_v62 = vmax.f32 %v2552_v13, 0.0  ;;  %v2618_v5 = vmax.f32 %v2554_v29, 0.0  ;;  %v12031_v32 = vpop.f32.mrb[17].mxu0  ;;  %v12033_v12 = vpop.f32.mrb[17].mxu1  ;;  %v3000_v41 = vrot.slane %v2998_v38, 7  ;;  %v12039_v22 = vadd.f32 %v11907_v23, %v2396_v18 }
 0x224   :  { %12798 = vst [vmem:[#allocation47_spill] sm:$0xff] %v12029_v45  ;;  %v3007_v6 = vrot.slane %v3005_v34, 7  ;;  %v12041_v24 = vpop.f32.mrb[18].mxu0  ;;  %v12043_v31 = vpop.f32.mrb[18].mxu1  ;;  %v3282_v33 = vld [vmem:[#allocation2 + $0x60] sm:$0xff]  ;;  %v3285_v2 = vld [vmem:[#allocation2 + $0x68] sm:$0xff]  ;;  %v12131_v59 = vadd.f32 %v11907_v23, %v12025_v9  ;;  %v12146_v9 = vadd.f32 %v11911_v35, %v12031_v32 }
 0x225   :  { %v12045_v13 = vpack.c.bf16 %v2616_v62, %v2612_v60  ;;  %v9506_v29 = vpack.c.bf16 %v2616_v62, %v2615_v25  ;;  %v12047_v21 = vpack.c.bf16 %v2618_v5, %v2614_v50  ;;  %v9507_v30 = vpack.c.bf16 %v2618_v5, %v2617_v46  ;;  %v12049_v38 = vpop.f32.mrb[19].mxu0  ;;  %v12051_v34 = vpop.f32.mrb[19].mxu1 }
 0x226   :  { %v3003_v54 = vor.u32 %v3001_v1, %v3000_v41  ;;  %v3011_v11 = vrot.slane %v3000_v41, 4  ;;  %v3010_v18 = vor.u32 %v3008_v39, %v3007_v6  ;;  %v3020_v45 = vrot.slane %v3007_v6, 4  ;;  %v3290_v41 = vld [vmem:[#allocation2 + $0x80] sm:$0x11]  ;;  %v3293_v6 = vld [vmem:[#allocation2 + $0x88] sm:$0x11] }
 0x227   :  { %12799 = vst [vmem:[#allocation48_spill] sm:$0xff] %v12045_v13  ;;  %12800 = vst [vmem:[#allocation49_spill] sm:$0xff] %v12047_v21  ;;  %v3013_v58 = vshrl.u32 %v9506_v29, 16  ;;  %v3016_v40 = vshll.u32 %v9506_v29, 16  ;;  %v3022_v53 = vshrl.u32 %v9507_v30, 16  ;;  %v3025_v20 = vshll.u32 %v9507_v30, 16 }
 0x228   :  { %v12055_v60 = vsel %vm11835_vm8, %v3003_v54, %v3282_v33  ;;  %v3286_v25 = vsel %vm11835_vm8, %v3010_v18, %v3285_v2  ;;  %v2619_v50 = vmax.f32 %v12036_v0, 0.0  ;;  %v2621_v46 = vmax.f32 %v12039_v22, 0.0  ;;  %v10483_v13 = vld [vmem:[#allocation8 + $0x200] ss:$16 sps:$4 sm:$0xff]  }
 0x229   :  { %3284 = vst [vmem:[#allocation2 + $0x60] sm:$0xff] %v12055_v60  ;;  %3287 = vst [vmem:[#allocation2 + $0x68] sm:$0xff] %v3286_v25  ;;  %v3015_v1 = vrot.slane %v3013_v58, 7  ;;  %v3024_v39 = vrot.slane %v3022_v53, 7  ;;  %v2556_v62 = vadd.f32 %v11911_v35, %v11987_v52  ;;  %v2558_v5 = vadd.f32 %v11915_v7, %v11989_v42  ;;  %v12074_v58 = vpop.f32.mrb[20].mxu0  ;;  %v12076_v52 = vpop.f32.mrb[20].mxu1 }
 0x22a   :  { %v2559_v33 = vadd.f32 %v11903_v37, %v11999_v44  ;;  %v2561_v0 = vadd.f32 %v11907_v23, %v12001_v48  ;;  %v2560_v22 = vadd.f32 %v11911_v35, %v12006_v17  ;;  %v2562_v53 = vadd.f32 %v11915_v7, %v12008_v63  ;;  %v12078_v54 = vpop.f32.mrb[21].mxu0  ;;  %v12080_v44 = vpop.f32.mrb[21].mxu1 }
 0x22b   :  { %v3018_v2 = vor.u32 %v3016_v40, %v3015_v1  ;;  %v3029_v42 = vrot.slane %v3015_v1, 4  ;;  %v3027_v29 = vor.u32 %v3025_v20, %v3024_v39  ;;  %v3030_v30 = vrot.slane %v3024_v39, 4  ;;  %v12082_v17 = vpop.f32.mrb[22].mxu0  ;;  %v12084_v16 = vpop.f32.mrb[22].mxu1 }
 0x22c   :  { %v2620_v18 = vmax.f32 %v2556_v62, 0.0  ;;  %v2622_v48 = vmax.f32 %v2558_v5, 0.0  ;;  %v2623_v25 = vmax.f32 %v2559_v33, 0.0  ;;  %v2625_v21 = vmax.f32 %v2561_v0, 0.0  ;;  %v12096_v39 = vpop.f32.mrb[23].mxu0  ;;  %v12098_v62 = vpop.f32.mrb[23].mxu1 }
 0x22d   :  { %v12088_v63 = vsel %vm11949_vm10, %v3011_v11, %v3018_v2  ;;  %v3291_v20 = vsel %vm11813_vm14, %v3029_v42, %v3290_v41  ;;  %v3028_v40 = vsel %vm11949_vm10, %v3020_v45, %v3027_v29  ;;  %v3294_v1 = vsel %vm11813_vm14, %v3030_v30, %v3293_v6 }
 0x22e   :  { %3288 = vst [vmem:[#allocation2 + $0x70] sm:$0xff] %v12088_v63  ;;  %3292 = vst [vmem:[#allocation2 + $0x80] sm:$0x11] %v3291_v20  ;;  %v9508_v11 = vpack.c.bf16 %v2620_v18, %v2619_v50  ;;  %v9509_v5 = vpack.c.bf16 %v2622_v48, %v2621_v46  ;;  %v12101_v33 = vpack.c.bf16 %v2623_v25, %v2619_v50  ;;  %v2624_v0 = vmax.f32 %v2560_v22, 0.0 }
 0x22f   :  { %3289 = vst [vmem:[#allocation2 + $0x78] sm:$0xff] %v3028_v40  ;;  %3295 = vst [vmem:[#allocation2 + $0x88] sm:$0x11] %v3294_v1  ;;  %v12103_v41 = vpack.c.bf16 %v2625_v21, %v2621_v46  ;;  %v2626_v45 = vmax.f32 %v2562_v53, 0.0  ;;  %v8952_v6 = vcombine.low %v11943_v28, %v11960_v26  ;;  %v10491_v46 = vld [vmem:[#allocation8 + $0x224] ss:$16 sps:$4 sm:$0xff]   ;;  %v8953_v53 = vcombine.high %v11943_v28, %v11960_v26 }
 0x230   :  { %12801 = vst [vmem:[#allocation50_spill] sm:$0xff] %v12101_v33  ;;  %v3032_v2 = vshrl.u32 %v9508_v11, 16  ;;  %v3035_v42 = vshll.u32 %v9508_v11, 16  ;;  %v3039_v29 = vshrl.u32 %v9509_v5, 16  ;;  %v3042_v30 = vshll.u32 %v9509_v5, 16 }
 0x231   :  { %12802 = vst [vmem:[#allocation51_spill] sm:$0xff] %v12103_v41  ;;  %v12107_v20 = vpack.c.bf16 %v2624_v0, %v2620_v18  ;;  %v9510_v40 = vpack.c.bf16 %v2624_v0, %v2623_v25  ;;  %v12109_v1 = vpack.c.bf16 %v2626_v45, %v2622_v48  ;;  %v9511_v50 = vpack.c.bf16 %v2626_v45, %v2625_v21  ;;  %v10486_v33 = vld [vmem:[#allocation8 + $0x208] ss:$16 sps:$4 sm:$0xff]   ;;  %v10494_v5 = vld [vmem:[#allocation8 + $0x22c] ss:$16 sps:$4 sm:$0xff]   ;;  %v12117_v14 = vpop.f32.mrb[24].mxu0 }
 0x232   :  { %v3034_v41 = vrot.slane %v3032_v2, 7  ;;  %v3041_v22 = vrot.slane %v3039_v29, 7  ;;  %v12115_v11 = vadd.f32 %v11903_v37, %v12023_v10  ;;  %v12119_v18 = vpop.f32.mrb[24].mxu1  ;;  %v3299_v25 = vld [vmem:[#allocation2 + $0x98] sm:$0xff]  ;;  %v12121_v45 = vpop.f32.mrb[25].mxu0  ;;  %4598 = vmatprep.mubr.bf16.mxu0 %v8953_v53  ;;  %4824 = vmatprep.mubr.bf16.mxu1 %v8953_v53  ;;  %v2567_v32 = vadd.f32 %v11903_v37, %v12041_v24 }
 0x233   :  { %12803 = vst [vmem:[#allocation52_spill] sm:$0xff] %v12107_v20  ;;  %12804 = vst [vmem:[#allocation53_spill] sm:$0xff] %v12109_v1  ;;  %v3047_v48 = vshrl.u32 %v9510_v40, 16  ;;  %v3050_v0 = vshll.u32 %v9510_v40, 16  ;;  %v3056_v21 = vshrl.u32 %v9511_v50, 16  ;;  %v12123_v2 = vpop.f32.mrb[25].mxu1  ;;  %4599 = vmatmul.mubr.bf16.vlgmr.msra.gmra.mrb[32].mxu0 %v8952_v6  ;;  %4825 = vmatmul.mubr.bf16.vlgmr.msra.gmra.mrb[32].mxu1 %v8952_v6 }
 0x234   :  { %v3037_v29 = vor.u32 %v3035_v42, %v3034_v41  ;;  %v3045_v1 = vrot.slane %v3034_v41, 4  ;;  %v3044_v28 = vor.u32 %v3042_v30, %v3041_v22  ;;  %v3304_v26 = vld [vmem:[#allocation2 + $0xb0] sm:$0x11]  ;;  %v3059_v20 = vshll.u32 %v9511_v50, 16  ;;  %v3307_v10 = vld [vmem:[#allocation2 + $0xb8] sm:$0x11]  ;;  %4680 = vmatpush1.bf16.msra.mxu0 %v10483_v13  ;;  %4906 = vmatpush1.bf16.msra.mxu1 %v10486_v33 }
 0x235   :  { %v12125_v57 = vpop.f32.mrb[26].mxu0  ;;  %v12127_v61 = vpop.f32.mrb[26].mxu1  ;;  %v3054_v15 = vrot.slane %v3041_v22, 4  ;;  %v3049_v55 = vrot.slane %v3047_v48, 7  ;;  %v3058_v40 = vrot.slane %v3056_v21, 7  ;;  %v2627_v22 = vmax.f32 %v12115_v11, 0.0  ;;  %4681 = vmatprep.subr.bf16.mxu0 %v10491_v46  ;;  %4907 = vmatprep.subr.bf16.mxu1 %v10494_v5 }
 0x236   :  { %v12133_v41 = vpop.f32.mrb[27].mxu0  ;;  %v12135_v42 = vpop.f32.mrb[27].mxu1  ;;  %v12139_v30 = vsel %vm11835_vm8, %v3037_v29, %v3296_v36  ;;  %v3300_v50 = vsel %vm11835_vm8, %v3044_v28, %v3299_v25  ;;  %v10489_v6 = vld [vmem:[#allocation8 + $0x220] ss:$16 sps:$4 sm:$0xff]   ;;  %v10492_v53 = vld [vmem:[#allocation8 + $0x228] ss:$16 sps:$4 sm:$0xff]   ;;  %v2566_v11 = vadd.f32 %v11915_v7, %v12033_v12  ;;  %v2569_v46 = vadd.f32 %v11907_v23, %v12043_v31 }
 0x237   :  { %3298 = vst [vmem:[#allocation2 + $0x90] sm:$0xff] %v12139_v30  ;;  %3301 = vst [vmem:[#allocation2 + $0x98] sm:$0xff] %v3300_v50  ;;  %v3052_v48 = vor.u32 %v3050_v0, %v3049_v55  ;;  %v3063_v21 = vrot.slane %v3049_v55, 4  ;;  %v3061_v36 = vor.u32 %v3059_v20, %v3058_v40  ;;  %v3064_v29 = vrot.slane %v3058_v40, 4  ;;  %v10497_v25 = vld [vmem:[#allocation8 + $0x244] ss:$16 sps:$4 sm:$0xff]  }
 0x238   :  { %v2629_v13 = vmax.f32 %v12131_v59, 0.0  ;;  %v2628_v33 = vmax.f32 %v12146_v9, 0.0  ;;  %v10500_v28 = vld [vmem:[#allocation8 + $0x24c] ss:$16 sps:$4 sm:$0xff]   ;;  %v2630_v24 = vmax.f32 %v2566_v11, 0.0  ;;  %4682 = vmatpush1.bf16.msra.mxu0 %v10489_v6  ;;  %4908 = vmatpush1.bf16.msra.mxu1 %v10492_v53  ;;  %v2570_v40 = vadd.f32 %v11915_v7, %v12051_v34 }
 0x239   :  { %v12157_v0 = vsel %vm11949_vm10, %v3045_v1, %v3052_v48  ;;  %v3305_v55 = vsel %vm11813_vm14, %v3063_v21, %v3304_v26  ;;  %v3062_v20 = vsel %vm11949_vm10, %v3054_v15, %v3061_v36  ;;  %v3308_v59 = vsel %vm11813_vm14, %v3064_v29, %v3307_v10  ;;  %v10495_v5 = vld [vmem:[#allocation8 + $0x240] ss:$16 sps:$4 sm:$0xff]   ;;  %v12168_v26 = vpop.f32.mrb[28].mxu0  ;;  %v12170_v15 = vpop.f32.mrb[28].mxu1  ;;  %4683 = vmatprep.subr.bf16.mxu0 %v10497_v25  ;;  %v10498_v53 = vld [vmem:[#allocation8 + $0x248] ss:$16 sps:$4 sm:$0xff]  }
 0x23a   :  { %3302 = vst [vmem:[#allocation2 + $0xa0] sm:$0xff] %v12157_v0  ;;  %3306 = vst [vmem:[#allocation2 + $0xb0] sm:$0x11] %v3305_v55  ;;  %v9512_v12 = vpack.c.bf16 %v2628_v33, %v2627_v22  ;;  %v2631_v1 = vmax.f32 %v2567_v32, 0.0  ;;  %v2568_v10 = vadd.f32 %v11911_v35, %v12049_v38  ;;  %v8957_v50 = vcombine.high %v11993_v19, %v12014_v51  ;;  %v10503_v31 = vld [vmem:[#allocation8 + $0x264] ss:$16 sps:$4 sm:$0xff]  }
 0x23b   :  { %3303 = vst [vmem:[#allocation2 + $0xa8] sm:$0xff] %v3062_v20  ;;  %3309 = vst [vmem:[#allocation2 + $0xb8] sm:$0x11] %v3308_v59  ;;  %v8956_v6 = vcombine.low %v11993_v19, %v12014_v51  ;;  %v12180_v9 = vpop.f32.mrb[29].mxu0  ;;  %v12182_v48 = vpop.f32.mrb[29].mxu1  ;;  %v9513_v29 = vpack.c.bf16 %v2630_v24, %v2629_v13  ;;  %4909 = vmatprep.subr.bf16.mxu1 %v10500_v28  ;;  %v2633_v55 = vmax.f32 %v2569_v46, 0.0 }
 0x23c   :  { %v3066_v21 = vshrl.u32 %v9512_v12, 16  ;;  %v3069_v36 = vshll.u32 %v9512_v12, 16  ;;  %v12184_v38 = vpack.c.bf16 %v2631_v1, %v2627_v22  ;;  %v10506_v34 = vld [vmem:[#allocation8 + $0x26c] ss:$16 sps:$4 sm:$0xff]   ;;  %v12186_v11 = vpop.f32.mrb[30].mxu0  ;;  %v12188_v32 = vpop.f32.mrb[30].mxu1  ;;  %4608 = vmatprep.mubr.bf16.mxu0 %v8957_v50  ;;  %4834 = vmatprep.mubr.bf16.mxu1 %v8957_v50  ;;  %v12192_v25 = vadd.f32 %v11903_v37, %v12074_v58 }
 0x23d   :  { %v2632_v51 = vmax.f32 %v2568_v10, 0.0  ;;  %v2634_v19 = vmax.f32 %v2570_v40, 0.0  ;;  %v12194_v20 = vpop.f32.mrb[31].mxu0  ;;  %v12196_v59 = vpop.f32.mrb[31].mxu1  ;;  %v3073_v28 = vshrl.u32 %v9513_v29, 16  ;;  %v3076_v12 = vshll.u32 %v9513_v29, 16  ;;  %4609 = vmatmul.mubr.bf16.gmra.mrb[36].mxu0 %v8956_v6  ;;  %4835 = vmatmul.mubr.bf16.gmra.mrb[36].mxu1 %v8956_v6 }
 0x23e   :  { %12805 = vst [vmem:[#allocation54_spill] sm:$0xff] %v12184_v38  ;;  %12806 = vst [vmem:[#allocation55_spill] sm:$0xff] %v12196_v59  ;;  %v3068_v22 = vrot.slane %v3066_v21, 7  ;;  %v12200_v46 = vadd.f32 %v11907_v23, %v12076_v52  ;;  %v3310_v10 = vld [vmem:[#allocation2 + $0xc0] sm:$0xff]  ;;  %v12202_v40 = vpack.c.bf16 %v2633_v55, %v2629_v13  ;;  %4684 = vmatpush1.bf16.msra.mxu0 %v10495_v5  ;;  %4910 = vmatpush1.bf16.msra.mxu1 %v10498_v53 }
 0x23f   :  { %v12204_v50 = vpack.c.bf16 %v2632_v51, %v2628_v33  ;;  %v9514_v58 = vpack.c.bf16 %v2632_v51, %v2631_v1  ;;  %v12206_v38 = vpack.c.bf16 %v2634_v19, %v2630_v24  ;;  %v3075_v29 = vrot.slane %v3073_v28, 7  ;;  %4685 = vmatprep.subr.bf16.mxu0 %v10503_v31  ;;  %v10509_v52 = vld [vmem:[#allocation8 + $0x284] ss:$16 sps:$4 sm:$0xff]   ;;  %4911 = vmatprep.subr.bf16.mxu1 %v10506_v34  ;;  %v10512_v24 = vld [vmem:[#allocation8 + $0x28c] ss:$16 sps:$4 sm:$0xff]  }
 0x240   :  { %v3071_v21 = vor.u32 %v3069_v36, %v3068_v22  ;;  %v3079_v3 = vrot.slane %v3068_v22, 4  ;;  %v9515_v6 = vpack.c.bf16 %v2634_v19, %v2633_v55  ;;  %v2635_v13 = vmax.f32 %v12192_v25, 0.0  ;;  %v10507_v22 = vld [vmem:[#allocation8 + $0x280] ss:$16 sps:$4 sm:$0xff]   ;;  %v10510_v25 = vld [vmem:[#allocation8 + $0x288] ss:$16 sps:$4 sm:$0xff]  }
 0x241   :  { %v3081_v27 = vshrl.u32 %v9514_v58, 16  ;;  %v3084_v59 = vshll.u32 %v9514_v58, 16  ;;  %v2637_v33 = vmax.f32 %v12200_v46, 0.0  ;;  %v3078_v5 = vor.u32 %v3076_v12, %v3075_v29  ;;  %v3318_v31 = vld [vmem:[#allocation2 + $0xe0] sm:$0x11] }
 0x242   :  { %v12212_v1 = vsel %vm11835_vm8, %v3071_v21, %v3310_v10  ;;  %v3088_v36 = vrot.slane %v3075_v29, 4  ;;  %v3090_v51 = vshrl.u32 %v9515_v6, 16  ;;  %v3093_v55 = vshll.u32 %v9515_v6, 16  ;;  %4686 = vmatpush1.bf16.msra.mxu0 %v10501_v8  ;;  %v3321_v46 = vld [vmem:[#allocation2 + $0xe8] sm:$0x11]  ;;  %4912 = vmatpush1.bf16.msra.mxu1 %v10504_v43 }
 0x243   :  { %3312 = vst [vmem:[#allocation2 + $0xc0] sm:$0xff] %v12212_v1  ;;  %v3083_v53 = vrot.slane %v3081_v27, 7  ;;  %v12217_v19 = vadd.f32 %v11911_v35, %v12078_v54  ;;  %v12221_v34 = vadd.f32 %v11915_v7, %v12080_v44  ;;  %v3314_v28 = vsel %vm11835_vm8, %v3078_v5, %v3313_v4  ;;  %4687 = vmatprep.subr.bf16.mxu0 %v10509_v52  ;;  %v10515_v10 = vld [vmem:[#allocation8 + $0x2a4] ss:$16 sps:$4 sm:$0xff]   ;;  %v10518_v21 = vld [vmem:[#allocation8 + $0x2ac] ss:$16 sps:$4 sm:$0xff]  }
 0x244   :  { %v3092_v12 = vrot.slane %v3090_v51, 7  ;;  %v12227_v27 = vadd.f32 %v11903_v37, %v12082_v17  ;;  %v12231_v54 = vadd.f32 %v11907_v23, %v12084_v16  ;;  %3315 = vst [vmem:[#allocation2 + $0xc8] sm:$0xff] %v3314_v28  ;;  %4913 = vmatprep.subr.bf16.mxu1 %v10512_v24  ;;  %v10513_v51 = vld [vmem:[#allocation8 + $0x2a0] ss:$16 sps:$4 sm:$0xff]   ;;  %v2576_v28 = vadd.f32 %v11911_v35, %v12096_v39  ;;  %v10521_v39 = vld [vmem:[#allocation8 + $0x2c4] ss:$16 sps:$4 sm:$0xff]  }
 0x245   :  { %v3086_v44 = vor.u32 %v3084_v59, %v3083_v53  ;;  %v3097_v8 = vrot.slane %v3083_v53, 4  ;;  %v2636_v58 = vmax.f32 %v12217_v19, 0.0  ;;  %v2638_v4 = vmax.f32 %v12221_v34, 0.0 }
 0x246   :  { %v3095_v43 = vor.u32 %v3093_v55, %v3092_v12  ;;  %v3098_v29 = vrot.slane %v3092_v12, 4  ;;  %v2639_v17 = vmax.f32 %v12227_v27, 0.0  ;;  %v2641_v6 = vmax.f32 %v12231_v54, 0.0  ;;  %4688 = vmatpush1.bf16.msra.mxu0 %v10507_v22  ;;  %4914 = vmatpush1.bf16.msra.mxu1 %v10510_v25  ;;  %v10524_v54 = vld [vmem:[#allocation8 + $0x2cc] ss:$16 sps:$4 sm:$0xff]  }
 0x247   :  { %v12239_v16 = vsel %vm11949_vm10, %v3079_v3, %v3086_v44  ;;  %v3319_v59 = vsel %vm11813_vm14, %v3097_v8, %v3318_v31  ;;  %v9516_v52 = vpack.c.bf16 %v2636_v58, %v2635_v13  ;;  %v9517_v5 = vpack.c.bf16 %v2638_v4, %v2637_v33  ;;  %4689 = vmatprep.subr.bf16.mxu0 %v10515_v10  ;;  %v3324_v10 = vld [vmem:[#allocation2 + $0xf0] sm:$0xff] }
 0x248   :  { %3316 = vst [vmem:[#allocation2 + $0xd0] sm:$0xff] %v12239_v16  ;;  %3320 = vst [vmem:[#allocation2 + $0xe0] sm:$0x11] %v3319_v59  ;;  %v3096_v24 = vsel %vm11949_vm10, %v3088_v36, %v3095_v43  ;;  %v3322_v53 = vsel %vm11813_vm14, %v3098_v29, %v3321_v46  ;;  %v12248_v55 = vpack.c.bf16 %v2639_v17, %v2635_v13  ;;  %4915 = vmatprep.subr.bf16.mxu1 %v10518_v21 }
 0x249   :  { %v12250_v3 = vpack.c.bf16 %v2641_v6, %v2637_v33  ;;  %3317 = vst [vmem:[#allocation2 + $0xd8] sm:$0xff] %v3096_v24  ;;  %3323 = vst [vmem:[#allocation2 + $0xe8] sm:$0x11] %v3322_v53  ;;  %v3100_v31 = vshrl.u32 %v9516_v52, 16  ;;  %v3103_v19 = vshll.u32 %v9516_v52, 16  ;;  %v3107_v22 = vshrl.u32 %v9517_v5, 16 }
 0x24a   :  { %v3110_v34 = vshll.u32 %v9517_v5, 16  ;;  %v2578_v36 = vadd.f32 %v11915_v7, %v12098_v62  ;;  %v8961_v13 = vcombine.high %v12055_v60, %v12088_v63  ;;  %v10516_v33 = vld [vmem:[#allocation8 + $0x2a8] ss:$16 sps:$4 sm:$0xff]   ;;  %v8960_v46 = vcombine.low %v12055_v60, %v12088_v63  ;;  %4690 = vmatpush1.bf16.msra.mxu0 %v10513_v51  ;;  %v10519_v63 = vld [vmem:[#allocation8 + $0x2c0] ss:$16 sps:$4 sm:$0xff]  }
 0x24b   :  { %v12258_v12 = vrot.slane %v3100_v31, 7  ;;  %v12260_v25 = vrot.slane %v3107_v22, 7  ;;  %v12266_v27 = vadd.f32 %v11903_v37, %v12117_v14  ;;  %v3327_v62 = vld [vmem:[#allocation2 + $0xf8] sm:$0xff]  ;;  %v2640_v44 = vmax.f32 %v2576_v28, 0.0  ;;  %v10527_v52 = vld [vmem:[#allocation8 + $0x2e4] ss:$16 sps:$4 sm:$0xff]   ;;  %4916 = vmatpush1.bf16.msra.mxu1 %v10516_v33  ;;  %4691 = vmatprep.subr.bf16.mxu0 %v10521_v39 }
 0x24c   :  { %v2642_v8 = vmax.f32 %v2578_v36, 0.0  ;;  %4618 = vmatprep.mubr.bf16.mxu0 %v8961_v13  ;;  %4844 = vmatprep.mubr.bf16.mxu1 %v8961_v13  ;;  %v12270_v21 = vadd.f32 %v11907_v23, %v12119_v18  ;;  %v12274_v60 = vadd.f32 %v11911_v35, %v12121_v45  ;;  %v10522_v45 = vld [vmem:[#allocation8 + $0x2c8] ss:$16 sps:$4 sm:$0xff]   ;;  %v10525_v28 = vld [vmem:[#allocation8 + $0x2e0] ss:$16 sps:$4 sm:$0xff]   ;;  %v2582_v33 = vadd.f32 %v11915_v7, %v12123_v2 }
 0x24d   :  { %v3105_v14 = vor.u32 %v3103_v19, %v12258_v12  ;;  %v3113_v43 = vrot.slane %v12258_v12, 4  ;;  %v3112_v29 = vor.u32 %v3110_v34, %v12260_v25  ;;  %v3122_v59 = vrot.slane %v12260_v25, 4  ;;  %4619 = vmatmul.mubr.bf16.gmra.mrb[40].mxu0 %v8960_v46  ;;  %4845 = vmatmul.mubr.bf16.gmra.mrb[40].mxu1 %v8960_v46  ;;  %v3332_v36 = vld [vmem:[#allocation2 + $0x110] sm:$0x11] }
 0x24e   :  { %v12280_v5 = vpack.c.bf16 %v2640_v44, %v2636_v58  ;;  %v9518_v18 = vpack.c.bf16 %v2640_v44, %v2639_v17  ;;  %v12282_v51 = vpack.c.bf16 %v2642_v8, %v2638_v4  ;;  %v9519_v24 = vpack.c.bf16 %v2642_v8, %v2641_v6  ;;  %4917 = vmatprep.subr.bf16.mxu1 %v10524_v54  ;;  %v10530_v58 = vld [vmem:[#allocation8 + $0x2ec] ss:$16 sps:$4 sm:$0xff]   ;;  %v10533_v46 = vld [vmem:[#allocation8 + $0x304] ss:$16 sps:$4 sm:$0xff]   ;;  %v10528_v44 = vld [vmem:[#allocation8 + $0x2e8] ss:$16 sps:$4 sm:$0xff]  }
 0x24f   :  { %v12286_v53 = vsel %vm11835_vm8, %v3105_v14, %v3324_v10  ;;  %v3328_v31 = vsel %vm11835_vm8, %v3112_v29, %v3327_v62  ;;  %v2643_v19 = vmax.f32 %v12266_v27, 0.0  ;;  %v2645_v22 = vmax.f32 %v12270_v21, 0.0  ;;  %4692 = vmatpush1.bf16.msra.mxu0 %v10519_v63  ;;  %v3335_v54 = vld [vmem:[#allocation2 + $0x118] sm:$0x11]  ;;  %4918 = vmatpush1.bf16.msra.mxu1 %v10522_v45 }
 0x250   :  { %3326 = vst [vmem:[#allocation2 + $0xf0] sm:$0xff] %v12286_v53  ;;  %3329 = vst [vmem:[#allocation2 + $0xf8] sm:$0xff] %v3328_v31  ;;  %v3115_v4 = vshrl.u32 %v9518_v18, 16  ;;  %v3118_v17 = vshll.u32 %v9518_v18, 16  ;;  %v3124_v6 = vshrl.u32 %v9519_v24, 16  ;;  %v3127_v34 = vshll.u32 %v9519_v24, 16  ;;  %4693 = vmatprep.subr.bf16.mxu0 %v10527_v52  ;;  %4919 = vmatprep.subr.bf16.mxu1 %v10530_v58 }
 0x251   :  { %v2644_v13 = vmax.f32 %v12274_v60, 0.0  ;;  %v2583_v12 = vadd.f32 %v11903_v37, %v12125_v57  ;;  %v2585_v25 = vadd.f32 %v11907_v23, %v12127_v61  ;;  %v2584_v10 = vadd.f32 %v11911_v35, %v12133_v41  ;;  %v10536_v60 = vld [vmem:[#allocation8 + $0x30c] ss:$16 sps:$4 sm:$0xff]   ;;  %v10531_v52 = vld [vmem:[#allocation8 + $0x300] ss:$16 sps:$4 sm:$0xff]  }
 0x252   :  { %v3117_v27 = vrot.slane %v3115_v4, 7  ;;  %v3126_v39 = vrot.slane %v3124_v6, 7  ;;  %v2586_v62 = vadd.f32 %v11915_v7, %v12135_v42  ;;  %v2646_v8 = vmax.f32 %v2582_v33, 0.0  ;;  %v10539_v42 = vld [vmem:[#allocation8 + $0x324] ss:$16 sps:$4 sm:$0xff]  }
 0x253   :  { %v9520_v2 = vpack.c.bf16 %v2644_v13, %v2643_v19  ;;  %v2647_v21 = vmax.f32 %v2583_v12, 0.0  ;;  %v2649_v57 = vmax.f32 %v2585_v25, 0.0  ;;  %4694 = vmatpush1.bf16.msra.mxu0 %v10525_v28  ;;  %4920 = vmatpush1.bf16.msra.mxu1 %v10528_v44  ;;  %v8965_v33 = vcombine.high %v12139_v30, %v12157_v0  ;;  %v10537_v12 = vld [vmem:[#allocation8 + $0x320] ss:$16 sps:$4 sm:$0xff]   ;;  %v3341_v44 = vld [vmem:[#allocation2 + $0x128] sm:$0xff] }
 0x254   :  { %v3120_v61 = vor.u32 %v3118_v17, %v3117_v27  ;;  %v3131_v63 = vrot.slane %v3117_v27, 4  ;;  %v3129_v14 = vor.u32 %v3127_v34, %v3126_v39  ;;  %v3132_v29 = vrot.slane %v3126_v39, 4  ;;  %4695 = vmatprep.subr.bf16.mxu0 %v10533_v46  ;;  %4921 = vmatprep.subr.bf16.mxu1 %v10536_v60  ;;  %v3338_v34 = vld [vmem:[#allocation2 + $0x120] sm:$0xff]  ;;  %v10534_v39 = vld [vmem:[#allocation8 + $0x308] ss:$16 sps:$4 sm:$0xff]  }
 0x255   :  { %v3134_v18 = vshrl.u32 %v9520_v2, 16  ;;  %v9521_v24 = vpack.c.bf16 %v2646_v8, %v2645_v22  ;;  %v12304_v41 = vpack.c.bf16 %v2647_v21, %v2643_v19  ;;  %v3137_v17 = vshll.u32 %v9520_v2, 16  ;;  %4628 = vmatprep.mubr.bf16.mxu0 %v8965_v33  ;;  %4854 = vmatprep.mubr.bf16.mxu1 %v8965_v33 }
 0x256   :  { %v12308_v45 = vsel %vm11949_vm10, %v3113_v43, %v3120_v61  ;;  %v3333_v31 = vsel %vm11813_vm14, %v3131_v63, %v3332_v36  ;;  %v3130_v58 = vsel %vm11949_vm10, %v3122_v59, %v3129_v14  ;;  %v3336_v4 = vsel %vm11813_vm14, %v3132_v29, %v3335_v54  ;;  %v10545_v54 = vld [vmem:[#allocation8 + $0x344] ss:$16 sps:$4 sm:$0xff]   ;;  %v10542_v61 = vld [vmem:[#allocation8 + $0x32c] ss:$16 sps:$4 sm:$0xff]   ;;  %v10543_v29 = vld [vmem:[#allocation8 + $0x340] ss:$16 sps:$4 sm:$0xff]  }
 0x257   :  { %3330 = vst [vmem:[#allocation2 + $0x100] sm:$0xff] %v12308_v45  ;;  %3334 = vst [vmem:[#allocation2 + $0x110] sm:$0x11] %v3333_v31  ;;  %v12317_v19 = vrot.slane %v3134_v18, 7  ;;  %v3141_v43 = vshrl.u32 %v9521_v24, 16  ;;  %v12319_v6 = vpack.c.bf16 %v2649_v57, %v2645_v22  ;;  %v3144_v28 = vshll.u32 %v9521_v24, 16  ;;  %4696 = vmatpush1.bf16.msra.mxu0 %v10531_v52  ;;  %4922 = vmatpush1.bf16.msra.mxu1 %v10534_v39 }
 0x258   :  { %3331 = vst [vmem:[#allocation2 + $0x108] sm:$0xff] %v3130_v58  ;;  %3337 = vst [vmem:[#allocation2 + $0x118] sm:$0x11] %v3336_v4  ;;  %v2648_v36 = vmax.f32 %v2584_v10, 0.0  ;;  %v2650_v59 = vmax.f32 %v2586_v62, 0.0  ;;  %v8964_v22 = vcombine.low %v12139_v30, %v12157_v0  ;;  %4697 = vmatprep.subr.bf16.mxu0 %v10539_v42  ;;  %v2587_v0 = vadd.f32 %v11903_v37, %v12168_v26 }
 0x259   :  { %v3139_v25 = vor.u32 %v3137_v17, %v12317_v19  ;;  %v3147_v46 = vrot.slane %v12317_v19, 4  ;;  %v12325_v27 = vrot.slane %v3141_v43, 7  ;;  %v2589_v24 = vadd.f32 %v11907_v23, %v12170_v15  ;;  %v10540_v42 = vld [vmem:[#allocation8 + $0x328] ss:$16 sps:$4 sm:$0xff]   ;;  %v10551_v31 = vld [vmem:[#allocation8 + $0x364] ss:$16 sps:$4 sm:$0xff]   ;;  %4923 = vmatprep.subr.bf16.mxu1 %v10542_v61 }
 0x25a   :  { %v12329_v10 = vpack.c.bf16 %v2648_v36, %v2644_v13  ;;  %v9522_v62 = vpack.c.bf16 %v2648_v36, %v2647_v21  ;;  %v12331_v2 = vpack.c.bf16 %v2650_v59, %v2646_v8  ;;  %v9523_v60 = vpack.c.bf16 %v2650_v59, %v2649_v57  ;;  %4629 = vmatmul.mubr.bf16.gmra.mrb[44].mxu0 %v8964_v22  ;;  %v10548_v15 = vld [vmem:[#allocation8 + $0x34c] ss:$16 sps:$4 sm:$0xff]   ;;  %v10549_v39 = vld [vmem:[#allocation8 + $0x360] ss:$16 sps:$4 sm:$0xff]  }
 0x25b   :  { %v12335_v63 = vsel %vm11835_vm8, %v3139_v25, %v3338_v34  ;;  %v3146_v14 = vor.u32 %v3144_v28, %v12325_v27  ;;  %v3156_v30 = vrot.slane %v12325_v27, 4  ;;  %4855 = vmatmul.mubr.bf16.gmra.mrb[44].mxu1 %v8964_v22  ;;  %4698 = vmatpush1.bf16.msra.mxu0 %v10537_v12  ;;  %v2651_v18 = vmax.f32 %v2587_v0, 0.0  ;;  %v3346_v34 = vld [vmem:[#allocation2 + $0x140] sm:$0x11]  ;;  %v3349_v28 = vld [vmem:[#allocation2 + $0x148] sm:$0x11] }
 0x25c   :  { %3340 = vst [vmem:[#allocation2 + $0x120] sm:$0xff] %v12335_v63  ;;  %v3149_v13 = vshrl.u32 %v9522_v62, 16  ;;  %v3152_v8 = vshll.u32 %v9522_v62, 16  ;;  %v3158_v21 = vshrl.u32 %v9523_v60, 16  ;;  %v3161_v57 = vshll.u32 %v9523_v60, 16  ;;  %4699 = vmatprep.subr.bf16.mxu0 %v10545_v54  ;;  %4924 = vmatpush1.bf16.msra.mxu1 %v10540_v42  ;;  %v3352_v42 = vld [vmem:[#allocation2 + $0x150] sm:$0xff] }
 0x25d   :  { %v12344_v52 = vsel %vm11835_vm8, %v3146_v14, %v3341_v44  ;;  %v2588_v26 = vadd.f32 %v11911_v35, %v12180_v9  ;;  %v12353_v17 = vadd.f32 %v11915_v7, %v12182_v48  ;;  %v2591_v43 = vadd.f32 %v11903_v37, %v12186_v11  ;;  %v10546_v22 = vld [vmem:[#allocation8 + $0x348] ss:$16 sps:$4 sm:$0xff]   ;;  %v10557_v62 = vld [vmem:[#allocation8 + $0x384] ss:$16 sps:$4 sm:$0xff]   ;;  %4925 = vmatprep.subr.bf16.mxu1 %v10548_v15  ;;  %v10554_v60 = vld [vmem:[#allocation8 + $0x36c] ss:$16 sps:$4 sm:$0xff]  }
 0x25e   :  { %3343 = vst [vmem:[#allocation2 + $0x128] sm:$0xff] %v12344_v52  ;;  %v3151_v58 = vrot.slane %v3149_v13, 7  ;;  %v3160_v4 = vrot.slane %v3158_v21, 7  ;;  %v2653_v9 = vmax.f32 %v2589_v24, 0.0  ;;  %v2593_v59 = vadd.f32 %v11907_v23, %v12188_v32 }
 0x25f   :  { %v2652_v36 = vmax.f32 %v2588_v26, 0.0  ;;  %v2592_v33 = vadd.f32 %v11911_v35, %v12194_v20  ;;  %4700 = vmatpush1.bf16.msra.mxu0 %v10543_v29  ;;  %v2654_v11 = vmax.f32 %v12353_v17, 0.0  ;;  %v2655_v54 = vmax.f32 %v2591_v43, 0.0  ;;  %v10555_v26 = vld [vmem:[#allocation8 + $0x380] ss:$16 sps:$4 sm:$0xff]  }
 0x260   :  { %v3154_v12 = vor.u32 %v3152_v8, %v3151_v58  ;;  %v3165_v25 = vrot.slane %v3151_v58, 4  ;;  %v3163_v27 = vor.u32 %v3161_v57, %v3160_v4  ;;  %v3166_v48 = vrot.slane %v3160_v4, 4  ;;  %4701 = vmatprep.subr.bf16.mxu0 %v10551_v31  ;;  %v10552_v8 = vld [vmem:[#allocation8 + $0x368] ss:$16 sps:$4 sm:$0xff]   ;;  %4926 = vmatpush1.bf16.msra.mxu1 %v10546_v22  ;;  %v10563_v17 = vld [vmem:[#allocation8 + $0x3a4] ss:$16 sps:$4 sm:$0xff]  }
 0x261   :  { %v9524_v37 = vpack.c.bf16 %v2652_v36, %v2651_v18  ;;  %v2657_v44 = vmax.f32 %v2593_v59, 0.0  ;;  %v12378_v61 = vpack.c.bf16 %v2655_v54, %v2651_v18  ;;  %v2656_v0 = vmax.f32 %v2592_v33, 0.0  ;;  %4927 = vmatprep.subr.bf16.mxu1 %v10554_v60 }
 0x262   :  { %v12366_v23 = vsel %vm11949_vm10, %v3147_v46, %v3154_v12  ;;  %v3347_v35 = vsel %vm11813_vm14, %v3165_v25, %v3346_v34  ;;  %v12372_v32 = vsel %vm11949_vm10, %v3156_v30, %v3163_v27  ;;  %v3350_v20 = vsel %vm11813_vm14, %v3166_v48, %v3349_v28  ;;  %v12807_v30 = vld [vmem:[#allocation55_spill] sm:$0xff]  ;;  %v3355_v28 = vld [vmem:[#allocation2 + $0x158] sm:$0xff] }
 0x263   :  { %3344 = vst [vmem:[#allocation2 + $0x130] sm:$0xff] %v12366_v23  ;;  %3348 = vst [vmem:[#allocation2 + $0x140] sm:$0x11] %v3347_v35  ;;  %v3168_v19 = vshrl.u32 %v9524_v37, 16  ;;  %v9525_v46 = vpack.c.bf16 %v2654_v11, %v2653_v9  ;;  %v12380_v14 = vpack.c.bf16 %v2657_v44, %v2653_v9  ;;  %v2594_v13 = vadd.f32 %v11915_v7, %v12807_v30  ;;  %v10560_v7 = vld [vmem:[#allocation8 + $0x38c] ss:$16 sps:$4 sm:$0xff]  }
 0x264   :  { %3345 = vst [vmem:[#allocation2 + $0x138] sm:$0xff] %v12372_v32  ;;  %3351 = vst [vmem:[#allocation2 + $0x148] sm:$0x11] %v3350_v20  ;;  %4702 = vmatpush1.bf16.msra.mxu0 %v10549_v39  ;;  %v3171_v57 = vshll.u32 %v9524_v37, 16  ;;  %v8969_v24 = vcombine.high %v12212_v1, %v12239_v16  ;;  %v12386_v18 = vpack.c.bf16 %v2656_v0, %v2652_v36  ;;  %4928 = vmatpush1.bf16.msra.mxu1 %v10552_v8  ;;  %v10561_v25 = vld [vmem:[#allocation8 + $0x3a0] ss:$16 sps:$4 sm:$0xff]  }
 0x265   :  { %v3170_v21 = vrot.slane %v3168_v19, 7  ;;  %v3175_v29 = vshrl.u32 %v9525_v46, 16  ;;  %4703 = vmatprep.subr.bf16.mxu0 %v10557_v62  ;;  %v9526_v31 = vpack.c.bf16 %v2656_v0, %v2655_v54  ;;  %v2658_v58 = vmax.f32 %v2594_v13, 0.0  ;;  %v10566_v27 = vld [vmem:[#allocation8 + $0x3ac] ss:$16 sps:$4 sm:$0xff]   ;;  %4929 = vmatprep.subr.bf16.mxu1 %v10560_v7 }
 0x266   :  { %v8968_v4 = vcombine.low %v12212_v1, %v12239_v16  ;;  %v3178_v34 = vshll.u32 %v9525_v46, 16  ;;  %4638 = vmatprep.mubr.bf16.mxu0 %v8969_v24  ;;  %4864 = vmatprep.mubr.bf16.mxu1 %v8969_v24  ;;  %v8973_v1 = vcombine.high %v12286_v53, %v12308_v45  ;;  %v10558_v16 = vld [vmem:[#allocation8 + $0x388] ss:$16 sps:$4 sm:$0xff]   ;;  %v8972_v37 = vcombine.low %v12286_v53, %v12308_v45  ;;  %v3360_v62 = vld [vmem:[#allocation2 + $0x170] sm:$0x11] }
 0x267   :  { %v3173_v43 = vor.u32 %v3171_v57, %v3170_v21  ;;  %v3177_v15 = vrot.slane %v3175_v29, 7  ;;  %v3183_v9 = vshrl.u32 %v9526_v31, 16  ;;  %v12390_v59 = vpack.c.bf16 %v2658_v58, %v2654_v11  ;;  %v10569_v11 = vld [vmem:[#allocation8 + $0x3c4] ss:$16 sps:$4 sm:$0xff]   ;;  %v3363_v0 = vld [vmem:[#allocation2 + $0x178] sm:$0x11] }
 0x268   :  { %v9527_v33 = vpack.c.bf16 %v2658_v58, %v2657_v44  ;;  %4639 = vmatmul.mubr.bf16.gmra.mrb[48].mxu0 %v8968_v4  ;;  %4865 = vmatmul.mubr.bf16.gmra.mrb[48].mxu1 %v8968_v4  ;;  %v3186_v22 = vshll.u32 %v9526_v31, 16  ;;  %v3181_v54 = vrot.slane %v3170_v21, 4  ;;  %v8977_v35 = vcombine.high %v12335_v63, %v12366_v23  ;;  %v10564_v21 = vld [vmem:[#allocation8 + $0x3a8] ss:$16 sps:$4 sm:$0xff]   ;;  %v10572_v29 = vld [vmem:[#allocation8 + $0x3cc] ss:$16 sps:$4 sm:$0xff]  }
 0x269   :  { %v3353_v36 = vsel %vm11835_vm8, %v3173_v43, %v3352_v42  ;;  %v3180_v12 = vor.u32 %v3178_v34, %v3177_v15  ;;  %4704 = vmatpush1.bf16.msra.mxu0 %v10555_v26  ;;  %v3185_v48 = vrot.slane %v3183_v9, 7  ;;  %4648 = vmatprep.mubr.bf16.mxu0 %v8973_v1  ;;  %v8976_v20 = vcombine.low %v12335_v63, %v12366_v23  ;;  %v10567_v63 = vld [vmem:[#allocation8 + $0x3c0] ss:$16 sps:$4 sm:$0xff]   ;;  %v10577_v24 = vld [vmem:[#allocation8 + $0x3e4] ss:$16 sps:$4 sm:$0xff]   ;;  %v3367_v9 = vld [vmem:[#allocation2 + $0x8] sm:$0xff] }
 0x26a   :  { %3354 = vst [vmem:[#allocation2 + $0x150] sm:$0xff] %v3353_v36  ;;  %v3192_v39 = vshrl.u32 %v9527_v33, 16  ;;  %4705 = vmatprep.subr.bf16.mxu0 %v10563_v17  ;;  %4874 = vmatprep.mubr.bf16.mxu1 %v8973_v1  ;;  %v3195_v45 = vshll.u32 %v9527_v33, 16  ;;  %v3190_v46 = vrot.slane %v3177_v15, 4  ;;  %v10570_v31 = vld [vmem:[#allocation8 + $0x3c8] ss:$16 sps:$4 sm:$0xff]   ;;  %v12414_v56 = vcombine.high %v12344_v52, %v12372_v32 }
 0x26b   :  { %v3356_v44 = vsel %vm11835_vm8, %v3180_v12, %v3355_v28  ;;  %v3188_v60 = vor.u32 %v3186_v22, %v3185_v48  ;;  %v3199_v19 = vrot.slane %v3185_v48, 4  ;;  %4930 = vmatpush1.bf16.msra.mxu1 %v10558_v16  ;;  %v10575_v58 = vld [vmem:[#allocation8 + $0x3e0] ss:$16 sps:$4 sm:$0xff]   ;;  %v10580_v4 = vld [vmem:[#allocation8 + $0x3ec] ss:$16 sps:$4 sm:$0xff]   ;;  %v12418_v47 = vcombine.low %v12344_v52, %v12372_v32 }
 0x26c   :  { %3357 = vst [vmem:[#allocation2 + $0x158] sm:$0xff] %v3356_v44  ;;  %v3194_v53 = vrot.slane %v3192_v39, 7  ;;  %4931 = vmatprep.subr.bf16.mxu1 %v10566_v27  ;;  %v10583_v7 = vld [vmem:[#allocation9 + $0x4] ss:$16 sps:$4 sm:$0xff]   ;;  %v10578_v15 = vld [vmem:[#allocation8 + $0x3e8] ss:$16 sps:$4 sm:$0xff]  }
 0x26d   :  { %4706 = vmatpush1.bf16.msra.mxu0 %v10561_v25  ;;  %v3189_v49 = vsel %vm11949_vm10, %v3181_v54, %v3188_v60  ;;  %v3361_v30 = vsel %vm11813_vm14, %v3199_v19, %v3360_v62  ;;  %v10586_v34 = vld [vmem:[#allocation9 + $0xc] ss:$16 sps:$4 sm:$0xff]   ;;  %v10584_v12 = vld [vmem:[#allocation9 + $0x8] ss:$16 sps:$4 sm:$0xff]   ;;  %v10590_v25 = vld [vmem:[#allocation9 + $0x24] ss:$16 sps:$4 sm:$0xff]  }
 0x26e   :  { %v3197_v13 = vor.u32 %v3195_v45, %v3194_v53  ;;  %v3200_v8 = vrot.slane %v3194_v53, 4  ;;  %4707 = vmatprep.subr.bf16.mxu0 %v10569_v11  ;;  %3358 = vst [vmem:[#allocation2 + $0x160] sm:$0xff] %v3189_v49  ;;  %3362 = vst [vmem:[#allocation2 + $0x170] sm:$0x11] %v3361_v30  ;;  %v8981_v23 = vcombine.high %v3353_v36, %v3189_v49  ;;  %v3369_v28 = vld [vmem:[#allocation2 + $0x18] sm:$0xff]  ;;  %v3373_v32 = vld [vmem:[#allocation2 + $0x48] sm:$0xff] }
 0x26f   :  { %v8980_v57 = vcombine.low %v3353_v36, %v3189_v49  ;;  %4932 = vmatpush1.bf16.msra.mxu1 %v10564_v21  ;;  %v8955_v52 = vcombine.high %v3367_v9, %v3369_v28  ;;  %v8954_v33 = vcombine.low %v3367_v9, %v3369_v28  ;;  %v10581_v36 = vld [vmem:[#allocation9] ss:$16 sps:$4 sm:$0xff]   ;;  %v3371_v1 = vld [vmem:[#allocation2 + $0x38] sm:$0xff]  ;;  %v10597_v39 = vld [vmem:[#allocation9 + $0x44] ss:$16 sps:$4 sm:$0xff]  }
 0x270   :  { %v3198_v26 = vsel %vm11949_vm10, %v3190_v46, %v3197_v13  ;;  %v3364_v42 = vsel %vm11813_vm14, %v3200_v8, %v3363_v0  ;;  %4649 = vmatmul.mubr.bf16.gmra.mrb[52].mxu0 %v8972_v37  ;;  %4875 = vmatmul.mubr.bf16.gmra.mrb[52].mxu1 %v8972_v37  ;;  %v8959_v16 = vcombine.high %v3371_v1, %v3373_v32  ;;  %v10593_v27 = vld [vmem:[#allocation9 + $0x2c] ss:$16 sps:$4 sm:$0xff]   ;;  %v10588_v48 = vld [vmem:[#allocation9 + $0x20] ss:$16 sps:$4 sm:$0xff]   ;;  %v10591_v22 = vld [vmem:[#allocation9 + $0x28] ss:$16 sps:$4 sm:$0xff]  }
 0x271   :  { %3359 = vst [vmem:[#allocation2 + $0x168] sm:$0xff] %v3198_v26  ;;  %3365 = vst [vmem:[#allocation2 + $0x178] sm:$0x11] %v3364_v42  ;;  %4658 = vmatprep.mubr.bf16.mxu0 %v8977_v35  ;;  %4884 = vmatprep.mubr.bf16.mxu1 %v8977_v35  ;;  %v12420_v17 = vcombine.high %v3356_v44, %v3198_v26  ;;  %v12422_v43 = vcombine.low %v3356_v44, %v3198_v26  ;;  %v10600_v37 = vld [vmem:[#allocation9 + $0x4c] ss:$16 sps:$4 sm:$0xff]  }
 0x272   :  { %4708 = vmatpush1.bf16.msra.mxu0 %v10567_v63  ;;  %4933 = vmatprep.subr.bf16.mxu1 %v10572_v29  ;;  %v3377_v11 = vld [vmem:[#allocation2 + $0x78] sm:$0xff]  ;;  %v8958_v54 = vcombine.low %v3371_v1, %v3373_v32  ;;  %v10595_v44 = vld [vmem:[#allocation9 + $0x40] ss:$16 sps:$4 sm:$0xff]   ;;  %v3375_v35 = vld [vmem:[#allocation2 + $0x68] sm:$0xff] }
 0x273   :  { %4709 = vmatprep.subr.bf16.mxu0 %v10577_v24  ;;  %4934 = vmatpush1.bf16.msra.mxu1 %v10570_v31  ;;  %v10598_v62 = vld [vmem:[#allocation9 + $0x48] ss:$16 sps:$4 sm:$0xff]   ;;  %v10604_v60 = vld [vmem:[#allocation9 + $0x64] ss:$16 sps:$4 sm:$0xff]   ;;  %v10607_v19 = vld [vmem:[#allocation9 + $0x6c] ss:$16 sps:$4 sm:$0xff]   ;;  %v8962_v30 = vcombine.low %v3375_v35, %v3377_v11 }
 0x274   :  { %4935 = vmatprep.subr.bf16.mxu1 %v10580_v4  ;;  %v10602_v53 = vld [vmem:[#allocation9 + $0x60] ss:$16 sps:$4 sm:$0xff]   ;;  %v10605_v45 = vld [vmem:[#allocation9 + $0x68] ss:$16 sps:$4 sm:$0xff]   ;;  %v10611_v46 = vld [vmem:[#allocation9 + $0x84] ss:$16 sps:$4 sm:$0xff]  }
 0x275   :  { %v10614_v0 = vld [vmem:[#allocation9 + $0x8c] ss:$16 sps:$4 sm:$0xff]   ;;  %v10609_v13 = vld [vmem:[#allocation9 + $0x80] ss:$16 sps:$4 sm:$0xff]   ;;  %v10612_v8 = vld [vmem:[#allocation9 + $0x88] ss:$16 sps:$4 sm:$0xff]  }
 0x276   :  { %4710 = vmatpush1.bf16.msra.mxu0 %v10575_v58  ;;  %v3381_v49 = vld [vmem:[#allocation2 + $0xa8] sm:$0xff]  ;;  %v3379_v21 = vld [vmem:[#allocation2 + $0x98] sm:$0xff]  ;;  %v10616_v29 = vld [vmem:[#allocation9 + $0xa0] ss:$16 sps:$4 sm:$0xff]  }
 0x277   :  { %5338 = vmatprep.subr.bf16.mxu0 %v10583_v7  ;;  %4936 = vmatpush1.bf16.msra.mxu1 %v10578_v15  ;;  %v8967_v63 = vcombine.high %v3379_v21, %v3381_v49  ;;  %v10619_v24 = vld [vmem:[#allocation9 + $0xa8] ss:$16 sps:$4 sm:$0xff]   ;;  %v10625_v26 = vld [vmem:[#allocation9 + $0xc4] ss:$16 sps:$4 sm:$0xff]   ;;  %v10628_v42 = vld [vmem:[#allocation9 + $0xcc] ss:$16 sps:$4 sm:$0xff]   ;;  %v8966_v58 = vcombine.low %v3379_v21, %v3381_v49 }
 0x278   :  { %4659 = vmatmul.mubr.bf16.gmra.mrb[56].mxu0 %v8976_v20  ;;  %4885 = vmatmul.mubr.bf16.gmra.mrb[56].mxu1 %v8976_v20  ;;  %v8963_v20 = vcombine.high %v3375_v35, %v3377_v11  ;;  %v3385_v31 = vld [vmem:[#allocation2 + $0xd8] sm:$0xff]  ;;  %v10623_v4 = vld [vmem:[#allocation9 + $0xc0] ss:$16 sps:$4 sm:$0xff]   ;;  %v3383_v15 = vld [vmem:[#allocation2 + $0xc8] sm:$0xff] }
 0x279   :  { %4668 = vmatprep.mubr.bf16.mxu0 %v8981_v23  ;;  %4894 = vmatprep.mubr.bf16.mxu1 %v8981_v23  ;;  %v10618_v23 = vld [vmem:[#allocation9 + $0xa4] ss:$16 sps:$4 sm:$0xff]   ;;  %v10626_v7 = vld [vmem:[#allocation9 + $0xc8] ss:$16 sps:$4 sm:$0xff]   ;;  %v10635_v9 = vld [vmem:[#allocation9 + $0xec] ss:$16 sps:$4 sm:$0xff]   ;;  %v8970_v1 = vcombine.low %v3383_v15, %v3385_v31 }
 0x27a   :  { %5451 = vmatprep.subr.bf16.mxu1 %v10586_v34  ;;  %v8971_v34 = vcombine.high %v3383_v15, %v3385_v31  ;;  %v10632_v28 = vld [vmem:[#allocation9 + $0xe4] ss:$16 sps:$4 sm:$0xff]   ;;  %v10633_v32 = vld [vmem:[#allocation9 + $0xe8] ss:$16 sps:$4 sm:$0xff]   ;;  %v10651_v35 = vld [vmem:[#allocation9 + $0x140] ss:$16 sps:$4 sm:$0xff]  }
 0x27b   :  { %v10647_v11 = vld [vmem:[#allocation9 + $0x128] ss:$16 sps:$4 sm:$0xff]   ;;  %v10663_v49 = vld [vmem:[#allocation9 + $0x180] ss:$16 sps:$4 sm:$0xff]   ;;  %v10689_v31 = vld [vmem:[#allocation8 + $0x404] ss:$16 sps:$4 sm:$0xff]  }
 0x27c   :  { %v10672_v21 = vld [vmem:[#allocation9 + $0x1a8] ss:$16 sps:$4 sm:$0xff]   ;;  %v10695_v15 = vld [vmem:[#allocation8 + $0x424] ss:$16 sps:$4 sm:$0xff]  }
 0x280   :  { %4669 = vmatmul.mubr.bf16.gmra.mrb[60].mxu0 %v8980_v57  ;;  %4895 = vmatmul.mubr.bf16.gmra.mrb[60].mxu1 %v8980_v57  ;;  %v10621_v57 = vld [vmem:[#allocation9 + $0xac] ss:$16 sps:$4 sm:$0xff]  }
 0x281   :  { %4711 = vmatprep.mubr.bf16.mxu0 %v8955_v52  ;;  %4937 = vmatprep.mubr.bf16.mxu1 %v8955_v52  ;;  %v10630_v52 = vld [vmem:[#allocation9 + $0xe0] ss:$16 sps:$4 sm:$0xff]  }
 0x288   :  { %4712 = vmatmul.mubr.bf16.vlgmr.msra.gmra.mrb[32].mxu0 %v8954_v33  ;;  %4938 = vmatmul.mubr.bf16.vlgmr.msra.gmra.mrb[32].mxu1 %v8954_v33  ;;  %v10639_v33 = vld [vmem:[#allocation9 + $0x104] ss:$16 sps:$4 sm:$0xff]  }
 0x289   :  { %4721 = vmatprep.mubr.bf16.mxu0 %v8959_v16  ;;  %4947 = vmatprep.mubr.bf16.mxu1 %v8959_v16  ;;  %v10637_v16 = vld [vmem:[#allocation9 + $0x100] ss:$16 sps:$4 sm:$0xff]  }
 0x28a   :  { %5339 = vmatpush1.bf16.msra.mxu0 %v10581_v36  ;;  %5452 = vmatpush1.bf16.msra.mxu1 %v10584_v12  ;;  %v10642_v36 = vld [vmem:[#allocation9 + $0x10c] ss:$16 sps:$4 sm:$0xff]  }
 0x28b   :  { %5340 = vmatprep.subr.bf16.mxu0 %v10590_v25  ;;  %5453 = vmatprep.subr.bf16.mxu1 %v10593_v27  ;;  %v3389_v12 = vld [vmem:[#allocation2 + $0x108] sm:$0xff]  ;;  %v3387_v27 = vld [vmem:[#allocation2 + $0xf8] sm:$0xff] }
 0x28c   :  { %v10640_v25 = vld [vmem:[#allocation9 + $0x108] ss:$16 sps:$4 sm:$0xff]  }
 0x28e   :  { %5341 = vmatpush1.bf16.msra.mxu0 %v10588_v48  ;;  %5454 = vmatpush1.bf16.msra.mxu1 %v10591_v22  ;;  %v8975_v48 = vcombine.high %v3387_v27, %v3389_v12  ;;  %v10646_v22 = vld [vmem:[#allocation9 + $0x124] ss:$16 sps:$4 sm:$0xff]  }
 0x28f   :  { %5342 = vmatprep.subr.bf16.mxu0 %v10597_v39  ;;  %5455 = vmatprep.subr.bf16.mxu1 %v10600_v37  ;;  %v10649_v39 = vld [vmem:[#allocation9 + $0x12c] ss:$16 sps:$4 sm:$0xff]   ;;  %v10644_v37 = vld [vmem:[#allocation9 + $0x120] ss:$16 sps:$4 sm:$0xff]  }
 0x290   :  { %4722 = vmatmul.mubr.bf16.gmra.mrb[36].mxu0 %v8958_v54  ;;  %4948 = vmatmul.mubr.bf16.gmra.mrb[36].mxu1 %v8958_v54  ;;  %v10653_v54 = vld [vmem:[#allocation9 + $0x144] ss:$16 sps:$4 sm:$0xff]  }
 0x291   :  { %4731 = vmatprep.mubr.bf16.mxu0 %v8963_v20  ;;  %4957 = vmatprep.mubr.bf16.mxu1 %v8963_v20  ;;  %v10654_v20 = vld [vmem:[#allocation9 + $0x148] ss:$16 sps:$4 sm:$0xff]  }
 0x292   :  { %5343 = vmatpush1.bf16.msra.mxu0 %v10595_v44  ;;  %5456 = vmatpush1.bf16.msra.mxu1 %v10598_v62  ;;  %v10656_v44 = vld [vmem:[#allocation9 + $0x14c] ss:$16 sps:$4 sm:$0xff]   ;;  %v8974_v62 = vcombine.low %v3387_v27, %v3389_v12  ;;  %v10702_v12 = vld [vmem:[#allocation8 + $0x448] ss:$16 sps:$4 sm:$0xff]   ;;  %v10705_v27 = vld [vmem:[#allocation8 + $0x460] ss:$16 sps:$4 sm:$0xff]  }
 0x293   :  { %5344 = vmatprep.subr.bf16.mxu0 %v10604_v60  ;;  %5457 = vmatprep.subr.bf16.mxu1 %v10607_v19  ;;  %v10659_v60 = vld [vmem:[#allocation9 + $0x164] ss:$16 sps:$4 sm:$0xff]   ;;  %v10662_v19 = vld [vmem:[#allocation9 + $0x16c] ss:$16 sps:$4 sm:$0xff]  }
 0x296   :  { %5345 = vmatpush1.bf16.msra.mxu0 %v10602_v53  ;;  %5458 = vmatpush1.bf16.msra.mxu1 %v10605_v45  ;;  %v10657_v53 = vld [vmem:[#allocation9 + $0x160] ss:$16 sps:$4 sm:$0xff]   ;;  %v10660_v45 = vld [vmem:[#allocation9 + $0x168] ss:$16 sps:$4 sm:$0xff]  }
 0x297   :  { %5346 = vmatprep.subr.bf16.mxu0 %v10611_v46  ;;  %5459 = vmatprep.subr.bf16.mxu1 %v10614_v0  ;;  %v10665_v46 = vld [vmem:[#allocation9 + $0x184] ss:$16 sps:$4 sm:$0xff]   ;;  %v10668_v0 = vld [vmem:[#allocation9 + $0x18c] ss:$16 sps:$4 sm:$0xff]  }
 0x298   :  { %4732 = vmatmul.mubr.bf16.gmra.mrb[40].mxu0 %v8962_v30  ;;  %4958 = vmatmul.mubr.bf16.gmra.mrb[40].mxu1 %v8962_v30  ;;  %v10666_v30 = vld [vmem:[#allocation9 + $0x188] ss:$16 sps:$4 sm:$0xff]  }
 0x299   :  { %4741 = vmatprep.mubr.bf16.mxu0 %v8967_v63  ;;  %4967 = vmatprep.mubr.bf16.mxu1 %v8967_v63  ;;  %v10677_v63 = vld [vmem:[#allocation9 + $0x1c4] ss:$16 sps:$4 sm:$0xff]  }
 0x29a   :  { %5347 = vmatpush1.bf16.msra.mxu0 %v10609_v13  ;;  %5460 = vmatpush1.bf16.msra.mxu1 %v10612_v8  ;;  %v10671_v13 = vld [vmem:[#allocation9 + $0x1a4] ss:$16 sps:$4 sm:$0xff]   ;;  %v10674_v8 = vld [vmem:[#allocation9 + $0x1ac] ss:$16 sps:$4 sm:$0xff]  }
 0x29b   :  { %5348 = vmatprep.subr.bf16.mxu0 %v10618_v23  ;;  %5461 = vmatprep.subr.bf16.mxu1 %v10621_v57  ;;  %v10680_v23 = vld [vmem:[#allocation9 + $0x1cc] ss:$16 sps:$4 sm:$0xff]   ;;  %v10675_v57 = vld [vmem:[#allocation9 + $0x1c0] ss:$16 sps:$4 sm:$0xff]  }
 0x29e   :  { %5349 = vmatpush1.bf16.msra.mxu0 %v10616_v29  ;;  %5462 = vmatpush1.bf16.msra.mxu1 %v10619_v24  ;;  %v10678_v29 = vld [vmem:[#allocation9 + $0x1c8] ss:$16 sps:$4 sm:$0xff]   ;;  %v10683_v24 = vld [vmem:[#allocation9 + $0x1e4] ss:$16 sps:$4 sm:$0xff]  }
 0x29f   :  { %5350 = vmatprep.subr.bf16.mxu0 %v10625_v26  ;;  %5463 = vmatprep.subr.bf16.mxu1 %v10628_v42  ;;  %v10681_v26 = vld [vmem:[#allocation9 + $0x1e0] ss:$16 sps:$4 sm:$0xff]   ;;  %v10684_v42 = vld [vmem:[#allocation9 + $0x1e8] ss:$16 sps:$4 sm:$0xff]  }
 0x2a0   :  { %4742 = vmatmul.mubr.bf16.gmra.mrb[44].mxu0 %v8966_v58  ;;  %4968 = vmatmul.mubr.bf16.gmra.mrb[44].mxu1 %v8966_v58  ;;  %v10692_v58 = vld [vmem:[#allocation8 + $0x40c] ss:$16 sps:$4 sm:$0xff]  }
 0x2a1   :  { %4751 = vmatprep.mubr.bf16.mxu0 %v8971_v34  ;;  %4977 = vmatprep.mubr.bf16.mxu1 %v8971_v34  ;;  %v12809_v34 = vld [vmem:[#allocation21_spill] sm:$0xff] }
 0x2a2   :  { %5351 = vmatpush1.bf16.msra.mxu0 %v10623_v4  ;;  %5464 = vmatpush1.bf16.msra.mxu1 %v10626_v7  ;;  %v10687_v4 = vld [vmem:[#allocation8 + $0x400] ss:$16 sps:$4 sm:$0xff]   ;;  %v10690_v7 = vld [vmem:[#allocation8 + $0x408] ss:$16 sps:$4 sm:$0xff]  }
 0x2a3   :  { %5352 = vmatprep.subr.bf16.mxu0 %v10632_v28  ;;  %5465 = vmatprep.subr.bf16.mxu1 %v10635_v9  ;;  %v10693_v28 = vld [vmem:[#allocation8 + $0x420] ss:$16 sps:$4 sm:$0xff]   ;;  %v10696_v9 = vld [vmem:[#allocation8 + $0x428] ss:$16 sps:$4 sm:$0xff]  }
 0x2a6   :  { %5353 = vmatpush1.bf16.msra.mxu0 %v10630_v52  ;;  %5466 = vmatpush1.bf16.msra.mxu1 %v10633_v32  ;;  %v10701_v52 = vld [vmem:[#allocation8 + $0x444] ss:$16 sps:$4 sm:$0xff]   ;;  %v10704_v32 = vld [vmem:[#allocation8 + $0x44c] ss:$16 sps:$4 sm:$0xff]  }
 0x2a7   :  { %5354 = vmatprep.subr.bf16.mxu0 %v10639_v33  ;;  %5467 = vmatprep.subr.bf16.mxu1 %v10642_v36  ;;  %v12810_v33 = vld [vmem:[#allocation22_spill] sm:$0xff]  ;;  %v10699_v36 = vld [vmem:[#allocation8 + $0x440] ss:$16 sps:$4 sm:$0xff]  }
 0x2a8   :  { %4752 = vmatmul.mubr.bf16.gmra.mrb[48].mxu0 %v8970_v1  ;;  %4978 = vmatmul.mubr.bf16.gmra.mrb[48].mxu1 %v8970_v1  ;;  %v10707_v1 = vld [vmem:[#allocation8 + $0x464] ss:$16 sps:$4 sm:$0xff]  }
 0x2a9   :  { %4761 = vmatprep.mubr.bf16.mxu0 %v8975_v48  ;;  %4987 = vmatprep.mubr.bf16.mxu1 %v8975_v48  ;;  %v10708_v48 = vld [vmem:[#allocation8 + $0x468] ss:$16 sps:$4 sm:$0xff]  }
 0x2aa   :  { %5355 = vmatpush1.bf16.msra.mxu0 %v10637_v16  ;;  %5468 = vmatpush1.bf16.msra.mxu1 %v10640_v25  ;;  %v10710_v16 = vld [vmem:[#allocation8 + $0x46c] ss:$16 sps:$4 sm:$0xff]   ;;  %v12811_v25 = vld [vmem:[#allocation23_spill] sm:$0xff] }
 0x2ab   :  { %5356 = vmatprep.subr.bf16.mxu0 %v10646_v22  ;;  %5469 = vmatprep.subr.bf16.mxu1 %v10649_v39  ;;  %v10713_v22 = vld [vmem:[#allocation8 + $0x484] ss:$16 sps:$4 sm:$0xff]   ;;  %v10716_v39 = vld [vmem:[#allocation8 + $0x48c] ss:$16 sps:$4 sm:$0xff]  }
 0x2ae   :  { %5357 = vmatpush1.bf16.msra.mxu0 %v10644_v37  ;;  %5470 = vmatpush1.bf16.msra.mxu1 %v10647_v11  ;;  %v12812_v37 = vld [vmem:[#allocation24_spill] sm:$0xff]  ;;  %v10711_v11 = vld [vmem:[#allocation8 + $0x480] ss:$16 sps:$4 sm:$0xff]  }
 0x2af   :  { %5358 = vmatprep.subr.bf16.mxu0 %v10653_v54  ;;  %5471 = vmatprep.subr.bf16.mxu1 %v10656_v44  ;;  %v10714_v54 = vld [vmem:[#allocation8 + $0x488] ss:$16 sps:$4 sm:$0xff]   ;;  %v10719_v44 = vld [vmem:[#allocation8 + $0x4a4] ss:$16 sps:$4 sm:$0xff]  }
 0x2b0   :  { %4762 = vmatmul.mubr.bf16.gmra.mrb[52].mxu0 %v8974_v62  ;;  %4988 = vmatmul.mubr.bf16.gmra.mrb[52].mxu1 %v8974_v62  ;;  %v10722_v62 = vld [vmem:[#allocation8 + $0x4ac] ss:$16 sps:$4 sm:$0xff]  }
 0x2b1   :  { %4771 = vmatprep.mubr.bf16.mxu0 %v12414_v56  ;;  %4997 = vmatprep.mubr.bf16.mxu1 %v12414_v56  ;;  %v10669_v56 = vld [vmem:[#allocation9 + $0x1a0] ss:$16 sps:$4 sm:$0xff]  }
 0x2b2   :  { %5359 = vmatpush1.bf16.msra.mxu0 %v10651_v35  ;;  %5472 = vmatpush1.bf16.msra.mxu1 %v10654_v20  ;;  %v12813_v35 = vld [vmem:[#allocation26_spill] sm:$0xff]  ;;  %v10717_v20 = vld [vmem:[#allocation8 + $0x4a0] ss:$16 sps:$4 sm:$0xff]  }
 0x2b3   :  { %5360 = vmatprep.subr.bf16.mxu0 %v10659_v60  ;;  %5473 = vmatprep.subr.bf16.mxu1 %v10662_v19  ;;  %v10720_v60 = vld [vmem:[#allocation8 + $0x4a8] ss:$16 sps:$4 sm:$0xff]   ;;  %v10725_v19 = vld [vmem:[#allocation8 + $0x4c4] ss:$16 sps:$4 sm:$0xff]  }
 0x2b6   :  { %5361 = vmatpush1.bf16.msra.mxu0 %v10657_v53  ;;  %5474 = vmatpush1.bf16.msra.mxu1 %v10660_v45  ;;  %v10728_v53 = vld [vmem:[#allocation8 + $0x4cc] ss:$16 sps:$4 sm:$0xff]   ;;  %v12814_v45 = vld [vmem:[#allocation27_spill] sm:$0xff] }
 0x2b7   :  { %5362 = vmatprep.subr.bf16.mxu0 %v10665_v46  ;;  %5475 = vmatprep.subr.bf16.mxu1 %v10668_v0  ;;  %v10723_v46 = vld [vmem:[#allocation8 + $0x4c0] ss:$16 sps:$4 sm:$0xff]   ;;  %v10726_v0 = vld [vmem:[#allocation8 + $0x4c8] ss:$16 sps:$4 sm:$0xff]  }
 0x2b8   :  { %4772 = vmatmul.mubr.bf16.gmra.mrb[56].mxu0 %v12418_v47  ;;  %4998 = vmatmul.mubr.bf16.gmra.mrb[56].mxu1 %v12418_v47  ;;  %v10686_v47 = vld [vmem:[#allocation9 + $0x1ec] ss:$16 sps:$4 sm:$0xff]  }
 0x2b9   :  { %4781 = vmatprep.mubr.bf16.mxu0 %v12420_v17  ;;  %5007 = vmatprep.mubr.bf16.mxu1 %v12420_v17  ;;  %v12808_v17 = vld [vmem:[#allocation20_spill] sm:$0xff] }
 0x2ba   :  { %5363 = vmatpush1.bf16.msra.mxu0 %v10663_v49  ;;  %5476 = vmatpush1.bf16.msra.mxu1 %v10666_v30  ;;  %v10731_v49 = vld [vmem:[#allocation8 + $0x4e4] ss:$16 sps:$4 sm:$0xff]   ;;  %v10734_v30 = vld [vmem:[#allocation8 + $0x4ec] ss:$16 sps:$4 sm:$0xff]  }
 0x2bb   :  { %5364 = vmatprep.subr.bf16.mxu0 %v10671_v13  ;;  %5477 = vmatprep.subr.bf16.mxu1 %v10674_v8  ;;  %v12815_v13 = vld [vmem:[#allocation28_spill] sm:$0xff]  ;;  %v10729_v8 = vld [vmem:[#allocation8 + $0x4e0] ss:$16 sps:$4 sm:$0xff]  }
 0x2be   :  { %5365 = vmatpush1.bf16.msra.mxu0 %v10669_v56  ;;  %5478 = vmatpush1.bf16.msra.mxu1 %v10672_v21  ;;  %v10732_v56 = vld [vmem:[#allocation8 + $0x4e8] ss:$16 sps:$4 sm:$0xff]   ;;  %v10737_v21 = vld [vmem:[#allocation8 + $0x504] ss:$16 sps:$4 sm:$0xff]  }
 0x2bf   :  { %5366 = vmatprep.subr.bf16.mxu0 %v10677_v63  ;;  %5479 = vmatprep.subr.bf16.mxu1 %v10680_v23  ;;  %v10740_v63 = vld [vmem:[#allocation8 + $0x50c] ss:$16 sps:$4 sm:$0xff]   ;;  %v12816_v23 = vld [vmem:[#allocation29_spill] sm:$0xff] }
 0x2c0   :  { %4782 = vmatmul.mubr.bf16.gmra.mrb[60].mxu0 %v12422_v43  ;;  %5008 = vmatmul.mubr.bf16.gmra.mrb[60].mxu1 %v12422_v43  ;;  %v10698_v43 = vld [vmem:[#allocation8 + $0x42c] ss:$16 sps:$4 sm:$0xff]  }
 0x2c1   :  { %5370 = vmatprep.mubr.bf16.mxu0 %v12808_v17  ;;  %5483 = vmatprep.mubr.bf16.mxu1 %v12808_v17  ;;  %v12817_v17 = vld [vmem:[#allocation30_spill] sm:$0xff] }
 0x2c2   :  { %5367 = vmatpush1.bf16.msra.mxu0 %v10675_v57  ;;  %5480 = vmatpush1.bf16.msra.mxu1 %v10678_v29  ;;  %v10735_v57 = vld [vmem:[#allocation8 + $0x500] ss:$16 sps:$4 sm:$0xff]   ;;  %v10738_v29 = vld [vmem:[#allocation8 + $0x508] ss:$16 sps:$4 sm:$0xff]  }
 0x2c3   :  { %5368 = vmatprep.subr.bf16.mxu0 %v10683_v24  ;;  %5481 = vmatprep.subr.bf16.mxu1 %v10686_v47  ;;  %v10743_v24 = vld [vmem:[#allocation8 + $0x524] ss:$16 sps:$4 sm:$0xff]   ;;  %v10746_v47 = vld [vmem:[#allocation8 + $0x52c] ss:$16 sps:$4 sm:$0xff]  }
 0x2c6   :  { %5369 = vmatpush1.bf16.msra.mxu0 %v10681_v26  ;;  %5482 = vmatpush1.bf16.msra.mxu1 %v10684_v42  ;;  %v10741_v26 = vld [vmem:[#allocation8 + $0x520] ss:$16 sps:$4 sm:$0xff]   ;;  %v10744_v42 = vld [vmem:[#allocation8 + $0x528] ss:$16 sps:$4 sm:$0xff]  }
 0x2c7   :  { %6333 = vmatprep.subr.bf16.mxu0 %v10689_v31  ;;  %6559 = vmatprep.subr.bf16.mxu1 %v10692_v58  ;;  %v10749_v31 = vld [vmem:[#allocation8 + $0x544] ss:$16 sps:$4 sm:$0xff]   ;;  %v10752_v58 = vld [vmem:[#allocation8 + $0x54c] ss:$16 sps:$4 sm:$0xff]  }
 0x2c9   :  { %5371 = vmatmul.mubr.bf16.vlgmr.msra.gmra.mrb[32].mxu0 %v12809_v34  ;;  %5484 = vmatmul.mubr.bf16.vlgmr.msra.gmra.mrb[32].mxu1 %v12809_v34  ;;  %v10758_v34 = vld [vmem:[#allocation8 + $0x56c] ss:$16 sps:$4 sm:$0xff]  }
 0x2ca   :  { %6334 = vmatpush1.bf16.msra.mxu0 %v10687_v4  ;;  %6560 = vmatpush1.bf16.msra.mxu1 %v10690_v7  ;;  %v12818_v4 = vld [vmem:[#allocation31_spill] sm:$0xff] }
 0x2cb   :  { %6335 = vmatprep.subr.bf16.mxu0 %v10695_v15  ;;  %6561 = vmatprep.subr.bf16.mxu1 %v10698_v43  ;;  %v10747_v7 = vld [vmem:[#allocation8 + $0x540] ss:$16 sps:$4 sm:$0xff]   ;;  %v10750_v15 = vld [vmem:[#allocation8 + $0x548] ss:$16 sps:$4 sm:$0xff]   ;;  %v10755_v43 = vld [vmem:[#allocation8 + $0x564] ss:$16 sps:$4 sm:$0xff]  }
 0x2cc   :  { %5380 = vmatprep.mubr.bf16.mxu0 %v12810_v33  ;;  %5493 = vmatprep.mubr.bf16.mxu1 %v12810_v33  ;;  %v10764_v33 = vld [vmem:[#allocation8 + $0x58c] ss:$16 sps:$4 sm:$0xff]  }
 0x2ce   :  { %6336 = vmatpush1.bf16.msra.mxu0 %v10693_v28  ;;  %6562 = vmatpush1.bf16.msra.mxu1 %v10696_v9  ;;  %v12819_v28 = vld [vmem:[#allocation32_spill] sm:$0xff]  ;;  %v10753_v9 = vld [vmem:[#allocation8 + $0x560] ss:$16 sps:$4 sm:$0xff]  }
 0x2cf   :  { %6337 = vmatprep.subr.bf16.mxu0 %v10701_v52  ;;  %6563 = vmatprep.subr.bf16.mxu1 %v10704_v32  ;;  %v10756_v52 = vld [vmem:[#allocation8 + $0x568] ss:$16 sps:$4 sm:$0xff]   ;;  %v10761_v32 = vld [vmem:[#allocation8 + $0x584] ss:$16 sps:$4 sm:$0xff]  }
 0x2d1   :  { %5381 = vmatmul.mubr.bf16.gmra.mrb[36].mxu0 %v12811_v25  ;;  %5494 = vmatmul.mubr.bf16.gmra.mrb[36].mxu1 %v12811_v25  ;;  %v10770_v25 = vld [vmem:[#allocation8 + $0x5ac] ss:$16 sps:$4 sm:$0xff]  }
 0x2d2   :  { %6338 = vmatpush1.bf16.msra.mxu0 %v10699_v36  ;;  %6564 = vmatpush1.bf16.msra.mxu1 %v10702_v12  ;;  %v12820_v36 = vld [vmem:[#allocation33_spill] sm:$0xff] }
 0x2d3   :  { %6339 = vmatprep.subr.bf16.mxu0 %v10707_v1  ;;  %6565 = vmatprep.subr.bf16.mxu1 %v10710_v16  ;;  %v10759_v12 = vld [vmem:[#allocation8 + $0x580] ss:$16 sps:$4 sm:$0xff]   ;;  %v10762_v1 = vld [vmem:[#allocation8 + $0x588] ss:$16 sps:$4 sm:$0xff]   ;;  %v10767_v16 = vld [vmem:[#allocation8 + $0x5a4] ss:$16 sps:$4 sm:$0xff]  }
 0x2d4   :  { %5390 = vmatprep.mubr.bf16.mxu0 %v12812_v37  ;;  %5503 = vmatprep.mubr.bf16.mxu1 %v12812_v37  ;;  %v10776_v37 = vld [vmem:[#allocation8 + $0x5cc] ss:$16 sps:$4 sm:$0xff]  }
 0x2d6   :  { %6340 = vmatpush1.bf16.msra.mxu0 %v10705_v27  ;;  %6566 = vmatpush1.bf16.msra.mxu1 %v10708_v48  ;;  %v12821_v27 = vld [vmem:[#allocation34_spill] sm:$0xff]  ;;  %v10765_v48 = vld [vmem:[#allocation8 + $0x5a0] ss:$16 sps:$4 sm:$0xff]  }
 0x2d7   :  { %6341 = vmatprep.subr.bf16.mxu0 %v10713_v22  ;;  %6567 = vmatprep.subr.bf16.mxu1 %v10716_v39  ;;  %v10768_v22 = vld [vmem:[#allocation8 + $0x5a8] ss:$16 sps:$4 sm:$0xff]   ;;  %v10773_v39 = vld [vmem:[#allocation8 + $0x5c4] ss:$16 sps:$4 sm:$0xff]  }
 0x2d9   :  { %5391 = vmatmul.mubr.bf16.gmra.mrb[40].mxu0 %v12813_v35  ;;  %5504 = vmatmul.mubr.bf16.gmra.mrb[40].mxu1 %v12813_v35  ;;  %v10782_v35 = vld [vmem:[#allocation8 + $0x5ec] ss:$16 sps:$4 sm:$0xff]  }
 0x2da   :  { %6342 = vmatpush1.bf16.msra.mxu0 %v10711_v11  ;;  %6568 = vmatpush1.bf16.msra.mxu1 %v10714_v54  ;;  %v12822_v11 = vld [vmem:[#allocation35_spill] sm:$0xff] }
 0x2db   :  { %6343 = vmatprep.subr.bf16.mxu0 %v10719_v44  ;;  %6569 = vmatprep.subr.bf16.mxu1 %v10722_v62  ;;  %v10771_v54 = vld [vmem:[#allocation8 + $0x5c0] ss:$16 sps:$4 sm:$0xff]   ;;  %v10774_v44 = vld [vmem:[#allocation8 + $0x5c8] ss:$16 sps:$4 sm:$0xff]   ;;  %v10779_v62 = vld [vmem:[#allocation8 + $0x5e4] ss:$16 sps:$4 sm:$0xff]  }
 0x2dc   :  { %5400 = vmatprep.mubr.bf16.mxu0 %v12814_v45  ;;  %5513 = vmatprep.mubr.bf16.mxu1 %v12814_v45  ;;  %v10785_v45 = vld [vmem:[#allocation8 + $0x604] ss:$16 sps:$4 sm:$0xff]  }
 0x2de   :  { %6344 = vmatpush1.bf16.msra.mxu0 %v10717_v20  ;;  %6570 = vmatpush1.bf16.msra.mxu1 %v10720_v60  ;;  %v12823_v20 = vld [vmem:[#allocation36_spill] sm:$0xff] }
 0x2df   :  { %6345 = vmatprep.subr.bf16.mxu0 %v10725_v19  ;;  %6571 = vmatprep.subr.bf16.mxu1 %v10728_v53  ;;  %v12824_v60 = vld [vmem:[#allocation40_spill] sm:$0xff]  ;;  %v10777_v19 = vld [vmem:[#allocation8 + $0x5e0] ss:$16 sps:$4 sm:$0xff]  }
 0x2e0   :  { %v10780_v53 = vld [vmem:[#allocation8 + $0x5e8] ss:$16 sps:$4 sm:$0xff]  }
 0x2e1   :  { %5401 = vmatmul.mubr.bf16.gmra.mrb[44].mxu0 %v12815_v13  ;;  %5514 = vmatmul.mubr.bf16.gmra.mrb[44].mxu1 %v12815_v13  ;;  %v12825_v13 = vld [vmem:[#allocation38_spill] sm:$0xff] }
 0x2e2   :  { %6346 = vmatpush1.bf16.msra.mxu0 %v10723_v46  ;;  %6572 = vmatpush1.bf16.msra.mxu1 %v10726_v0  ;;  %v10788_v46 = vld [vmem:[#allocation8 + $0x60c] ss:$16 sps:$4 sm:$0xff]   ;;  %v10783_v0 = vld [vmem:[#allocation8 + $0x600] ss:$16 sps:$4 sm:$0xff]  }
 0x2e3   :  { %6347 = vmatprep.subr.bf16.mxu0 %v10731_v49  ;;  %6573 = vmatprep.subr.bf16.mxu1 %v10734_v30  ;;  %v10786_v49 = vld [vmem:[#allocation8 + $0x608] ss:$16 sps:$4 sm:$0xff]   ;;  %v10791_v30 = vld [vmem:[#allocation8 + $0x624] ss:$16 sps:$4 sm:$0xff]  }
 0x2e4   :  { %5410 = vmatprep.mubr.bf16.mxu0 %v12816_v23  ;;  %5523 = vmatprep.mubr.bf16.mxu1 %v12816_v23  ;;  %v10797_v23 = vld [vmem:[#allocation8 + $0x644] ss:$16 sps:$4 sm:$0xff]  }
 0x2e6   :  { %6348 = vmatpush1.bf16.msra.mxu0 %v10729_v8  ;;  %6574 = vmatpush1.bf16.msra.mxu1 %v10732_v56  ;;  %v10794_v8 = vld [vmem:[#allocation8 + $0x62c] ss:$16 sps:$4 sm:$0xff]  }
 0x2e7   :  { %6349 = vmatprep.subr.bf16.mxu0 %v10737_v21  ;;  %6575 = vmatprep.subr.bf16.mxu1 %v10740_v63  ;;  %v12826_v56 = vld [vmem:[#allocation44_spill] sm:$0xff]  ;;  %v10789_v21 = vld [vmem:[#allocation8 + $0x620] ss:$16 sps:$4 sm:$0xff]  }
 0x2e8   :  { %v10792_v63 = vld [vmem:[#allocation8 + $0x628] ss:$16 sps:$4 sm:$0xff]  }
 0x2e9   :  { %5411 = vmatmul.mubr.bf16.gmra.mrb[48].mxu0 %v12817_v17  ;;  %5524 = vmatmul.mubr.bf16.gmra.mrb[48].mxu1 %v12817_v17  ;;  %v12827_v17 = vld [vmem:[#allocation42_spill] sm:$0xff] }
 0x2ea   :  { %6350 = vmatpush1.bf16.msra.mxu0 %v10735_v57  ;;  %6576 = vmatpush1.bf16.msra.mxu1 %v10738_v29  ;;  %v10800_v57 = vld [vmem:[#allocation8 + $0x64c] ss:$16 sps:$4 sm:$0xff]   ;;  %v10795_v29 = vld [vmem:[#allocation8 + $0x640] ss:$16 sps:$4 sm:$0xff]  }
 0x2eb   :  { %6351 = vmatprep.subr.bf16.mxu0 %v10743_v24  ;;  %6577 = vmatprep.subr.bf16.mxu1 %v10746_v47  ;;  %v10798_v24 = vld [vmem:[#allocation8 + $0x648] ss:$16 sps:$4 sm:$0xff]   ;;  %v10803_v47 = vld [vmem:[#allocation8 + $0x664] ss:$16 sps:$4 sm:$0xff]  }
 0x2ec   :  { %5420 = vmatprep.mubr.bf16.mxu0 %v12818_v4  ;;  %5533 = vmatprep.mubr.bf16.mxu1 %v12818_v4  ;;  %v10809_v4 = vld [vmem:[#allocation8 + $0x684] ss:$16 sps:$4 sm:$0xff]  }
 0x2ee   :  { %6352 = vmatpush1.bf16.msra.mxu0 %v10741_v26  ;;  %6578 = vmatpush1.bf16.msra.mxu1 %v10744_v42  ;;  %v10806_v26 = vld [vmem:[#allocation8 + $0x66c] ss:$16 sps:$4 sm:$0xff]  }
 0x2ef   :  { %6353 = vmatprep.subr.bf16.mxu0 %v10749_v31  ;;  %6579 = vmatprep.subr.bf16.mxu1 %v10752_v58  ;;  %v12828_v42 = vld [vmem:[#allocation48_spill] sm:$0xff]  ;;  %v10801_v31 = vld [vmem:[#allocation8 + $0x660] ss:$16 sps:$4 sm:$0xff]  }
 0x2f0   :  { %v10804_v58 = vld [vmem:[#allocation8 + $0x668] ss:$16 sps:$4 sm:$0xff]  }
 0x2f1   :  { %5421 = vmatmul.mubr.bf16.gmra.mrb[52].mxu0 %v12819_v28  ;;  %5534 = vmatmul.mubr.bf16.gmra.mrb[52].mxu1 %v12819_v28  ;;  %v12829_v28 = vld [vmem:[#allocation46_spill] sm:$0xff] }
 0x2f2   :  { %6354 = vmatpush1.bf16.msra.mxu0 %v10747_v7  ;;  %6580 = vmatpush1.bf16.msra.mxu1 %v10750_v15  ;;  %v10812_v7 = vld [vmem:[#allocation8 + $0x68c] ss:$16 sps:$4 sm:$0xff]   ;;  %v10807_v15 = vld [vmem:[#allocation8 + $0x680] ss:$16 sps:$4 sm:$0xff]  }
 0x2f3   :  { %6355 = vmatprep.subr.bf16.mxu0 %v10755_v43  ;;  %6581 = vmatprep.subr.bf16.mxu1 %v10758_v34  ;;  %v10810_v43 = vld [vmem:[#allocation8 + $0x688] ss:$16 sps:$4 sm:$0xff]   ;;  %v10815_v34 = vld [vmem:[#allocation8 + $0x6a4] ss:$16 sps:$4 sm:$0xff]  }
 0x2f4   :  { %5430 = vmatprep.mubr.bf16.mxu0 %v12820_v36  ;;  %5543 = vmatprep.mubr.bf16.mxu1 %v12820_v36  ;;  %v10821_v36 = vld [vmem:[#allocation8 + $0x6c4] ss:$16 sps:$4 sm:$0xff]  }
 0x2f6   :  { %6356 = vmatpush1.bf16.msra.mxu0 %v10753_v9  ;;  %6582 = vmatpush1.bf16.msra.mxu1 %v10756_v52  ;;  %v10818_v9 = vld [vmem:[#allocation8 + $0x6ac] ss:$16 sps:$4 sm:$0xff]  }
 0x2f7   :  { %6357 = vmatprep.subr.bf16.mxu0 %v10761_v32  ;;  %6583 = vmatprep.subr.bf16.mxu1 %v10764_v33  ;;  %v12830_v52 = vld [vmem:[#allocation52_spill] sm:$0xff]  ;;  %v10813_v32 = vld [vmem:[#allocation8 + $0x6a0] ss:$16 sps:$4 sm:$0xff]  }
 0x2f8   :  { %v10816_v33 = vld [vmem:[#allocation8 + $0x6a8] ss:$16 sps:$4 sm:$0xff]  }
 0x2f9   :  { %5431 = vmatmul.mubr.bf16.gmra.mrb[56].mxu0 %v12821_v27  ;;  %5544 = vmatmul.mubr.bf16.gmra.mrb[56].mxu1 %v12821_v27  ;;  %v12831_v27 = vld [vmem:[#allocation50_spill] sm:$0xff] }
 0x2fa   :  { %6358 = vmatpush1.bf16.msra.mxu0 %v10759_v12  ;;  %6584 = vmatpush1.bf16.msra.mxu1 %v10762_v1  ;;  %v10824_v12 = vld [vmem:[#allocation8 + $0x6cc] ss:$16 sps:$4 sm:$0xff]   ;;  %v10819_v1 = vld [vmem:[#allocation8 + $0x6c0] ss:$16 sps:$4 sm:$0xff]  }
 0x2fb   :  { %6359 = vmatprep.subr.bf16.mxu0 %v10767_v16  ;;  %6585 = vmatprep.subr.bf16.mxu1 %v10770_v25  ;;  %v10822_v16 = vld [vmem:[#allocation8 + $0x6c8] ss:$16 sps:$4 sm:$0xff]   ;;  %v10827_v25 = vld [vmem:[#allocation8 + $0x6e4] ss:$16 sps:$4 sm:$0xff]  }
 0x2fc   :  { %5440 = vmatprep.mubr.bf16.mxu0 %v12822_v11  ;;  %5553 = vmatprep.mubr.bf16.mxu1 %v12822_v11  ;;  %v10836_v11 = vld [vmem:[#allocation8 + $0x70c] ss:$16 sps:$4 sm:$0xff]  }
 0x2fe   :  { %6360 = vmatpush1.bf16.msra.mxu0 %v10765_v48  ;;  %6586 = vmatpush1.bf16.msra.mxu1 %v10768_v22  ;;  %v10830_v48 = vld [vmem:[#allocation8 + $0x6ec] ss:$16 sps:$4 sm:$0xff]   ;;  %v10825_v22 = vld [vmem:[#allocation8 + $0x6e0] ss:$16 sps:$4 sm:$0xff]  }
 0x2ff   :  { %6361 = vmatprep.subr.bf16.mxu0 %v10773_v39  ;;  %6587 = vmatprep.subr.bf16.mxu1 %v10776_v37  ;;  %v10828_v39 = vld [vmem:[#allocation8 + $0x6e8] ss:$16 sps:$4 sm:$0xff]   ;;  %v10833_v37 = vld [vmem:[#allocation8 + $0x704] ss:$16 sps:$4 sm:$0xff]  }
 0x301   :  { %5441 = vmatmul.mubr.bf16.gmra.mrb[60].mxu0 %v12823_v20  ;;  %5554 = vmatmul.mubr.bf16.gmra.mrb[60].mxu1 %v12823_v20  ;;  %v10842_v20 = vld [vmem:[#allocation8 + $0x72c] ss:$16 sps:$4 sm:$0xff]  }
 0x302   :  { %6362 = vmatpush1.bf16.msra.mxu0 %v10771_v54  ;;  %6365 = vmatprep.mubr.bf16.mxu0 %v12824_v60  ;;  %v10831_v54 = vld [vmem:[#allocation8 + $0x700] ss:$16 sps:$4 sm:$0xff]  }
 0x303   :  { %6588 = vmatpush1.bf16.msra.mxu1 %v10774_v44  ;;  %6591 = vmatprep.mubr.bf16.mxu1 %v12824_v60  ;;  %v10834_v44 = vld [vmem:[#allocation8 + $0x708] ss:$16 sps:$4 sm:$0xff]  }
 0x304   :  { %6363 = vmatprep.subr.bf16.mxu0 %v10779_v62  ;;  %6589 = vmatprep.subr.bf16.mxu1 %v10782_v35  ;;  %v10839_v62 = vld [vmem:[#allocation8 + $0x724] ss:$16 sps:$4 sm:$0xff]   ;;  %v12832_v35 = vld [vmem:[#allocation54_spill] sm:$0xff] }
 0x305   :  { %v10840_v60 = vld [vmem:[#allocation8 + $0x728] ss:$16 sps:$4 sm:$0xff]  }
 0x306   :  { %6364 = vmatpush1.bf16.msra.mxu0 %v10777_v19  ;;  %v10845_v19 = vld [vmem:[#allocation8 + $0x744] ss:$16 sps:$4 sm:$0xff]  }
 0x307   :  { %6590 = vmatpush1.bf16.msra.mxu1 %v10780_v53  ;;  %6446 = vmatprep.subr.bf16.mxu0 %v10785_v45  ;;  %v10848_v53 = vld [vmem:[#allocation8 + $0x74c] ss:$16 sps:$4 sm:$0xff]   ;;  %v10843_v45 = vld [vmem:[#allocation8 + $0x740] ss:$16 sps:$4 sm:$0xff]  }
 0x308   :  { %6672 = vmatprep.subr.bf16.mxu1 %v10788_v46  ;;  %v10846_v46 = vld [vmem:[#allocation8 + $0x748] ss:$16 sps:$4 sm:$0xff]  }
 0x309   :  { %6366 = vmatmul.mubr.bf16.vlgmr.msra.gmra.mrb[32].mxu0 %v12825_v13 }
 0x30a   :  { %6592 = vmatmul.mubr.bf16.vlgmr.msra.gmra.mrb[32].mxu1 %v12825_v13  ;;  %6375 = vmatprep.mubr.bf16.mxu0 %v12826_v56  ;;  %v10857_v13 = vld [vmem:[#allocation8 + $0x784] ss:$16 sps:$4 sm:$0xff]  }
 0x30b   :  { %6447 = vmatpush1.bf16.msra.mxu0 %v10783_v0  ;;  %6601 = vmatprep.mubr.bf16.mxu1 %v12826_v56  ;;  %v10851_v0 = vld [vmem:[#allocation8 + $0x764] ss:$16 sps:$4 sm:$0xff]   ;;  %v10855_v56 = vld [vmem:[#allocation8 + $0x780] ss:$16 sps:$4 sm:$0xff]  }
 0x30c   :  { %6673 = vmatpush1.bf16.msra.mxu1 %v10786_v49  ;;  %6448 = vmatprep.subr.bf16.mxu0 %v10791_v30  ;;  %v10854_v49 = vld [vmem:[#allocation8 + $0x76c] ss:$16 sps:$4 sm:$0xff]   ;;  %v10852_v30 = vld [vmem:[#allocation8 + $0x768] ss:$16 sps:$4 sm:$0xff]  }
 0x30d   :  { %6674 = vmatprep.subr.bf16.mxu1 %v10794_v8  ;;  %v10860_v8 = vld [vmem:[#allocation8 + $0x78c] ss:$16 sps:$4 sm:$0xff]  }
 0x30f   :  { %6449 = vmatpush1.bf16.msra.mxu0 %v10789_v21  ;;  %v10858_v21 = vld [vmem:[#allocation8 + $0x788] ss:$16 sps:$4 sm:$0xff]  }
 0x310   :  { %6675 = vmatpush1.bf16.msra.mxu1 %v10792_v63  ;;  %6450 = vmatprep.subr.bf16.mxu0 %v10797_v23  ;;  %v10863_v63 = vld [vmem:[#allocation8 + $0x7a4] ss:$16 sps:$4 sm:$0xff]   ;;  %v10864_v23 = vld [vmem:[#allocation8 + $0x7a8] ss:$16 sps:$4 sm:$0xff]  }
 0x311   :  { %6376 = vmatmul.mubr.bf16.gmra.mrb[36].mxu0 %v12827_v17  ;;  %6676 = vmatprep.subr.bf16.mxu1 %v10800_v57  ;;  %v10869_v57 = vld [vmem:[#allocation8 + $0x7c4] ss:$16 sps:$4 sm:$0xff]  }
 0x312   :  { %6602 = vmatmul.mubr.bf16.gmra.mrb[36].mxu1 %v12827_v17  ;;  %6385 = vmatprep.mubr.bf16.mxu0 %v12828_v42  ;;  %v10875_v17 = vld [vmem:[#allocation8 + $0x7e4] ss:$16 sps:$4 sm:$0xff]  }
 0x313   :  { %6451 = vmatpush1.bf16.msra.mxu0 %v10795_v29  ;;  %6611 = vmatprep.mubr.bf16.mxu1 %v12828_v42  ;;  %v10872_v29 = vld [vmem:[#allocation8 + $0x7cc] ss:$16 sps:$4 sm:$0xff]   ;;  %v10876_v42 = vld [vmem:[#allocation8 + $0x7e8] ss:$16 sps:$4 sm:$0xff]  }
 0x314   :  { %6677 = vmatpush1.bf16.msra.mxu1 %v10798_v24  ;;  %6452 = vmatprep.subr.bf16.mxu0 %v10803_v47  ;;  %v10867_v24 = vld [vmem:[#allocation8 + $0x7c0] ss:$16 sps:$4 sm:$0xff]   ;;  %v10870_v47 = vld [vmem:[#allocation8 + $0x7c8] ss:$16 sps:$4 sm:$0xff]  }
 0x315   :  { %6678 = vmatprep.subr.bf16.mxu1 %v10806_v26  ;;  %v10873_v26 = vld [vmem:[#allocation8 + $0x7e0] ss:$16 sps:$4 sm:$0xff]  }
 0x317   :  { %6453 = vmatpush1.bf16.msra.mxu0 %v10801_v31  ;;  %v10881_v31 = vld [vmem:[#allocation8 + $0x804] ss:$16 sps:$4 sm:$0xff]  }
 0x318   :  { %6679 = vmatpush1.bf16.msra.mxu1 %v10804_v58  ;;  %6454 = vmatprep.subr.bf16.mxu0 %v10809_v4  ;;  %v10884_v58 = vld [vmem:[#allocation8 + $0x80c] ss:$16 sps:$4 sm:$0xff]   ;;  %v10879_v4 = vld [vmem:[#allocation8 + $0x800] ss:$16 sps:$4 sm:$0xff]  }
 0x319   :  { %6386 = vmatmul.mubr.bf16.gmra.mrb[40].mxu0 %v12829_v28  ;;  %6680 = vmatprep.subr.bf16.mxu1 %v10812_v7  ;;  %v10882_v7 = vld [vmem:[#allocation8 + $0x808] ss:$16 sps:$4 sm:$0xff]  }
 0x31a   :  { %6612 = vmatmul.mubr.bf16.gmra.mrb[40].mxu1 %v12829_v28  ;;  %6395 = vmatprep.mubr.bf16.mxu0 %v12830_v52  ;;  %v10885_v28 = vld [vmem:[#allocation8 + $0x820] ss:$16 sps:$4 sm:$0xff]  }
 0x31b   :  { %6455 = vmatpush1.bf16.msra.mxu0 %v10807_v15  ;;  %6621 = vmatprep.mubr.bf16.mxu1 %v12830_v52  ;;  %v10887_v15 = vld [vmem:[#allocation8 + $0x824] ss:$16 sps:$4 sm:$0xff]  }
 0x31c   :  { %6681 = vmatpush1.bf16.msra.mxu1 %v10810_v43  ;;  %6456 = vmatprep.subr.bf16.mxu0 %v10815_v34  ;;  %v10890_v43 = vld [vmem:[#allocation8 + $0x82c] ss:$16 sps:$4 sm:$0xff]   ;;  %v12835_v34 = vld [vmem:[#allocation45_spill] sm:$0xff] }
 0x31d   :  { %6682 = vmatprep.subr.bf16.mxu1 %v10818_v9  ;;  %v10888_v9 = vld [vmem:[#allocation8 + $0x828] ss:$16 sps:$4 sm:$0xff]   ;;  %v10893_v52 = vld [vmem:[#allocation8 + $0x844] ss:$16 sps:$4 sm:$0xff]  }
 0x31f   :  { %6457 = vmatpush1.bf16.msra.mxu0 %v10813_v32  ;;  %v10896_v32 = vld [vmem:[#allocation8 + $0x84c] ss:$16 sps:$4 sm:$0xff]  }
 0x320   :  { %6683 = vmatpush1.bf16.msra.mxu1 %v10816_v33  ;;  %6458 = vmatprep.subr.bf16.mxu0 %v10821_v36  ;;  %v10891_v33 = vld [vmem:[#allocation8 + $0x840] ss:$16 sps:$4 sm:$0xff]   ;;  %v10894_v36 = vld [vmem:[#allocation8 + $0x848] ss:$16 sps:$4 sm:$0xff]  }
 0x321   :  { %6396 = vmatmul.mubr.bf16.gmra.mrb[44].mxu0 %v12831_v27  ;;  %6684 = vmatprep.subr.bf16.mxu1 %v10824_v12  ;;  %v10899_v12 = vld [vmem:[#allocation8 + $0x864] ss:$16 sps:$4 sm:$0xff]  }
 0x322   :  { %6622 = vmatmul.mubr.bf16.gmra.mrb[44].mxu1 %v12831_v27  ;;  %6405 = vmatprep.mubr.bf16.mxu0 %v12204_v50  ;;  %v10897_v27 = vld [vmem:[#allocation8 + $0x860] ss:$16 sps:$4 sm:$0xff]  }
 0x323   :  { %6459 = vmatpush1.bf16.msra.mxu0 %v10819_v1  ;;  %6631 = vmatprep.mubr.bf16.mxu1 %v12204_v50  ;;  %v10837_v50 = vld [vmem:[#allocation8 + $0x720] ss:$16 sps:$4 sm:$0xff]  }
 0x324   :  { %6685 = vmatpush1.bf16.msra.mxu1 %v10822_v16  ;;  %6460 = vmatprep.subr.bf16.mxu0 %v10827_v25  ;;  %v12836_v1 = vld [vmem:[#allocation43_spill] sm:$0xff]  ;;  %v10902_v16 = vld [vmem:[#allocation8 + $0x86c] ss:$16 sps:$4 sm:$0xff]   ;;  %v12837_v25 = vld [vmem:[#allocation49_spill] sm:$0xff] }
 0x325   :  { %6686 = vmatprep.subr.bf16.mxu1 %v10830_v48  ;;  %v10900_v48 = vld [vmem:[#allocation8 + $0x868] ss:$16 sps:$4 sm:$0xff]  }
 0x327   :  { %6461 = vmatpush1.bf16.msra.mxu0 %v10825_v22  ;;  %v10905_v22 = vld [vmem:[#allocation8 + $0x884] ss:$16 sps:$4 sm:$0xff]  }
 0x328   :  { %6687 = vmatpush1.bf16.msra.mxu1 %v10828_v39  ;;  %6462 = vmatprep.subr.bf16.mxu0 %v10833_v37  ;;  %v10908_v39 = vld [vmem:[#allocation8 + $0x88c] ss:$16 sps:$4 sm:$0xff]   ;;  %v10903_v37 = vld [vmem:[#allocation8 + $0x880] ss:$16 sps:$4 sm:$0xff]  }
 0x329   :  { %6406 = vmatmul.mubr.bf16.gmra.mrb[48].mxu0 %v12832_v35  ;;  %6688 = vmatprep.subr.bf16.mxu1 %v10836_v11  ;;  %v10906_v11 = vld [vmem:[#allocation8 + $0x888] ss:$16 sps:$4 sm:$0xff]  }
 0x32a   :  { %6632 = vmatmul.mubr.bf16.gmra.mrb[48].mxu1 %v12832_v35  ;;  %6415 = vmatprep.mubr.bf16.mxu0 %v12280_v5  ;;  %v12839_v35 = vld [vmem:[#allocation53_spill] sm:$0xff] }
 0x32b   :  { %6463 = vmatpush1.bf16.msra.mxu0 %v10831_v54  ;;  %6641 = vmatprep.mubr.bf16.mxu1 %v12280_v5  ;;  %v10849_v5 = vld [vmem:[#allocation8 + $0x760] ss:$16 sps:$4 sm:$0xff]   ;;  %v10911_v54 = vld [vmem:[#allocation8 + $0x8a4] ss:$16 sps:$4 sm:$0xff]  }
 0x32c   :  { %6689 = vmatpush1.bf16.msra.mxu1 %v10834_v44  ;;  %6464 = vmatprep.subr.bf16.mxu0 %v10839_v62  ;;  %v12838_v44 = vld [vmem:[#allocation47_spill] sm:$0xff]  ;;  %v10914_v62 = vld [vmem:[#allocation8 + $0x8ac] ss:$16 sps:$4 sm:$0xff]  }
 0x32d   :  { %6690 = vmatprep.subr.bf16.mxu1 %v10842_v20  ;;  %v10909_v20 = vld [vmem:[#allocation8 + $0x8a0] ss:$16 sps:$4 sm:$0xff]  }
 0x32f   :  { %6465 = vmatpush1.bf16.msra.mxu0 %v10837_v50  ;;  %v10912_v50 = vld [vmem:[#allocation8 + $0x8a8] ss:$16 sps:$4 sm:$0xff]  }
 0x330   :  { %6691 = vmatpush1.bf16.msra.mxu1 %v10840_v60  ;;  %6466 = vmatprep.subr.bf16.mxu0 %v10845_v19  ;;  %v10917_v60 = vld [vmem:[#allocation8 + $0x8c4] ss:$16 sps:$4 sm:$0xff]   ;;  %v10920_v19 = vld [vmem:[#allocation8 + $0x8cc] ss:$16 sps:$4 sm:$0xff]  }
 0x331   :  { %6416 = vmatmul.mubr.bf16.gmra.mrb[52].mxu0 %v12248_v55  ;;  %6692 = vmatprep.subr.bf16.mxu1 %v10848_v53  ;;  %v10915_v53 = vld [vmem:[#allocation8 + $0x8c0] ss:$16 sps:$4 sm:$0xff]  }
 0x332   :  { %6642 = vmatmul.mubr.bf16.gmra.mrb[52].mxu1 %v12248_v55  ;;  %6425 = vmatprep.mubr.bf16.mxu0 %v12329_v10  ;;  %v10866_v55 = vld [vmem:[#allocation8 + $0x7ac] ss:$16 sps:$4 sm:$0xff]  }
 0x333   :  { %6467 = vmatpush1.bf16.msra.mxu0 %v10843_v45  ;;  %6651 = vmatprep.mubr.bf16.mxu1 %v12329_v10  ;;  %v10861_v10 = vld [vmem:[#allocation8 + $0x7a0] ss:$16 sps:$4 sm:$0xff]   ;;  %v10918_v45 = vld [vmem:[#allocation8 + $0x8c8] ss:$16 sps:$4 sm:$0xff]  }
 0x334   :  { %6693 = vmatpush1.bf16.msra.mxu1 %v10846_v46  ;;  %6468 = vmatprep.subr.bf16.mxu0 %v10851_v0  ;;  %v10923_v46 = vld [vmem:[#allocation8 + $0x8e4] ss:$16 sps:$4 sm:$0xff]  }
 0x335   :  { %6694 = vmatprep.subr.bf16.mxu1 %v10854_v49  ;;  %v12840_v0 = vld [vmem:[#allocation51_spill] sm:$0xff]  ;;  %v10926_v49 = vld [vmem:[#allocation8 + $0x8ec] ss:$16 sps:$4 sm:$0xff]  }
 0x337   :  { %6469 = vmatpush1.bf16.msra.mxu0 %v10849_v5  ;;  %v10921_v5 = vld [vmem:[#allocation8 + $0x8e0] ss:$16 sps:$4 sm:$0xff]  }
 0x338   :  { %6695 = vmatpush1.bf16.msra.mxu1 %v10852_v30  ;;  %6470 = vmatprep.subr.bf16.mxu0 %v10857_v13  ;;  %v10924_v30 = vld [vmem:[#allocation8 + $0x8e8] ss:$16 sps:$4 sm:$0xff]   ;;  %v10929_v13 = vld [vmem:[#allocation8 + $0x904] ss:$16 sps:$4 sm:$0xff]  }
 0x339   :  { %6426 = vmatmul.mubr.bf16.gmra.mrb[56].mxu0 %v12304_v41  ;;  %6696 = vmatprep.subr.bf16.mxu1 %v10860_v8  ;;  %v10932_v8 = vld [vmem:[#allocation8 + $0x90c] ss:$16 sps:$4 sm:$0xff]  }
 0x33a   :  { %6652 = vmatmul.mubr.bf16.gmra.mrb[56].mxu1 %v12304_v41  ;;  %6435 = vmatprep.mubr.bf16.mxu0 %v12386_v18  ;;  %v10878_v41 = vld [vmem:[#allocation8 + $0x7ec] ss:$16 sps:$4 sm:$0xff]  }
 0x33b   :  { %6471 = vmatpush1.bf16.msra.mxu0 %v10855_v56  ;;  %6661 = vmatprep.mubr.bf16.mxu1 %v12386_v18  ;;  %v12833_v18 = vld [vmem:[#allocation41_spill] sm:$0xff] }
 0x33c   :  { %6697 = vmatpush1.bf16.msra.mxu1 %v10858_v21  ;;  %6472 = vmatprep.subr.bf16.mxu0 %v10863_v63  ;;  %v10927_v56 = vld [vmem:[#allocation8 + $0x900] ss:$16 sps:$4 sm:$0xff]   ;;  %v10930_v21 = vld [vmem:[#allocation8 + $0x908] ss:$16 sps:$4 sm:$0xff]   ;;  %v10935_v63 = vld [vmem:[#allocation8 + $0x924] ss:$16 sps:$4 sm:$0xff]  }
 0x33d   :  { %6698 = vmatprep.subr.bf16.mxu1 %v10866_v55  ;;  %v10938_v55 = vld [vmem:[#allocation8 + $0x92c] ss:$16 sps:$4 sm:$0xff]  }
 0x33f   :  { %6473 = vmatpush1.bf16.msra.mxu0 %v10861_v10  ;;  %v10936_v10 = vld [vmem:[#allocation8 + $0x928] ss:$16 sps:$4 sm:$0xff]  }
 0x340   :  { %6699 = vmatpush1.bf16.msra.mxu1 %v10864_v23  ;;  %6474 = vmatprep.subr.bf16.mxu0 %v10869_v57  ;;  %v10941_v23 = vld [vmem:[#allocation8 + $0x944] ss:$16 sps:$4 sm:$0xff]   ;;  %v10944_v57 = vld [vmem:[#allocation8 + $0x94c] ss:$16 sps:$4 sm:$0xff]  }
 0x341   :  { %6436 = vmatmul.mubr.bf16.gmra.mrb[60].mxu0 %v12378_v61  ;;  %6700 = vmatprep.subr.bf16.mxu1 %v10872_v29  ;;  %v10939_v29 = vld [vmem:[#allocation8 + $0x940] ss:$16 sps:$4 sm:$0xff]  }
 0x342   :  { %6662 = vmatmul.mubr.bf16.gmra.mrb[60].mxu1 %v12378_v61  ;;  %6478 = vmatprep.mubr.bf16.mxu0 %v12833_v18  ;;  %v12834_v61 = vld [vmem:[#allocation39_spill] sm:$0xff] }
 0x343   :  { %6475 = vmatpush1.bf16.msra.mxu0 %v10867_v24  ;;  %6704 = vmatprep.mubr.bf16.mxu1 %v12833_v18  ;;  %v10942_v24 = vld [vmem:[#allocation8 + $0x948] ss:$16 sps:$4 sm:$0xff]   ;;  %v10956_v18 = vld [vmem:[#allocation8 + $0x98c] ss:$16 sps:$4 sm:$0xff]  }
 0x344   :  { %6701 = vmatpush1.bf16.msra.mxu1 %v10870_v47  ;;  %6476 = vmatprep.subr.bf16.mxu0 %v10875_v17  ;;  %v10947_v47 = vld [vmem:[#allocation8 + $0x964] ss:$16 sps:$4 sm:$0xff]   ;;  %v10948_v17 = vld [vmem:[#allocation8 + $0x968] ss:$16 sps:$4 sm:$0xff]  }
 0x345   :  { %6702 = vmatprep.subr.bf16.mxu1 %v10878_v41  ;;  %v10953_v41 = vld [vmem:[#allocation8 + $0x984] ss:$16 sps:$4 sm:$0xff]  }
 0x347   :  { %6477 = vmatpush1.bf16.msra.mxu0 %v10873_v26  ;;  %v3400_v26 = vld [vmem:[#allocation2 + $0x20] sm:$0x11] }
 0x348   :  { %6703 = vmatpush1.bf16.msra.mxu1 %v10876_v42  ;;  %7746 = vmatprep.subr.bf16.mxu0 %v10881_v31  ;;  %v11071_v42 = vld [vmem:[#allocation2 + $0x10] sm:$0xff] }
 0x349   :  { %7972 = vmatprep.subr.bf16.mxu1 %v10884_v58  ;;  %v3480_v31 = vrot.slane %v11071_v42, 5  ;;  %v10951_v58 = vld [vmem:[#allocation8 + $0x980] ss:$16 sps:$4 sm:$0xff]  }
 0x34a   :  { %6479 = vmatmul.mubr.bf16.vlgmr.msra.gmra.mrb[32].mxu0 %v12834_v61 }
 0x34b   :  { %6705 = vmatmul.mubr.bf16.vlgmr.msra.gmra.mrb[32].mxu1 %v12834_v61  ;;  %6488 = vmatprep.mubr.bf16.mxu0 %v12835_v34  ;;  %v10957_v61 = vld [vmem:[#allocation8 + $0x9a0] ss:$16 sps:$4 sm:$0xff]  }
 0x34c   :  { %6714 = vmatprep.mubr.bf16.mxu1 %v12835_v34  ;;  %7747 = vmatpush1.bf16.msra.mxu0 %v10879_v4  ;;  %v10959_v4 = vld [vmem:[#allocation8 + $0x9a4] ss:$16 sps:$4 sm:$0xff]   ;;  %v3486_v34 = vrot.slane %v3480_v31, 4 }
 0x34d   :  { %7973 = vmatpush1.bf16.msra.mxu1 %v10882_v7  ;;  %7748 = vmatprep.subr.bf16.mxu0 %v10887_v15  ;;  %v3398_v7 = vld [vmem:[#allocation2] sm:$0xee]  ;;  %v3487_v15 = vrot.slane %v3400_v26, 5  ;;  %v10998_v26 = vld [vmem:[#allocation8 + $0xa6c] ss:$16 sps:$4 sm:$0xff]  }
 0x34e   :  { %7974 = vmatprep.subr.bf16.mxu1 %v10890_v43  ;;  %v8936_v43 = vrot.slane %v3398_v7, 9  ;;  %v11001_v7 = vld [vmem:[#allocation8 + $0xa84] ss:$16 sps:$4 sm:$0xff]  }
 0x350   :  { %7749 = vmatpush1.bf16.msra.mxu0 %v10885_v28  ;;  %v10960_v28 = vld [vmem:[#allocation8 + $0x9a8] ss:$16 sps:$4 sm:$0xff]  }
 0x351   :  { %7975 = vmatpush1.bf16.msra.mxu1 %v10888_v9  ;;  %7750 = vmatprep.subr.bf16.mxu0 %v10893_v52  ;;  %v10965_v9 = vld [vmem:[#allocation8 + $0x9c4] ss:$16 sps:$4 sm:$0xff]   ;;  %v10968_v52 = vld [vmem:[#allocation8 + $0x9cc] ss:$16 sps:$4 sm:$0xff]  }
 0x352   :  { %6489 = vmatmul.mubr.bf16.gmra.mrb[36].mxu0 %v12836_v1  ;;  %7976 = vmatprep.subr.bf16.mxu1 %v10896_v32 }
 0x353   :  { %6715 = vmatmul.mubr.bf16.gmra.mrb[36].mxu1 %v12836_v1  ;;  %6498 = vmatprep.mubr.bf16.mxu0 %v12837_v25 }
 0x354   :  { %6724 = vmatprep.mubr.bf16.mxu1 %v12837_v25  ;;  %7751 = vmatpush1.bf16.msra.mxu0 %v10891_v33  ;;  %v3488_v33 = vsel %vm11485_vm5, %v3486_v34, %v3487_v15 }
 0x355   :  { %7977 = vmatpush1.bf16.msra.mxu1 %v10894_v36  ;;  %7752 = vmatprep.subr.bf16.mxu0 %v10899_v12  ;;  %v10963_v36 = vld [vmem:[#allocation8 + $0x9c0] ss:$16 sps:$4 sm:$0xff]  }
 0x356   :  { %7978 = vmatprep.subr.bf16.mxu1 %v10902_v16  ;;  %v3404_v12 = vld [vmem:[#allocation2 + $0x50] sm:$0x11]  ;;  %v10966_v16 = vld [vmem:[#allocation8 + $0x9c8] ss:$16 sps:$4 sm:$0xff]  }
 0x358   :  { %7753 = vmatpush1.bf16.msra.mxu0 %v10897_v27  ;;  %v10971_v27 = vld [vmem:[#allocation8 + $0x9e4] ss:$16 sps:$4 sm:$0xff]  }
 0x359   :  { %7979 = vmatpush1.bf16.msra.mxu1 %v10900_v48  ;;  %7754 = vmatprep.subr.bf16.mxu0 %v10905_v22  ;;  %v10974_v48 = vld [vmem:[#allocation8 + $0x9ec] ss:$16 sps:$4 sm:$0xff]   ;;  %v3402_v22 = vld [vmem:[#allocation2 + $0x30] sm:$0xee] }
 0x35a   :  { %6499 = vmatmul.mubr.bf16.gmra.mrb[40].mxu0 %v12838_v44  ;;  %7980 = vmatprep.subr.bf16.mxu1 %v10908_v39  ;;  %v3501_v39 = vrot.slane %v3404_v12, 5  ;;  %v3414_v12 = vld [vmem:[#allocation2 + $0xc0] sm:$0xee] }
 0x35b   :  { %6725 = vmatmul.mubr.bf16.gmra.mrb[40].mxu1 %v12838_v44  ;;  %6508 = vmatprep.mubr.bf16.mxu0 %v12839_v35  ;;  %v8938_v44 = vrot.slane %v3402_v22, 9  ;;  %v11013_v22 = vld [vmem:[#allocation8 + $0xac4] ss:$16 sps:$4 sm:$0xff]  }
 0x35c   :  { %6734 = vmatprep.mubr.bf16.mxu1 %v12839_v35  ;;  %7755 = vmatpush1.bf16.msra.mxu0 %v10903_v37  ;;  %v10969_v37 = vld [vmem:[#allocation8 + $0x9e0] ss:$16 sps:$4 sm:$0xff]   ;;  %v10980_v35 = vld [vmem:[#allocation8 + $0xa0c] ss:$16 sps:$4 sm:$0xff]  }
 0x35d   :  { %7981 = vmatpush1.bf16.msra.mxu1 %v10906_v11  ;;  %7756 = vmatprep.subr.bf16.mxu0 %v10911_v54  ;;  %v10972_v11 = vld [vmem:[#allocation8 + $0x9e8] ss:$16 sps:$4 sm:$0xff]   ;;  %v10977_v54 = vld [vmem:[#allocation8 + $0xa04] ss:$16 sps:$4 sm:$0xff]  }
 0x35e   :  { %7982 = vmatprep.subr.bf16.mxu1 %v10914_v62 }
 0x360   :  { %7757 = vmatpush1.bf16.msra.mxu0 %v10909_v20 }
 0x361   :  { %7983 = vmatpush1.bf16.msra.mxu1 %v10912_v50  ;;  %7758 = vmatprep.subr.bf16.mxu0 %v10917_v60  ;;  %v3408_v50 = vld [vmem:[#allocation2 + $0x80] sm:$0x11]  ;;  %v11073_v60 = vld [vmem:[#allocation2 + $0x70] sm:$0xff] }
 0x362   :  { %6509 = vmatmul.mubr.bf16.gmra.mrb[44].mxu0 %v12840_v0  ;;  %7984 = vmatprep.subr.bf16.mxu1 %v10920_v19 }
 0x363   :  { %6735 = vmatmul.mubr.bf16.gmra.mrb[44].mxu1 %v12840_v0  ;;  %6518 = vmatprep.mubr.bf16.mxu0 %v12206_v38 }
 0x364   :  { %6744 = vmatprep.mubr.bf16.mxu1 %v12206_v38  ;;  %7759 = vmatpush1.bf16.msra.mxu0 %v10915_v53  ;;  %v10933_v38 = vld [vmem:[#allocation8 + $0x920] ss:$16 sps:$4 sm:$0xff]  }
 0x365   :  { %7985 = vmatpush1.bf16.msra.mxu1 %v10918_v45  ;;  %7760 = vmatprep.subr.bf16.mxu0 %v10923_v46  ;;  %v10975_v53 = vld [vmem:[#allocation8 + $0xa00] ss:$16 sps:$4 sm:$0xff]   ;;  %v10978_v46 = vld [vmem:[#allocation8 + $0xa08] ss:$16 sps:$4 sm:$0xff]  }
 0x366   :  { %7986 = vmatprep.subr.bf16.mxu1 %v10926_v49  ;;  %v10983_v49 = vld [vmem:[#allocation8 + $0xa24] ss:$16 sps:$4 sm:$0xff]  }
 0x368   :  { %7761 = vmatpush1.bf16.msra.mxu0 %v10921_v5  ;;  %v3406_v5 = vld [vmem:[#allocation2 + $0x60] sm:$0xee] }
 0x369   :  { %7987 = vmatpush1.bf16.msra.mxu1 %v10924_v30  ;;  %7762 = vmatprep.subr.bf16.mxu0 %v10929_v13  ;;  %v10986_v30 = vld [vmem:[#allocation8 + $0xa2c] ss:$16 sps:$4 sm:$0xff]   ;;  %v3515_v13 = vrot.slane %v3408_v50, 5  ;;  %v11014_v50 = vld [vmem:[#allocation8 + $0xac8] ss:$16 sps:$4 sm:$0xff]  }
 0x36a   :  { %6519 = vmatmul.mubr.bf16.gmra.mrb[48].mxu0 %v12202_v40  ;;  %7988 = vmatprep.subr.bf16.mxu1 %v10932_v8  ;;  %v10981_v8 = vld [vmem:[#allocation8 + $0xa20] ss:$16 sps:$4 sm:$0xff]  }
 0x36b   :  { %6745 = vmatmul.mubr.bf16.gmra.mrb[48].mxu1 %v12202_v40  ;;  %6528 = vmatprep.mubr.bf16.mxu0 %v12282_v51  ;;  %v10950_v40 = vld [vmem:[#allocation8 + $0x96c] ss:$16 sps:$4 sm:$0xff]  }
 0x36c   :  { %6754 = vmatprep.mubr.bf16.mxu1 %v12282_v51  ;;  %7763 = vmatpush1.bf16.msra.mxu0 %v10927_v56  ;;  %v10945_v51 = vld [vmem:[#allocation8 + $0x960] ss:$16 sps:$4 sm:$0xff]   ;;  %v8940_v56 = vrot.slane %v3406_v5, 9  ;;  %v11020_v5 = vld [vmem:[#allocation8 + $0xae8] ss:$16 sps:$4 sm:$0xff]  }
 0x36d   :  { %7989 = vmatpush1.bf16.msra.mxu1 %v10930_v21  ;;  %7764 = vmatprep.subr.bf16.mxu0 %v10935_v63  ;;  %v10984_v63 = vld [vmem:[#allocation8 + $0xa28] ss:$16 sps:$4 sm:$0xff]  }
 0x36e   :  { %7990 = vmatprep.subr.bf16.mxu1 %v10938_v55  ;;  %v10989_v55 = vld [vmem:[#allocation8 + $0xa44] ss:$16 sps:$4 sm:$0xff]  }
 0x370   :  { %7765 = vmatpush1.bf16.msra.mxu0 %v10933_v38  ;;  %v10992_v38 = vld [vmem:[#allocation8 + $0xa4c] ss:$16 sps:$4 sm:$0xff]  }
 0x371   :  { %7991 = vmatpush1.bf16.msra.mxu1 %v10936_v10  ;;  %7766 = vmatprep.subr.bf16.mxu0 %v10941_v23  ;;  %v3412_v23 = vld [vmem:[#allocation2 + $0xb0] sm:$0x11] }
 0x372   :  { %6529 = vmatmul.mubr.bf16.gmra.mrb[52].mxu0 %v12250_v3  ;;  %7992 = vmatprep.subr.bf16.mxu1 %v10944_v57  ;;  %v11074_v57 = vld [vmem:[#allocation2 + $0xa0] sm:$0xff]  ;;  %v3529_v42 = vrot.slane %v3412_v23, 5  ;;  %v11026_v23 = vld [vmem:[#allocation8 + $0xb08] ss:$16 sps:$4 sm:$0xff]  }
 0x373   :  { %6755 = vmatmul.mubr.bf16.gmra.mrb[52].mxu1 %v12250_v3  ;;  %6538 = vmatprep.mubr.bf16.mxu0 %v12331_v2  ;;  %v10954_v3 = vld [vmem:[#allocation8 + $0x988] ss:$16 sps:$4 sm:$0xff]  }
 0x374   :  { %6764 = vmatprep.mubr.bf16.mxu1 %v12331_v2  ;;  %7767 = vmatpush1.bf16.msra.mxu0 %v10939_v29  ;;  %v10962_v2 = vld [vmem:[#allocation8 + $0x9ac] ss:$16 sps:$4 sm:$0xff]   ;;  %v3522_v29 = vrot.slane %v11074_v57, 5 }
 0x375   :  { %7993 = vmatpush1.bf16.msra.mxu1 %v10942_v24  ;;  %7768 = vmatprep.subr.bf16.mxu0 %v10947_v47  ;;  %v10987_v47 = vld [vmem:[#allocation8 + $0xa40] ss:$16 sps:$4 sm:$0xff]  }
 0x376   :  { %7994 = vmatprep.subr.bf16.mxu1 %v10950_v40 }
 0x378   :  { %7769 = vmatpush1.bf16.msra.mxu0 %v10945_v51  ;;  %v10990_v51 = vld [vmem:[#allocation8 + $0xa48] ss:$16 sps:$4 sm:$0xff]  }
 0x379   :  { %7995 = vmatpush1.bf16.msra.mxu1 %v10948_v17  ;;  %7770 = vmatprep.subr.bf16.mxu0 %v10953_v41  ;;  %v10995_v41 = vld [vmem:[#allocation8 + $0xa64] ss:$16 sps:$4 sm:$0xff]  }
 0x37a   :  { %6539 = vmatmul.mubr.bf16.gmra.mrb[56].mxu0 %v12319_v6  ;;  %7996 = vmatprep.subr.bf16.mxu1 %v10956_v18  ;;  %v3410_v18 = vld [vmem:[#allocation2 + $0x90] sm:$0xee] }
 0x37b   :  { %6765 = vmatmul.mubr.bf16.gmra.mrb[56].mxu1 %v12319_v6  ;;  %6548 = vmatprep.mubr.bf16.mxu0 %v12390_v59  ;;  %v3481_v6 = vsel %vm11485_vm5, %v8936_v43, %v3480_v31  ;;  %v10993_v31 = vld [vmem:[#allocation8 + $0xa60] ss:$16 sps:$4 sm:$0xff]  }
 0x37c   :  { %6774 = vmatprep.mubr.bf16.mxu1 %v12390_v59  ;;  %7771 = vmatpush1.bf16.msra.mxu0 %v10951_v58  ;;  %v11072_v59 = vld [vmem:[#allocation2 + $0x40] sm:$0xff]  ;;  %v9305_v25 = vcombine.high %v3481_v6, %v3488_v33  ;;  %v9304_v19 = vcombine.low %v3481_v6, %v3488_v33  ;;  %v8942_v58 = vrot.slane %v3410_v18, 9  ;;  %v11075_v43 = vld [vmem:[#allocation2 + $0xd0] sm:$0xff]  ;;  %v11002_v33 = vld [vmem:[#allocation8 + $0xa88] ss:$16 sps:$4 sm:$0xff]  }
 0x37d   :  { %7997 = vmatpush1.bf16.msra.mxu1 %v10954_v3  ;;  %7772 = vmatprep.subr.bf16.mxu0 %v10959_v4  ;;  %v3494_v1 = vrot.slane %v11072_v59, 5  ;;  %v3528_v3 = vrot.slane %v3522_v29, 4  ;;  %v10996_v4 = vld [vmem:[#allocation8 + $0xa68] ss:$16 sps:$4 sm:$0xff]   ;;  %v3536_v34 = vrot.slane %v11075_v43, 5 }
 0x37e   :  { %7998 = vmatprep.subr.bf16.mxu1 %v10962_v2  ;;  %v11004_v2 = vld [vmem:[#allocation8 + $0xa8c] ss:$16 sps:$4 sm:$0xff]   ;;  %v11007_v6 = vld [vmem:[#allocation8 + $0xaa4] ss:$16 sps:$4 sm:$0xff]   ;;  %v11032_v18 = vld [vmem:[#allocation8 + $0xb28] ss:$16 sps:$4 sm:$0xff]  }
 0x37f   :  { %v3500_v62 = vrot.slane %v3494_v1, 4  ;;  %v3495_v45 = vsel %vm11485_vm5, %v8938_v44, %v3494_v1  ;;  %v3530_v15 = vsel %vm11485_vm5, %v3528_v3, %v3529_v42  ;;  %v11010_v59 = vld [vmem:[#allocation8 + $0xaac] ss:$16 sps:$4 sm:$0xff]   ;;  %v11078_v3 = vld [vmem:[#allocation2 + $0x160] sm:$0xff] }
 0x380   :  { %7773 = vmatpush1.bf16.msra.mxu0 %v10957_v61  ;;  %v3416_v61 = vld [vmem:[#allocation2 + $0xe0] sm:$0x11]  ;;  %v11040_v42 = vld [vmem:[#allocation8 + $0xb4c] ss:$16 sps:$4 sm:$0xff]  }
 0x381   :  { %7999 = vmatpush1.bf16.msra.mxu1 %v10960_v28  ;;  %7774 = vmatprep.subr.bf16.mxu0 %v10965_v9  ;;  %v3502_v20 = vsel %vm11485_vm5, %v3500_v62, %v3501_v39  ;;  %v10999_v9 = vld [vmem:[#allocation8 + $0xa80] ss:$16 sps:$4 sm:$0xff]   ;;  %v3543_v1 = vrot.slane %v3416_v61, 5  ;;  %v11016_v39 = vld [vmem:[#allocation8 + $0xacc] ss:$16 sps:$4 sm:$0xff]  }
 0x382   :  { %6549 = vmatmul.mubr.bf16.gmra.mrb[60].mxu0 %v12380_v14  ;;  %8000 = vmatprep.subr.bf16.mxu1 %v10968_v52  ;;  %v9309_v0 = vcombine.high %v3495_v45, %v3502_v20  ;;  %v9308_v24 = vcombine.low %v3495_v45, %v3502_v20  ;;  %v3523_v52 = vsel %vm11485_vm5, %v8942_v58, %v3522_v29  ;;  %v11031_v29 = vld [vmem:[#allocation8 + $0xb24] ss:$16 sps:$4 sm:$0xff]   ;;  %v11038_v61 = vld [vmem:[#allocation8 + $0xb48] ss:$16 sps:$4 sm:$0xff]  }
 0x383   :  { %6775 = vmatmul.mubr.bf16.gmra.mrb[60].mxu1 %v12380_v14  ;;  %7778 = vmatprep.mubr.bf16.mxu0 %v9305_v25  ;;  %v3508_v14 = vrot.slane %v11073_v60, 5  ;;  %v9316_v62 = vcombine.low %v3523_v52, %v3530_v15  ;;  %v3428_v58 = vld [vmem:[#allocation2 + $0x170] sm:$0x11] }
 0x384   :  { %7775 = vmatpush1.bf16.msra.mxu0 %v10963_v36  ;;  %8004 = vmatprep.mubr.bf16.mxu1 %v9305_v25  ;;  %v9317_v36 = vcombine.high %v3523_v52, %v3530_v15  ;;  %v8944_v25 = vrot.slane %v3414_v12, 9  ;;  %v3585_v52 = vrot.slane %v3428_v58, 5  ;;  %v11044_v12 = vld [vmem:[#allocation8 + $0xb68] ss:$16 sps:$4 sm:$0xff]  }
 0x385   :  { %8001 = vmatpush1.bf16.msra.mxu1 %v10966_v16  ;;  %7776 = vmatprep.subr.bf16.mxu0 %v10971_v27  ;;  %v3514_v21 = vrot.slane %v3508_v14, 4  ;;  %v3509_v40 = vsel %vm11485_vm5, %v8940_v56, %v3508_v14  ;;  %v11005_v16 = vld [vmem:[#allocation8 + $0xaa0] ss:$16 sps:$4 sm:$0xff]   ;;  %v3542_v27 = vrot.slane %v3536_v34, 4  ;;  %v11019_v14 = vld [vmem:[#allocation8 + $0xae4] ss:$16 sps:$4 sm:$0xff]  }
 0x386   :  { %8002 = vmatprep.subr.bf16.mxu1 %v10974_v48  ;;  %v11008_v48 = vld [vmem:[#allocation8 + $0xaa8] ss:$16 sps:$4 sm:$0xff]   ;;  %v3537_v20 = vsel %vm11485_vm5, %v8944_v25, %v3536_v34  ;;  %v3424_v56 = vld [vmem:[#allocation2 + $0x140] sm:$0x11]  ;;  %v11052_v25 = vld [vmem:[#allocation8 + $0xb8c] ss:$16 sps:$4 sm:$0xff]  }
 0x387   :  { %v3516_v10 = vsel %vm11485_vm5, %v3514_v21, %v3515_v13  ;;  %v11028_v13 = vld [vmem:[#allocation8 + $0xb0c] ss:$16 sps:$4 sm:$0xff]   ;;  %v11077_v21 = vld [vmem:[#allocation2 + $0x130] sm:$0xff] }
 0x388   :  { %7777 = vmatpush1.bf16.msra.mxu0 %v10969_v37  ;;  %v9313_v17 = vcombine.high %v3509_v40, %v3516_v10  ;;  %v9312_v28 = vcombine.low %v3509_v40, %v3516_v10  ;;  %v3544_v37 = vsel %vm11485_vm5, %v3542_v27, %v3543_v1  ;;  %v3571_v40 = vrot.slane %v3424_v56, 5  ;;  %v11043_v34 = vld [vmem:[#allocation8 + $0xb64] ss:$16 sps:$4 sm:$0xff]   ;;  %v11079_v1 = vld [vmem:[#allocation2 + $0x18] sm:$0xff] }
 0x389   :  { %8003 = vmatpush1.bf16.msra.mxu1 %v10972_v11  ;;  %7859 = vmatprep.subr.bf16.mxu0 %v10977_v54  ;;  %v3420_v11 = vld [vmem:[#allocation2 + $0x110] sm:$0x11]  ;;  %v11076_v54 = vld [vmem:[#allocation2 + $0x100] sm:$0xff]  ;;  %v9321_v60 = vcombine.high %v3537_v20, %v3544_v37 }
 0x38a   :  { %8085 = vmatprep.subr.bf16.mxu1 %v10980_v35  ;;  %v3550_v44 = vrot.slane %v11076_v54, 5  ;;  %v11011_v35 = vld [vmem:[#allocation8 + $0xac0] ss:$16 sps:$4 sm:$0xff]   ;;  %v3557_v45 = vrot.slane %v3420_v11, 5  ;;  %v11055_v54 = vld [vmem:[#allocation8 + $0xba4] ss:$16 sps:$4 sm:$0xff]  }
 0x38b   :  { %7779 = vmatmul.mubr.bf16.vlgmr.msra.gmra.mrb[32].mxu0 %v9304_v19 }
 0x38c   :  { %8005 = vmatmul.mubr.bf16.vlgmr.msra.gmra.mrb[32].mxu1 %v9304_v19  ;;  %7788 = vmatprep.mubr.bf16.mxu0 %v9309_v0  ;;  %v3418_v19 = vld [vmem:[#allocation2 + $0xf0] sm:$0xee] }
 0x38d   :  { %7860 = vmatpush1.bf16.msra.mxu0 %v10975_v53  ;;  %8014 = vmatprep.mubr.bf16.mxu1 %v9309_v0  ;;  %v11022_v53 = vld [vmem:[#allocation8 + $0xaec] ss:$16 sps:$4 sm:$0xff]   ;;  %v8946_v0 = vrot.slane %v3418_v19, 9  ;;  %v11061_v19 = vld [vmem:[#allocation8 + $0xbc4] ss:$16 sps:$4 sm:$0xff]  }
 0x38e   :  { %8086 = vmatpush1.bf16.msra.mxu1 %v10978_v46  ;;  %7861 = vmatprep.subr.bf16.mxu0 %v10983_v49  ;;  %v11017_v46 = vld [vmem:[#allocation8 + $0xae0] ss:$16 sps:$4 sm:$0xff]   ;;  %v3556_v49 = vrot.slane %v3550_v44, 4 }
 0x38f   :  { %8087 = vmatprep.subr.bf16.mxu1 %v10986_v30  ;;  %v11025_v30 = vld [vmem:[#allocation8 + $0xb04] ss:$16 sps:$4 sm:$0xff]   ;;  %v3551_v10 = vsel %vm11485_vm5, %v8946_v0, %v3550_v44  ;;  %v3401_v44 = vld [vmem:[#allocation2 + $0x28] sm:$0x11] }
 0x390   :  { %v11080_v0 = vld [vmem:[#allocation2 + $0x48] sm:$0xff] }
 0x391   :  { %7862 = vmatpush1.bf16.msra.mxu0 %v10981_v8  ;;  %v3558_v8 = vsel %vm11485_vm5, %v3556_v49, %v3557_v45  ;;  %v3498_v49 = vrot.slane %v11080_v0, 5 }
 0x392   :  { %8088 = vmatpush1.bf16.msra.mxu1 %v10984_v63  ;;  %7863 = vmatprep.subr.bf16.mxu0 %v10989_v55  ;;  %v3564_v63 = vrot.slane %v11077_v21, 5  ;;  %v9320_v55 = vcombine.low %v3537_v20, %v3544_v37  ;;  %v9325_v57 = vcombine.high %v3551_v10, %v3558_v8  ;;  %v11050_v37 = vld [vmem:[#allocation8 + $0xb88] ss:$16 sps:$4 sm:$0xff]   ;;  %v11067_v21 = vld [vmem:[#allocation8 + $0xbe4] ss:$16 sps:$4 sm:$0xff]  }
 0x393   :  { %7789 = vmatmul.mubr.bf16.gmra.mrb[36].mxu0 %v9308_v24  ;;  %8089 = vmatprep.subr.bf16.mxu1 %v10992_v38  ;;  %v11023_v38 = vld [vmem:[#allocation8 + $0xb00] ss:$16 sps:$4 sm:$0xff]   ;;  %v3399_v20 = vld [vmem:[#allocation2 + $0x8] sm:$0xee] }
 0x394   :  { %8015 = vmatmul.mubr.bf16.gmra.mrb[36].mxu1 %v9308_v24  ;;  %7798 = vmatprep.mubr.bf16.mxu0 %v9313_v17  ;;  %v3422_v24 = vld [vmem:[#allocation2 + $0x120] sm:$0xee]  ;;  %v8937_v45 = vrot.slane %v3399_v20, 9  ;;  %v3421_v20 = vld [vmem:[#allocation2 + $0x118] sm:$0x11] }
 0x395   :  { %7864 = vmatpush1.bf16.msra.mxu0 %v10987_v47  ;;  %8024 = vmatprep.mubr.bf16.mxu1 %v9313_v17  ;;  %v11034_v47 = vld [vmem:[#allocation8 + $0xb2c] ss:$16 sps:$4 sm:$0xff]   ;;  %v8948_v17 = vrot.slane %v3422_v24, 9 }
 0x396   :  { %8090 = vmatpush1.bf16.msra.mxu1 %v10990_v51  ;;  %7865 = vmatprep.subr.bf16.mxu0 %v10995_v41  ;;  %v11029_v51 = vld [vmem:[#allocation8 + $0xb20] ss:$16 sps:$4 sm:$0xff]   ;;  %v3570_v41 = vrot.slane %v3564_v63, 4  ;;  %v11081_v24 = vld [vmem:[#allocation2 + $0x78] sm:$0xff] }
 0x397   :  { %8091 = vmatprep.subr.bf16.mxu1 %v10998_v26  ;;  %v11037_v26 = vld [vmem:[#allocation8 + $0xb44] ss:$16 sps:$4 sm:$0xff]   ;;  %v3565_v15 = vsel %vm11485_vm5, %v8948_v17, %v3564_v63  ;;  %v11070_v63 = vld [vmem:[#allocation8 + $0xbec] ss:$16 sps:$4 sm:$0xff]  }
 0x399   :  { %7866 = vmatpush1.bf16.msra.mxu0 %v10993_v31  ;;  %v3572_v31 = vsel %vm11485_vm5, %v3570_v41, %v3571_v40 }
 0x39a   :  { %8092 = vmatpush1.bf16.msra.mxu1 %v10996_v4  ;;  %7867 = vmatprep.subr.bf16.mxu0 %v11001_v7  ;;  %v3578_v4 = vrot.slane %v11078_v3, 5  ;;  %v9324_v7 = vcombine.low %v3551_v10, %v3558_v8  ;;  %v9329_v43 = vcombine.high %v3565_v15, %v3572_v31  ;;  %v11062_v8 = vld [vmem:[#allocation8 + $0xbc8] ss:$16 sps:$4 sm:$0xff]   ;;  %v11065_v10 = vld [vmem:[#allocation8 + $0xbe0] ss:$16 sps:$4 sm:$0xff]  }
 0x39b   :  { %7799 = vmatmul.mubr.bf16.gmra.mrb[40].mxu0 %v9312_v28  ;;  %8093 = vmatprep.subr.bf16.mxu1 %v11004_v2  ;;  %v11035_v2 = vld [vmem:[#allocation8 + $0xb40] ss:$16 sps:$4 sm:$0xff]   ;;  %v11082_v3 = vld [vmem:[#allocation2 + $0xa8] sm:$0xff] }
 0x39c   :  { %8025 = vmatmul.mubr.bf16.gmra.mrb[40].mxu1 %v9312_v28  ;;  %7808 = vmatprep.mubr.bf16.mxu0 %v9317_v36  ;;  %v3426_v28 = vld [vmem:[#allocation2 + $0x150] sm:$0xee] }
 0x39d   :  { %7868 = vmatpush1.bf16.msra.mxu0 %v10999_v9  ;;  %8034 = vmatprep.mubr.bf16.mxu1 %v9317_v36  ;;  %v11046_v9 = vld [vmem:[#allocation8 + $0xb6c] ss:$16 sps:$4 sm:$0xff]   ;;  %v8950_v36 = vrot.slane %v3426_v28, 9 }
 0x39e   :  { %8094 = vmatpush1.bf16.msra.mxu1 %v11002_v33  ;;  %7869 = vmatprep.subr.bf16.mxu0 %v11007_v6  ;;  %v11041_v33 = vld [vmem:[#allocation8 + $0xb60] ss:$16 sps:$4 sm:$0xff]   ;;  %v3584_v6 = vrot.slane %v3578_v4, 4 }
 0x39f   :  { %8095 = vmatprep.subr.bf16.mxu1 %v11010_v59  ;;  %v11049_v59 = vld [vmem:[#allocation8 + $0xb84] ss:$16 sps:$4 sm:$0xff]  }
 0x3a0   :  { %v3586_v27 = vsel %vm11485_vm5, %v3584_v6, %v3585_v52 }
 0x3a1   :  { %7870 = vmatpush1.bf16.msra.mxu0 %v11005_v16  ;;  %v3484_v16 = vrot.slane %v11079_v1, 5 }
 0x3a2   :  { %8096 = vmatpush1.bf16.msra.mxu1 %v11008_v48  ;;  %7871 = vmatprep.subr.bf16.mxu0 %v11013_v22  ;;  %v9328_v48 = vcombine.low %v3565_v15, %v3572_v31  ;;  %v11047_v22 = vld [vmem:[#allocation8 + $0xb80] ss:$16 sps:$4 sm:$0xff]   ;;  %v3407_v31 = vld [vmem:[#allocation2 + $0x68] sm:$0xee] }
 0x3a3   :  { %7809 = vmatmul.mubr.bf16.gmra.mrb[44].mxu0 %v9316_v62  ;;  %8097 = vmatprep.subr.bf16.mxu1 %v11016_v39  ;;  %v3579_v39 = vsel %vm11485_vm5, %v8950_v36, %v3578_v4  ;;  %v3526_v4 = vrot.slane %v11082_v3, 5 }
 0x3a4   :  { %8035 = vmatmul.mubr.bf16.gmra.mrb[44].mxu1 %v9316_v62  ;;  %7818 = vmatprep.mubr.bf16.mxu0 %v9321_v60  ;;  %v9333_v11 = vcombine.high %v3579_v39, %v3586_v27  ;;  %v11058_v62 = vld [vmem:[#allocation8 + $0xbac] ss:$16 sps:$4 sm:$0xff]  }
 0x3a5   :  { %7872 = vmatpush1.bf16.msra.mxu0 %v11011_v35  ;;  %8044 = vmatprep.mubr.bf16.mxu1 %v9321_v60  ;;  %v3489_v35 = vrot.slane %v3484_v16, 4  ;;  %v3490_v60 = vrot.slane %v3401_v44, 5  ;;  %v3531_v28 = vrot.slane %v3526_v4, 4 }
 0x3a6   :  { %8098 = vmatpush1.bf16.msra.mxu1 %v11014_v50  ;;  %7873 = vmatprep.subr.bf16.mxu0 %v11019_v14  ;;  %v11053_v50 = vld [vmem:[#allocation8 + $0xba0] ss:$16 sps:$4 sm:$0xff]   ;;  %v11056_v14 = vld [vmem:[#allocation8 + $0xba8] ss:$16 sps:$4 sm:$0xff]  }
 0x3a7   :  { %8099 = vmatprep.subr.bf16.mxu1 %v11022_v53  ;;  %v11064_v53 = vld [vmem:[#allocation8 + $0xbcc] ss:$16 sps:$4 sm:$0xff]  }
 0x3a9   :  { %7874 = vmatpush1.bf16.msra.mxu0 %v11017_v46  ;;  %v3491_v46 = vsel %vm11485_vm5, %v3489_v35, %v3490_v60  ;;  %v3419_v60 = vld [vmem:[#allocation2 + $0xf8] sm:$0xee] }
 0x3aa   :  { %8100 = vmatpush1.bf16.msra.mxu1 %v11020_v5  ;;  %7875 = vmatprep.subr.bf16.mxu0 %v11025_v30  ;;  %v9332_v5 = vcombine.low %v3579_v39, %v3586_v27  ;;  %v11059_v30 = vld [vmem:[#allocation8 + $0xbc0] ss:$16 sps:$4 sm:$0xff]   ;;  %v11084_v39 = vld [vmem:[#allocation2 + $0x108] sm:$0xff] }
 0x3ab   :  { %7819 = vmatmul.mubr.bf16.gmra.mrb[48].mxu0 %v9320_v55  ;;  %8101 = vmatprep.subr.bf16.mxu1 %v11028_v13  ;;  %v3485_v13 = vsel %vm11485_vm5, %v8937_v45, %v3484_v16  ;;  %v3425_v45 = vld [vmem:[#allocation2 + $0x148] sm:$0x11] }
 0x3ac   :  { %8045 = vmatmul.mubr.bf16.gmra.mrb[48].mxu1 %v9320_v55  ;;  %7828 = vmatprep.mubr.bf16.mxu0 %v9325_v57  ;;  %v9307_v56 = vcombine.high %v3485_v13, %v3491_v46  ;;  %v3405_v55 = vld [vmem:[#allocation2 + $0x58] sm:$0x11]  ;;  %v9306_v17 = vcombine.low %v3485_v13, %v3491_v46  ;;  %v3423_v13 = vld [vmem:[#allocation2 + $0x128] sm:$0xee] }
 0x3ad   :  { %7876 = vmatpush1.bf16.msra.mxu0 %v11023_v38  ;;  %8054 = vmatprep.mubr.bf16.mxu1 %v9325_v57  ;;  %v3503_v38 = vrot.slane %v3498_v49, 4  ;;  %v11068_v57 = vld [vmem:[#allocation8 + $0xbe8] ss:$16 sps:$4 sm:$0xff]  }
 0x3ae   :  { %8102 = vmatpush1.bf16.msra.mxu1 %v11026_v23  ;;  %7877 = vmatprep.subr.bf16.mxu0 %v11031_v29  ;;  %v3403_v23 = vld [vmem:[#allocation2 + $0x38] sm:$0xee]  ;;  %v3504_v29 = vrot.slane %v3405_v55, 5  ;;  %v3429_v55 = vld [vmem:[#allocation2 + $0x178] sm:$0x11] }
 0x3af   :  { %8103 = vmatprep.subr.bf16.mxu1 %v11034_v47  ;;  %v3512_v47 = vrot.slane %v11081_v24, 5  ;;  %v8939_v40 = vrot.slane %v3403_v23, 9  ;;  %v11085_v46 = vld [vmem:[#allocation2 + $0x138] sm:$0xff] }
 0x3b0   :  { %v3568_v0 = vrot.slane %v11085_v46, 5  ;;  %v3427_v24 = vld [vmem:[#allocation2 + $0x158] sm:$0xee] }
 0x3b1   :  { %7878 = vmatpush1.bf16.msra.mxu0 %v11029_v51  ;;  %v3505_v51 = vsel %vm11485_vm5, %v3503_v38, %v3504_v29  ;;  %v3499_v41 = vsel %vm11485_vm5, %v8939_v40, %v3498_v49  ;;  %v11086_v38 = vld [vmem:[#allocation2 + $0x168] sm:$0xff]  ;;  %v8951_v40 = vrot.slane %v3427_v24, 9 }
 0x3b2   :  { %8104 = vmatpush1.bf16.msra.mxu1 %v11032_v18  ;;  %7879 = vmatprep.subr.bf16.mxu0 %v11037_v26  ;;  %v9311_v18 = vcombine.high %v3499_v41, %v3505_v51  ;;  %v3409_v26 = vld [vmem:[#allocation2 + $0x88] sm:$0x11]  ;;  %v9310_v15 = vcombine.low %v3499_v41, %v3505_v51 }
 0x3b3   :  { %7829 = vmatmul.mubr.bf16.gmra.mrb[52].mxu0 %v9324_v7  ;;  %8105 = vmatprep.subr.bf16.mxu1 %v11040_v42  ;;  %v3517_v42 = vrot.slane %v3512_v47, 4  ;;  %v3518_v58 = vrot.slane %v3409_v26, 5 }
 0x3b4   :  { %8055 = vmatmul.mubr.bf16.gmra.mrb[52].mxu1 %v9324_v7  ;;  %7838 = vmatprep.mubr.bf16.mxu0 %v9329_v43  ;;  %v8941_v7 = vrot.slane %v3407_v31, 9  ;;  %v8262_v31 = vld [vmem:[#allocation12] sm:$0xf] }
 0x3b5   :  { %7880 = vmatpush1.bf16.msra.mxu0 %v11035_v2  ;;  %8064 = vmatprep.mubr.bf16.mxu1 %v9329_v43  ;;  %v3519_v2 = vsel %vm11485_vm5, %v3517_v42, %v3518_v58  ;;  %v12842_v58 = vld [vmem:[#allocation37_spill] sm:$0xff] }
 0x3b6   :  { %8106 = vmatpush1.bf16.msra.mxu1 %v11038_v61  ;;  %7881 = vmatprep.subr.bf16.mxu0 %v11043_v34  ;;  %v3513_v61 = vsel %vm11485_vm5, %v8941_v7, %v3512_v47  ;;  %v3413_v34 = vld [vmem:[#allocation2 + $0xb8] sm:$0x11]  ;;  %v3588_v47 = vrot.slane %v3429_v55, 5  ;;  %v12843_v3 = vsub.s32 0, %v12842_v58  ;;  %v12844_v7 = vsub.s32 2, %v12842_v58 }
 0x3b7   :  { %8107 = vmatprep.subr.bf16.mxu1 %v11046_v9  ;;  %v9315_v43 = vcombine.high %v3513_v61, %v3519_v2  ;;  %v3411_v9 = vld [vmem:[#allocation2 + $0x98] sm:$0xee]  ;;  %v3532_v52 = vrot.slane %v3413_v34, 5  ;;  %v12845_v32 = vsub.s32 1, %v12842_v58 }
 0x3b8   :  { %v8943_v6 = vrot.slane %v3411_v9, 9 }
 0x3b9   :  { %7882 = vmatpush1.bf16.msra.mxu0 %v11041_v33  ;;  %v11083_v33 = vld [vmem:[#allocation2 + $0xd8] sm:$0xff] }
 0x3ba   :  { %8108 = vmatpush1.bf16.msra.mxu1 %v11044_v12  ;;  %7883 = vmatprep.subr.bf16.mxu0 %v11049_v59  ;;  %v3540_v36 = vrot.slane %v11083_v33, 5  ;;  %v3533_v12 = vsel %vm11485_vm5, %v3531_v28, %v3532_v52  ;;  %v9314_v59 = vcombine.low %v3513_v61, %v3519_v2  ;;  %v3527_v1 = vsel %vm11485_vm5, %v8943_v6, %v3526_v4 }
 0x3bb   :  { %7839 = vmatmul.mubr.bf16.gmra.mrb[56].mxu0 %v9328_v48  ;;  %8109 = vmatprep.subr.bf16.mxu1 %v11052_v25  ;;  %v9319_v16 = vcombine.high %v3527_v1, %v3533_v12  ;;  %v3417_v25 = vld [vmem:[#allocation2 + $0xe8] sm:$0x11]  ;;  %v9318_v44 = vcombine.low %v3527_v1, %v3533_v12  ;;  %v12594_v4 = vrot.slane %v8262_v31, %v12843_v3  ;;  %v12846_v61 = vsub.s32 3, %v12842_v58 }
 0x3bc   :  { %8065 = vmatmul.mubr.bf16.gmra.mrb[56].mxu1 %v9328_v48  ;;  %7848 = vmatprep.mubr.bf16.mxu0 %v9333_v11  ;;  %v3545_v27 = vrot.slane %v3540_v36, 4  ;;  %v3415_v48 = vld [vmem:[#allocation2 + $0xc8] sm:$0xee]  ;;  %v12598_v2 = vrot.slane %v8262_v31, %v12844_v7 }
 0x3bd   :  { %7884 = vmatpush1.bf16.msra.mxu0 %v11047_v22  ;;  %8074 = vmatprep.mubr.bf16.mxu1 %v9333_v11  ;;  %v3546_v22 = vrot.slane %v3417_v25, 5  ;;  %v8945_v11 = vrot.slane %v3415_v48, 9 }
 0x3be   :  { %8110 = vmatpush1.bf16.msra.mxu1 %v11050_v37  ;;  %7885 = vmatprep.subr.bf16.mxu0 %v11055_v54  ;;  %v3554_v37 = vrot.slane %v11084_v39, 5 }
 0x3bf   :  { %8111 = vmatprep.subr.bf16.mxu1 %v11058_v62  ;;  %v3547_v54 = vsel %vm11485_vm5, %v3545_v27, %v3546_v22  ;;  %v3541_v62 = vsel %vm11485_vm5, %v8945_v11, %v3540_v36 }
 0x3c0   :  { %v9323_v35 = vcombine.high %v3541_v62, %v3547_v54  ;;  %v9322_v49 = vcombine.low %v3541_v62, %v3547_v54 }
 0x3c1   :  { %7886 = vmatpush1.bf16.msra.mxu0 %v11053_v50  ;;  %v3559_v50 = vrot.slane %v3554_v37, 4 }
 0x3c2   :  { %8112 = vmatpush1.bf16.msra.mxu1 %v11056_v14  ;;  %7887 = vmatprep.subr.bf16.mxu0 %v11061_v19  ;;  %v3560_v14 = vrot.slane %v3421_v20, 5  ;;  %v8947_v19 = vrot.slane %v3419_v60, 9 }
 0x3c3   :  { %7849 = vmatmul.mubr.bf16.gmra.mrb[60].mxu0 %v9332_v5  ;;  %8113 = vmatprep.subr.bf16.mxu1 %v11064_v53 }
 0x3c4   :  { %8075 = vmatmul.mubr.bf16.gmra.mrb[60].mxu1 %v9332_v5  ;;  %7891 = vmatprep.mubr.bf16.mxu0 %v9307_v56  ;;  %v3561_v53 = vsel %vm11485_vm5, %v3559_v50, %v3560_v14  ;;  %v3555_v5 = vsel %vm11485_vm5, %v8947_v19, %v3554_v37 }
 0x3c5   :  { %7888 = vmatpush1.bf16.msra.mxu0 %v11059_v30  ;;  %8117 = vmatprep.mubr.bf16.mxu1 %v9307_v56  ;;  %v9327_v30 = vcombine.high %v3555_v5, %v3561_v53  ;;  %v8949_v56 = vrot.slane %v3423_v13, 9  ;;  %v9326_v23 = vcombine.low %v3555_v5, %v3561_v53 }
 0x3c6   :  { %8114 = vmatpush1.bf16.msra.mxu1 %v11062_v8  ;;  %7889 = vmatprep.subr.bf16.mxu0 %v11067_v21  ;;  %v3574_v8 = vrot.slane %v3425_v45, 5  ;;  %v3573_v21 = vrot.slane %v3568_v0, 4 }
 0x3c7   :  { %8115 = vmatprep.subr.bf16.mxu1 %v11070_v63 }
 0x3c8   :  { %v3575_v63 = vsel %vm11485_vm5, %v3573_v21, %v3574_v8 }
 0x3c9   :  { %7890 = vmatpush1.bf16.msra.mxu0 %v11065_v10  ;;  %v3582_v10 = vrot.slane %v11086_v38, 5 }
 0x3ca   :  { %8116 = vmatpush1.bf16.msra.mxu1 %v11068_v57  ;;  %v3569_v57 = vsel %vm11485_vm5, %v8949_v56, %v3568_v0 }
 0x3cb   :  { %v9331_v29 = vcombine.high %v3569_v57, %v3575_v63  ;;  %v3587_v51 = vrot.slane %v3582_v10, 4  ;;  %v9330_v41 = vcombine.low %v3569_v57, %v3575_v63 }
 0x3cc   :  { %7892 = vmatmul.mubr.bf16.vlgmr.msra.gmra.mrb[32].mxu0 %v9306_v17 }
 0x3cd   :  { %8118 = vmatmul.mubr.bf16.vlgmr.msra.gmra.mrb[32].mxu1 %v9306_v17  ;;  %7901 = vmatprep.mubr.bf16.mxu0 %v9311_v18  ;;  %v3589_v17 = vsel %vm11485_vm5, %v3587_v51, %v3588_v47 }
 0x3ce   :  { %8127 = vmatprep.mubr.bf16.mxu1 %v9311_v18  ;;  %v3583_v18 = vsel %vm11485_vm5, %v8951_v40, %v3582_v10 }
 0x3cf   :  { %v9335_v26 = vcombine.high %v3583_v18, %v3589_v17  ;;  %v9334_v42 = vcombine.low %v3583_v18, %v3589_v17 }
 0x3d4   :  { %7902 = vmatmul.mubr.bf16.gmra.mrb[36].mxu0 %v9310_v15 }
 0x3d5   :  { %8128 = vmatmul.mubr.bf16.gmra.mrb[36].mxu1 %v9310_v15  ;;  %7911 = vmatprep.mubr.bf16.mxu0 %v9315_v43  ;;  %v12602_v15 = vrot.slane %v8262_v31, %v12845_v32 }
 0x3d6   :  { %8137 = vmatprep.mubr.bf16.mxu1 %v9315_v43  ;;  %v12606_v43 = vrot.slane %v8262_v31, %v12846_v61 }
 0x3dc   :  { %7912 = vmatmul.mubr.bf16.gmra.mrb[40].mxu0 %v9314_v59 }
 0x3dd   :  { %8138 = vmatmul.mubr.bf16.gmra.mrb[40].mxu1 %v9314_v59  ;;  %7921 = vmatprep.mubr.bf16.mxu0 %v9319_v16 }
 0x3de   :  { %8147 = vmatprep.mubr.bf16.mxu1 %v9319_v16 }
 0x3e4   :  { %7922 = vmatmul.mubr.bf16.gmra.mrb[44].mxu0 %v9318_v44 }
 0x3e5   :  { %8148 = vmatmul.mubr.bf16.gmra.mrb[44].mxu1 %v9318_v44  ;;  %7931 = vmatprep.mubr.bf16.mxu0 %v9323_v35 }
 0x3e6   :  { %8157 = vmatprep.mubr.bf16.mxu1 %v9323_v35 }
 0x3ec   :  { %7932 = vmatmul.mubr.bf16.gmra.mrb[48].mxu0 %v9322_v49 }
 0x3ed   :  { %8158 = vmatmul.mubr.bf16.gmra.mrb[48].mxu1 %v9322_v49  ;;  %7941 = vmatprep.mubr.bf16.mxu0 %v9327_v30 }
 0x3ee   :  { %8167 = vmatprep.mubr.bf16.mxu1 %v9327_v30 }
 0x3f4   :  { %7942 = vmatmul.mubr.bf16.gmra.mrb[52].mxu0 %v9326_v23 }
 0x3f5   :  { %8168 = vmatmul.mubr.bf16.gmra.mrb[52].mxu1 %v9326_v23  ;;  %7951 = vmatprep.mubr.bf16.mxu0 %v9331_v29 }
 0x3f6   :  { %8177 = vmatprep.mubr.bf16.mxu1 %v9331_v29 }
 0x3fc   :  { %7952 = vmatmul.mubr.bf16.gmra.mrb[56].mxu0 %v9330_v41 }
 0x3fd   :  { %8178 = vmatmul.mubr.bf16.gmra.mrb[56].mxu1 %v9330_v41  ;;  %7961 = vmatprep.mubr.bf16.mxu0 %v9335_v26 }
 0x3fe   :  { %8187 = vmatprep.mubr.bf16.mxu1 %v9335_v26 }
 0x404   :  { %7962 = vmatmul.mubr.bf16.gmra.mrb[60].mxu0 %v9334_v42 }
 0x405   :  { %8188 = vmatmul.mubr.bf16.gmra.mrb[60].mxu1 %v9334_v42 }
 0x49f   :  { %v7893_v34 = vpop.f32.mrb[32].mxu0 }
 0x4a0   :  { %v8284_v28 = vadd.f32 %v12594_v4, %v7893_v34  ;;  %v8119_v9 = vpop.f32.mrb[32].mxu1  ;;  %v7895_v52 = vpop.f32.mrb[33].mxu0 }
 0x4a1   :  { %v8286_v33 = vadd.f32 %v12598_v2, %v8119_v9  ;;  %v8285_v36 = vadd.f32 %v12602_v15, %v7895_v52  ;;  %v8121_v6 = vpop.f32.mrb[33].mxu1  ;;  %v7897_v12 = vpop.f32.mrb[34].mxu0 }
 0x4a2   :  { %v8348_v59 = vmax.f32 %v8284_v28, 0.0  ;;  %v8287_v1 = vadd.f32 %v12606_v43, %v8121_v6  ;;  %v8288_v16 = vadd.f32 %v12594_v4, %v7897_v12  ;;  %v8123_v25 = vpop.f32.mrb[34].mxu1  ;;  %v7899_v27 = vpop.f32.mrb[35].mxu0 }
 0x4a3   :  { %v8350_v48 = vmax.f32 %v8286_v33, 0.0  ;;  %v8349_v22 = vmax.f32 %v8285_v36, 0.0  ;;  %v8290_v39 = vadd.f32 %v12598_v2, %v8123_v25  ;;  %v8289_v37 = vadd.f32 %v12602_v15, %v7899_v27  ;;  %v8125_v11 = vpop.f32.mrb[35].mxu1 }
 0x4a4   :  { %v8351_v54 = vmax.f32 %v8287_v1, 0.0  ;;  %v8352_v44 = vmax.f32 %v8288_v16, 0.0  ;;  %v8291_v62 = vadd.f32 %v12606_v43, %v8125_v11 }
 0x4a5   :  { %v9528_v35 = vpack.c.bf16 %v8349_v22, %v8348_v59  ;;  %v8354_v20 = vmax.f32 %v8290_v39, 0.0  ;;  %v8353_v50 = vmax.f32 %v8289_v37, 0.0 }
 0x4a6   :  { %v9529_v60 = vpack.c.bf16 %v8351_v54, %v8350_v48  ;;  %v8355_v14 = vmax.f32 %v8291_v62, 0.0 }
 0x4a7   :  { %8604 = vst [vmem:[#allocation14] sm:$0xff] %v9528_v35  ;;  %v9530_v19 = vpack.c.bf16 %v8353_v50, %v8352_v44  ;;  %v7903_v53 = vpop.f32.mrb[36].mxu0 }
 0x4a8   :  { %8605 = vst [vmem:[#allocation14 + $0x8] sm:$0xff] %v9529_v60  ;;  %v9531_v45 = vpack.c.bf16 %v8355_v14, %v8354_v20  ;;  %v8292_v46 = vadd.f32 %v12594_v4, %v7903_v53  ;;  %v8129_v0 = vpop.f32.mrb[36].mxu1  ;;  %v7905_v49 = vpop.f32.mrb[37].mxu0 }
 0x4a9   :  { %8606 = vst [vmem:[#allocation14 + $0x10] sm:$0xff] %v9530_v19  ;;  %v8294_v5 = vadd.f32 %v12598_v2, %v8129_v0  ;;  %v8293_v30 = vadd.f32 %v12602_v15, %v7905_v49  ;;  %v8131_v13 = vpop.f32.mrb[37].mxu1  ;;  %v7907_v8 = vpop.f32.mrb[38].mxu0 }
 0x4aa   :  { %8607 = vst [vmem:[#allocation14 + $0x18] sm:$0xff] %v9531_v45  ;;  %v8356_v56 = vmax.f32 %v8292_v46, 0.0  ;;  %v8295_v21 = vadd.f32 %v12606_v43, %v8131_v13  ;;  %v8296_v63 = vadd.f32 %v12594_v4, %v7907_v8  ;;  %v8133_v55 = vpop.f32.mrb[38].mxu1  ;;  %v7909_v38 = vpop.f32.mrb[39].mxu0 }
 0x4ab   :  { %v8358_v10 = vmax.f32 %v8294_v5, 0.0  ;;  %v8357_v23 = vmax.f32 %v8293_v30, 0.0  ;;  %v8298_v57 = vadd.f32 %v12598_v2, %v8133_v55  ;;  %v8297_v29 = vadd.f32 %v12602_v15, %v7909_v38  ;;  %v8135_v24 = vpop.f32.mrb[39].mxu1 }
 0x4ac   :  { %v8359_v47 = vmax.f32 %v8295_v21, 0.0  ;;  %v8360_v40 = vmax.f32 %v8296_v63, 0.0  ;;  %v8299_v51 = vadd.f32 %v12606_v43, %v8135_v24 }
 0x4ad   :  { %v9532_v17 = vpack.c.bf16 %v8357_v23, %v8356_v56  ;;  %v8362_v41 = vmax.f32 %v8298_v57, 0.0  ;;  %v8361_v18 = vmax.f32 %v8297_v29, 0.0 }
 0x4ae   :  { %v9533_v26 = vpack.c.bf16 %v8359_v47, %v8358_v10  ;;  %v8363_v42 = vmax.f32 %v8299_v51, 0.0 }
 0x4af   :  { %8608 = vst [vmem:[#allocation14 + $0x20] sm:$0xff] %v9532_v17  ;;  %v9534_v31 = vpack.c.bf16 %v8361_v18, %v8360_v40  ;;  %v7913_v58 = vpop.f32.mrb[40].mxu0 }
 0x4b0   :  { %8609 = vst [vmem:[#allocation14 + $0x28] sm:$0xff] %v9533_v26  ;;  %v9535_v3 = vpack.c.bf16 %v8363_v42, %v8362_v41  ;;  %v8300_v7 = vadd.f32 %v12594_v4, %v7913_v58  ;;  %v8139_v32 = vpop.f32.mrb[40].mxu1  ;;  %v7915_v61 = vpop.f32.mrb[41].mxu0 }
 0x4b1   :  { %8610 = vst [vmem:[#allocation14 + $0x30] sm:$0xff] %v9534_v31  ;;  %v8302_v34 = vadd.f32 %v12598_v2, %v8139_v32  ;;  %v8301_v28 = vadd.f32 %v12602_v15, %v7915_v61  ;;  %v8141_v9 = vpop.f32.mrb[41].mxu1  ;;  %v7917_v52 = vpop.f32.mrb[42].mxu0 }
 0x4b2   :  { %8611 = vst [vmem:[#allocation14 + $0x38] sm:$0xff] %v9535_v3  ;;  %v8364_v33 = vmax.f32 %v8300_v7, 0.0  ;;  %v8303_v36 = vadd.f32 %v12606_v43, %v8141_v9  ;;  %v8304_v6 = vadd.f32 %v12594_v4, %v7917_v52  ;;  %v8143_v12 = vpop.f32.mrb[42].mxu1  ;;  %v7919_v59 = vpop.f32.mrb[43].mxu0 }
 0x4b3   :  { %v8366_v1 = vmax.f32 %v8302_v34, 0.0  ;;  %v8365_v16 = vmax.f32 %v8301_v28, 0.0  ;;  %v8306_v25 = vadd.f32 %v12598_v2, %v8143_v12  ;;  %v8305_v27 = vadd.f32 %v12602_v15, %v7919_v59  ;;  %v8145_v48 = vpop.f32.mrb[43].mxu1 }
 0x4b4   :  { %v8367_v22 = vmax.f32 %v8303_v36, 0.0  ;;  %v8368_v39 = vmax.f32 %v8304_v6, 0.0  ;;  %v8307_v37 = vadd.f32 %v12606_v43, %v8145_v48 }
 0x4b5   :  { %v9536_v11 = vpack.c.bf16 %v8365_v16, %v8364_v33  ;;  %v8370_v54 = vmax.f32 %v8306_v25, 0.0  ;;  %v8369_v44 = vmax.f32 %v8305_v27, 0.0 }
 0x4b6   :  { %v9537_v62 = vpack.c.bf16 %v8367_v22, %v8366_v1  ;;  %v8371_v35 = vmax.f32 %v8307_v37, 0.0 }
 0x4b7   :  { %8612 = vst [vmem:[#allocation14 + $0x40] sm:$0xff] %v9536_v11  ;;  %v9538_v20 = vpack.c.bf16 %v8369_v44, %v8368_v39  ;;  %v7923_v50 = vpop.f32.mrb[44].mxu0 }
 0x4b8   :  { %8613 = vst [vmem:[#allocation14 + $0x48] sm:$0xff] %v9537_v62  ;;  %v9539_v60 = vpack.c.bf16 %v8371_v35, %v8370_v54  ;;  %v8308_v14 = vadd.f32 %v12594_v4, %v7923_v50  ;;  %v8149_v19 = vpop.f32.mrb[44].mxu1  ;;  %v7925_v53 = vpop.f32.mrb[45].mxu0 }
 0x4b9   :  { %8614 = vst [vmem:[#allocation14 + $0x50] sm:$0xff] %v9538_v20  ;;  %v8310_v45 = vadd.f32 %v12598_v2, %v8149_v19  ;;  %v8309_v46 = vadd.f32 %v12602_v15, %v7925_v53  ;;  %v8151_v0 = vpop.f32.mrb[45].mxu1  ;;  %v7927_v49 = vpop.f32.mrb[46].mxu0 }
 0x4ba   :  { %8615 = vst [vmem:[#allocation14 + $0x58] sm:$0xff] %v9539_v60  ;;  %v8372_v5 = vmax.f32 %v8308_v14, 0.0  ;;  %v8311_v30 = vadd.f32 %v12606_v43, %v8151_v0  ;;  %v8312_v13 = vadd.f32 %v12594_v4, %v7927_v49  ;;  %v8153_v8 = vpop.f32.mrb[46].mxu1  ;;  %v7929_v56 = vpop.f32.mrb[47].mxu0 }
 0x4bb   :  { %v8374_v21 = vmax.f32 %v8310_v45, 0.0  ;;  %v8373_v63 = vmax.f32 %v8309_v46, 0.0  ;;  %v8314_v55 = vadd.f32 %v12598_v2, %v8153_v8  ;;  %v8313_v38 = vadd.f32 %v12602_v15, %v7929_v56  ;;  %v8155_v10 = vpop.f32.mrb[47].mxu1 }
 0x4bc   :  { %v8375_v23 = vmax.f32 %v8311_v30, 0.0  ;;  %v8376_v57 = vmax.f32 %v8312_v13, 0.0  ;;  %v8315_v29 = vadd.f32 %v12606_v43, %v8155_v10 }
 0x4bd   :  { %v9540_v24 = vpack.c.bf16 %v8373_v63, %v8372_v5  ;;  %v8378_v47 = vmax.f32 %v8314_v55, 0.0  ;;  %v8377_v40 = vmax.f32 %v8313_v38, 0.0 }
 0x4be   :  { %v9541_v51 = vpack.c.bf16 %v8375_v23, %v8374_v21  ;;  %v8379_v17 = vmax.f32 %v8315_v29, 0.0 }
 0x4bf   :  { %8616 = vst [vmem:[#allocation14 + $0x60] sm:$0xff] %v9540_v24  ;;  %v9542_v41 = vpack.c.bf16 %v8377_v40, %v8376_v57  ;;  %v7933_v18 = vpop.f32.mrb[48].mxu0 }
 0x4c0   :  { %8617 = vst [vmem:[#allocation14 + $0x68] sm:$0xff] %v9541_v51  ;;  %v9543_v26 = vpack.c.bf16 %v8379_v17, %v8378_v47  ;;  %v8316_v42 = vadd.f32 %v12594_v4, %v7933_v18  ;;  %v8159_v31 = vpop.f32.mrb[48].mxu1  ;;  %v7935_v58 = vpop.f32.mrb[49].mxu0 }
 0x4c1   :  { %8618 = vst [vmem:[#allocation14 + $0x70] sm:$0xff] %v9542_v41  ;;  %v8318_v3 = vadd.f32 %v12598_v2, %v8159_v31  ;;  %v8317_v7 = vadd.f32 %v12602_v15, %v7935_v58  ;;  %v8161_v32 = vpop.f32.mrb[49].mxu1  ;;  %v7937_v61 = vpop.f32.mrb[50].mxu0 }
 0x4c2   :  { %8619 = vst [vmem:[#allocation14 + $0x78] sm:$0xff] %v9543_v26  ;;  %v8380_v34 = vmax.f32 %v8316_v42, 0.0  ;;  %v8319_v28 = vadd.f32 %v12606_v43, %v8161_v32  ;;  %v8320_v9 = vadd.f32 %v12594_v4, %v7937_v61  ;;  %v8163_v52 = vpop.f32.mrb[50].mxu1  ;;  %v7939_v33 = vpop.f32.mrb[51].mxu0 }
 0x4c3   :  { %v8382_v36 = vmax.f32 %v8318_v3, 0.0  ;;  %v8381_v6 = vmax.f32 %v8317_v7, 0.0  ;;  %v8322_v12 = vadd.f32 %v12598_v2, %v8163_v52  ;;  %v8321_v59 = vadd.f32 %v12602_v15, %v7939_v33  ;;  %v8165_v1 = vpop.f32.mrb[51].mxu1 }
 0x4c4   :  { %v8383_v16 = vmax.f32 %v8319_v28, 0.0  ;;  %v8384_v25 = vmax.f32 %v8320_v9, 0.0  ;;  %v8323_v27 = vadd.f32 %v12606_v43, %v8165_v1 }
 0x4c5   :  { %v9544_v48 = vpack.c.bf16 %v8381_v6, %v8380_v34  ;;  %v8386_v22 = vmax.f32 %v8322_v12, 0.0  ;;  %v8385_v39 = vmax.f32 %v8321_v59, 0.0 }
 0x4c6   :  { %v9545_v37 = vpack.c.bf16 %v8383_v16, %v8382_v36  ;;  %v8387_v11 = vmax.f32 %v8323_v27, 0.0 }
 0x4c7   :  { %8620 = vst [vmem:[#allocation14 + $0x80] sm:$0xff] %v9544_v48  ;;  %v9546_v54 = vpack.c.bf16 %v8385_v39, %v8384_v25  ;;  %v7943_v44 = vpop.f32.mrb[52].mxu0 }
 0x4c8   :  { %8621 = vst [vmem:[#allocation14 + $0x88] sm:$0xff] %v9545_v37  ;;  %v9547_v62 = vpack.c.bf16 %v8387_v11, %v8386_v22  ;;  %v8324_v35 = vadd.f32 %v12594_v4, %v7943_v44  ;;  %v8169_v20 = vpop.f32.mrb[52].mxu1  ;;  %v7945_v50 = vpop.f32.mrb[53].mxu0 }
 0x4c9   :  { %8622 = vst [vmem:[#allocation14 + $0x90] sm:$0xff] %v9546_v54  ;;  %v8326_v60 = vadd.f32 %v12598_v2, %v8169_v20  ;;  %v8325_v14 = vadd.f32 %v12602_v15, %v7945_v50  ;;  %v8171_v19 = vpop.f32.mrb[53].mxu1  ;;  %v7947_v53 = vpop.f32.mrb[54].mxu0 }
 0x4ca   :  { %8623 = vst [vmem:[#allocation14 + $0x98] sm:$0xff] %v9547_v62  ;;  %v8388_v45 = vmax.f32 %v8324_v35, 0.0  ;;  %v8327_v46 = vadd.f32 %v12606_v43, %v8171_v19  ;;  %v8328_v0 = vadd.f32 %v12594_v4, %v7947_v53  ;;  %v8173_v49 = vpop.f32.mrb[54].mxu1  ;;  %v7949_v5 = vpop.f32.mrb[55].mxu0 }
 0x4cb   :  { %v8390_v30 = vmax.f32 %v8326_v60, 0.0  ;;  %v8389_v13 = vmax.f32 %v8325_v14, 0.0  ;;  %v8330_v8 = vadd.f32 %v12598_v2, %v8173_v49  ;;  %v8329_v56 = vadd.f32 %v12602_v15, %v7949_v5  ;;  %v8175_v21 = vpop.f32.mrb[55].mxu1 }
 0x4cc   :  { %v8391_v63 = vmax.f32 %v8327_v46, 0.0  ;;  %v8392_v55 = vmax.f32 %v8328_v0, 0.0  ;;  %v8331_v38 = vadd.f32 %v12606_v43, %v8175_v21 }
 0x4cd   :  { %v9548_v10 = vpack.c.bf16 %v8389_v13, %v8388_v45  ;;  %v8394_v23 = vmax.f32 %v8330_v8, 0.0  ;;  %v8393_v57 = vmax.f32 %v8329_v56, 0.0 }
 0x4ce   :  { %v9549_v29 = vpack.c.bf16 %v8391_v63, %v8390_v30  ;;  %v8395_v24 = vmax.f32 %v8331_v38, 0.0 }
 0x4cf   :  { %8624 = vst [vmem:[#allocation14 + $0xa0] sm:$0xff] %v9548_v10  ;;  %v9550_v47 = vpack.c.bf16 %v8393_v57, %v8392_v55  ;;  %v7953_v40 = vpop.f32.mrb[56].mxu0 }
 0x4d0   :  { %8625 = vst [vmem:[#allocation14 + $0xa8] sm:$0xff] %v9549_v29  ;;  %v9551_v51 = vpack.c.bf16 %v8395_v24, %v8394_v23  ;;  %v8332_v17 = vadd.f32 %v12594_v4, %v7953_v40  ;;  %v8179_v41 = vpop.f32.mrb[56].mxu1  ;;  %v7955_v18 = vpop.f32.mrb[57].mxu0 }
 0x4d1   :  { %8626 = vst [vmem:[#allocation14 + $0xb0] sm:$0xff] %v9550_v47  ;;  %v8334_v26 = vadd.f32 %v12598_v2, %v8179_v41  ;;  %v8333_v42 = vadd.f32 %v12602_v15, %v7955_v18  ;;  %v8181_v31 = vpop.f32.mrb[57].mxu1  ;;  %v7957_v58 = vpop.f32.mrb[58].mxu0 }
 0x4d2   :  { %8627 = vst [vmem:[#allocation14 + $0xb8] sm:$0xff] %v9551_v51  ;;  %v8396_v3 = vmax.f32 %v8332_v17, 0.0  ;;  %v8335_v7 = vadd.f32 %v12606_v43, %v8181_v31  ;;  %v8336_v32 = vadd.f32 %v12594_v4, %v7957_v58  ;;  %v8183_v61 = vpop.f32.mrb[58].mxu1  ;;  %v7959_v34 = vpop.f32.mrb[59].mxu0 }
 0x4d3   :  { %v8398_v28 = vmax.f32 %v8334_v26, 0.0  ;;  %v8397_v9 = vmax.f32 %v8333_v42, 0.0  ;;  %v8338_v52 = vadd.f32 %v12598_v2, %v8183_v61  ;;  %v8337_v33 = vadd.f32 %v12602_v15, %v7959_v34  ;;  %v8185_v36 = vpop.f32.mrb[59].mxu1 }
 0x4d4   :  { %v8399_v6 = vmax.f32 %v8335_v7, 0.0  ;;  %v8400_v12 = vmax.f32 %v8336_v32, 0.0  ;;  %v8339_v59 = vadd.f32 %v12606_v43, %v8185_v36 }
 0x4d5   :  { %v9552_v1 = vpack.c.bf16 %v8397_v9, %v8396_v3  ;;  %v8402_v16 = vmax.f32 %v8338_v52, 0.0  ;;  %v8401_v25 = vmax.f32 %v8337_v33, 0.0 }
 0x4d6   :  { %v9553_v27 = vpack.c.bf16 %v8399_v6, %v8398_v28  ;;  %v8403_v48 = vmax.f32 %v8339_v59, 0.0 }
 0x4d7   :  { %8628 = vst [vmem:[#allocation14 + $0xc0] sm:$0xff] %v9552_v1  ;;  %v9554_v22 = vpack.c.bf16 %v8401_v25, %v8400_v12  ;;  %v7963_v39 = vpop.f32.mrb[60].mxu0 }
 0x4d8   :  { %8629 = vst [vmem:[#allocation14 + $0xc8] sm:$0xff] %v9553_v27  ;;  %v9555_v37 = vpack.c.bf16 %v8403_v48, %v8402_v16  ;;  %v8340_v11 = vadd.f32 %v12594_v4, %v7963_v39  ;;  %v8189_v54 = vpop.f32.mrb[60].mxu1  ;;  %v7965_v44 = vpop.f32.mrb[61].mxu0 }
 0x4d9   :  { %8630 = vst [vmem:[#allocation14 + $0xd0] sm:$0xff] %v9554_v22  ;;  %v8342_v62 = vadd.f32 %v12598_v2, %v8189_v54  ;;  %v8341_v35 = vadd.f32 %v12602_v15, %v7965_v44  ;;  %v8191_v20 = vpop.f32.mrb[61].mxu1  ;;  %v7967_v50 = vpop.f32.mrb[62].mxu0 }
 0x4da   :  { %8631 = vst [vmem:[#allocation14 + $0xd8] sm:$0xff] %v9555_v37  ;;  %v8404_v60 = vmax.f32 %v8340_v11, 0.0  ;;  %v8343_v14 = vadd.f32 %v12606_v43, %v8191_v20  ;;  %v8344_v19 = vadd.f32 %v12594_v4, %v7967_v50  ;;  %v8193_v53 = vpop.f32.mrb[62].mxu1  ;;  %v7969_v45 = vpop.f32.mrb[63].mxu0 }
 0x4db   :  { %v8406_v46 = vmax.f32 %v8342_v62, 0.0  ;;  %v8405_v0 = vmax.f32 %v8341_v35, 0.0  ;;  %v8346_v49 = vadd.f32 %v12598_v2, %v8193_v53  ;;  %v8345_v5 = vadd.f32 %v12602_v15, %v7969_v45  ;;  %v8195_v30 = vpop.f32.mrb[63].mxu1 }
 0x4dc   :  { %v8407_v13 = vmax.f32 %v8343_v14, 0.0  ;;  %v8408_v8 = vmax.f32 %v8344_v19, 0.0  ;;  %v8347_v56 = vadd.f32 %v12606_v43, %v8195_v30 }
 0x4dd   :  { %v9556_v21 = vpack.c.bf16 %v8405_v0, %v8404_v60  ;;  %v8410_v63 = vmax.f32 %v8346_v49, 0.0  ;;  %v8409_v55 = vmax.f32 %v8345_v5, 0.0 }
 0x4de   :  { %v9557_v38 = vpack.c.bf16 %v8407_v13, %v8406_v46  ;;  %v8411_v4 = vmax.f32 %v8347_v56, 0.0 }
 0x4df   :  { %8632 = vst [vmem:[#allocation14 + $0xe0] sm:$0xff] %v9556_v21  ;;  %v9558_v10 = vpack.c.bf16 %v8409_v55, %v8408_v8 }
 0x4e0   :  { %8633 = vst [vmem:[#allocation14 + $0xe8] sm:$0xff] %v9557_v38  ;;  %v9559_v23 = vpack.c.bf16 %v8411_v4, %v8410_v63 }
 0x4e1   :  { %8634 = vst [vmem:[#allocation14 + $0xf0] sm:$0xff] %v9558_v10 }
 0x4e2   :  { %8635 = vst [vmem:[#allocation14 + $0xf8] sm:$0xff] %v9559_v23 }
 0x4e3   :  { %11230 = shalt.err (!%p11227_p10)
}
 0x4e4   :  { %s11231_s24 = scalar_lea.hbm %s12693_s6, 4096 }
 0x4e5   :  { %p11232_p11 = scmp.ne.s32.totalorder %s12693_s6, %s11231_s24  ;;  %p11235_p12 = scmp.lt.u32.totalorder %s11231_s24, %s12693_s6 }
 0x4e7   :  { %p11237_p13 = pnand %p11235_p12, %p11232_p11 }
 0x4e9   :  { %11240 = shalt.err (!%p11237_p13)
}
 0x4ea   :  { %8647 = dma.vmem_to_hbm [thread:$0]  %s8642_s22, 4096, %s12693_s6, [#allocation5], %s11252_s7, %s11252_s7, %s11253_s8  }
 0x4eb   :  { %11249 = dma.done.wait [#allocation5], 4096  }
 0x4ec   :  { %11250 = vsyncadd [#allocation5], 4294963200 }
 0x4ed   :  { %8651 = vsyncpa [#allocation4], 1 }
 0x4ee   :  { %8652 = vsyncpa [#allocation7], 1 }
 0x4ef   :  { %8653 = vsyncpa [#allocation10], 1 }
 0x4f0   :  { %8654 = vsyncpa [#allocation13], 1 }
 0x4f1   :  { %8655 = vsyncpa [#allocation5], 1 }

</bundles_post_ra>
